<compile_context>
chip_gen: v7x
topology: tpu7x:2x2x1
jax: 0.10.0
libtpu: 0.0.40
codegen_flags: <defaults>
</compile_context>

<pallas_src>
import functools

import jax
import jax.numpy as jnp
import numpy as np
from jax import lax
from jax.experimental import pallas as pl
from jax.experimental.pallas import tpu as pltpu


# ----------------------------- Pallas kernel --------------------------------
def _point_to_sparse_kernel(x_ref, w1_ref, c1_ref, w2_ref, c2_ref, o_ref,
                            *, n_stk, n_stk_pnt):
    # x_ref : (Bt, Cin, Lp)  bf16, valid lanes [0, L+4) (edge-padded sequence)
    # w1_ref: (3, mid, Cin)  bf16, BN-scale folded, per-tap (out, in) layout
    # c1_ref: (mid, 1)       f32 folded bias ; w2_ref/c2_ref analogous
    # o_ref : (Bt, cout, n_stk) f32
    bt, cin, _ = x_ref.shape
    mid = w1_ref.shape[1]
    cout = w2_ref.shape[1]
    l_out = n_stk * n_stk_pnt          # conv2 output length (== L)
    l_mid = l_out + 2                  # conv1 output length

    x = x_ref[...]                     # (Bt, Cin, Lp) bf16

    # ---- conv1 (+ folded BN bias): 3 per-tap batched matmuls, f32 accumulate.
    # Taps are static lane slices; K=Cin is tiny but the MXU has huge slack.
    h1 = None
    for t in range(3):
        x_t = x[:, :, t:t + l_mid]                                   # (Bt,Cin,L+2)
        w_t = jnp.broadcast_to(w1_ref[t][None], (bt, mid, cin))      # (Bt,mid,Cin)
        term = jnp.einsum("bmc,bcl->bml", w_t, x_t,
                          preferred_element_type=jnp.float32)
        h1 = term if h1 is None else h1 + term
    h1 = h1 + c1_ref[...]              # (mid,1) broadcasts over (Bt, mid, L+2)
    h1 = h1 * jax.nn.sigmoid(h1)       # SiLU in f32 (v5e-safe)
    h1 = h1.astype(w2_ref.dtype)       # bf16 operands for the second MXU pass

    # ---- conv2 (+ folded BN bias): same per-tap structure, lane-dense (L=128)
    h2 = None
    for t in range(3):
        h_t = h1[:, :, t:t + l_out]                                  # (Bt,mid,L)
        w_t = jnp.broadcast_to(w2_ref[t][None], (bt, cout, mid))     # (Bt,cout,mid)
        term = jnp.einsum("bom,bml->bol", w_t, h_t,
                          preferred_element_type=jnp.float32)
        h2 = term if h2 is None else h2 + term
    h2 = h2 + c2_ref[...]
    h2 = h2 * jax.nn.sigmoid(h2)       # (Bt, cout, L) f32, lane-dense

    # ---- max over the points of each stroke.
    # One contiguous lane-slice reduction + narrow store per stroke; avoids a
    # lane->sublane reshape of h2 (which Mosaic may not lower cheaply).
    for g in range(n_stk):
        seg = h2[:, :, g * n_stk_pnt:(g + 1) * n_stk_pnt]            # (Bt,cout,pnt)
        o_ref[:, :, g:g + 1] = jnp.max(seg, axis=-1, keepdims=True)


# ----------------------------- wrapper helpers -------------------------------
def _round_up(x, m):
    return (x + m - 1) // m * m


def _fold_bn_into_weights(w, b, bn, eps=1e-5):
    """Fold conv bias + eval-mode BatchNorm into the weights/bias.

    w: (3, c_in, c_out) with w[k, i, o] == torch Conv1d weight[o, i, k].
    Returns (w_folded (3, c_out, c_in) bf16, bias (c_out, 1) f32).
    """
    gamma, beta, mean, var = bn
    s = gamma / jnp.sqrt(var + eps)                       # (c_out,)
    w_f = jnp.transpose(w * s[None, None, :], (0, 2, 1))  # scale out-chan, (k,o,i)
    c = (s * (b - mean) + beta).reshape(-1, 1)
    return w_f.astype(jnp.bfloat16), c.astype(jnp.float32)


def _num_tensorcores():
    """2 TensorCores on megacore (v4/v5p) and v7x parts; 1 elsewhere."""
    try:
        kind = jax.devices()[0].device_kind.lower()
    except Exception:
        return 1
    return 2 if any(tag in kind for tag in ("v4", "v5p", "v7", "7x")) else 1


def _per_elem_vmem_bytes(cin, mid, cout, seq_len):
    """Lane/sublane-padded VMEM footprint per batch element (rough)."""
    lp = _round_up(seq_len + 4, 128)
    l2p = _round_up(seq_len + 2, 128)
    lvp = _round_up(seq_len, 128)
    b = 0
    b += _round_up(cin, 8) * lp * 2 * 2        # x tile bf16, double-buffered
    b += _round_up(cin, 8) * l2p * 2 * 3       # conv1 tap slices (transient)
    b += _round_up(mid, 8) * l2p * (4 + 2)     # h1 f32 + bf16 copy
    b += _round_up(mid, 8) * l2p * 2 * 3       # conv2 tap slices
    b += _round_up(cout, 8) * lvp * 4 * 2      # h2 f32 + activation temp
    b += _round_up(cout, 8) * 128 * 4 * 2      # output tile (lane-padded), x2 buf
    return b


def _plan_batch(bs, per_elem_bytes, *, vmem_budget_bytes=16 << 20, num_cores=1):
    """Pick (b_tile, bs_pad, n_steps): b_tile multiple of 8, sized by the
    lane-padded VMEM budget (conservative across v5e/v6e/v7x), with at least
    `num_cores` grid steps so all TensorCores get work."""
    cap = max(8, int(vmem_budget_bytes / (per_elem_bytes * 1.5)) // 8 * 8)
    b_tile = min(_round_up(bs, 8), cap)
    n_steps = max(num_cores, -(-bs // b_tile))
    return b_tile, b_tile * n_steps, n_steps


# ----------------------------- forward ---------------------------------------
@jax.jit
def point_to_sparse_forward(xy, params):
    """xy: [bs, n_stk, n_stk_pnt, point_dim]  ->  [bs, sparse_out, n_stk]"""
    bs, n_stk, n_stk_pnt, cin = xy.shape
    seq_len = n_stk * n_stk_pnt

    w1, b1, bn1, w2, b2, bn2 = params
    mid = w1.shape[2]
    cout = w2.shape[2]

    # glue: 'b s sp c -> b c (s sp)', then eu.sequence_extend(x, 2) (edge pad).
    x = jnp.transpose(xy.reshape(bs, seq_len, cin), (0, 2, 1)).astype(jnp.float32)
    x = jnp.pad(x, ((0, 0), (0, 0), (2, 2)), mode="edge")     # (bs, cin, L+4)
    lp = _round_up(seq_len + 4, 128)                           # lane-pad sequence
    x = jnp.pad(x, ((0, 0), (0, 0), (0, lp - (seq_len + 4))))
    x = x.astype(jnp.bfloat16)

    # Fold conv bias + eval BN into weights (f32) before the bf16 cast.
    w1f, c1 = _fold_bn_into_weights(w1, b1, bn1)
    w2f, c2 = _fold_bn_into_weights(w2, b2, bn2)

    b_tile, bs_pad, n_steps = _plan_batch(
        bs, _per_elem_vmem_bytes(cin, mid, cout, seq_len),
        num_cores=_num_tensorcores())
    if bs_pad != bs:
        x = jnp.pad(x, ((0, bs_pad - bs), (0, 0), (0, 0)))

    grid_spec = pltpu.PrefetchScalarGridSpec(
        num_scalar_prefetch=0,
        grid=(n_steps,),
        in_specs=[
            # NOTE: add pipeline_mode=pl.Buffered(3) here if xprof shows exposed
            # input DMA at large batch tiles.
            pl.BlockSpec((b_tile, cin, lp), lambda b: (b, 0, 0)),
            pl.BlockSpec(w1f.shape, lambda b: (0, 0, 0)),
            pl.BlockSpec(c1.shape, lambda b: (0, 0)),
            pl.BlockSpec(w2f.shape, lambda b: (0, 0, 0)),
            pl.BlockSpec(c2.shape, lambda b: (0, 0)),
        ],
        out_specs=pl.BlockSpec((b_tile, cout, n_stk), lambda b: (b, 0, 0)),
    )

    out = pl.pallas_call(
        functools.partial(_point_to_sparse_kernel,
                          n_stk=n_stk, n_stk_pnt=n_stk_pnt),
        out_shape=jax.ShapeDtypeStruct((bs_pad, cout, n_stk), jnp.float32),
        grid_spec=grid_spec,
        compiler_params=pltpu.CompilerParams(
            dimension_semantics=("parallel",),
            vmem_limit_bytes=32 * 1024 * 1024),
    )(x, w1f, c1, w2f, c2)

    # Output is already in the module's [bs, emb, n_stk] layout.
    return out[:bs]


# ----------------------------- pure-JAX reference ---------------------------
def reference_forward(xy, params):
    w1, b1, bn1, w2, b2, bn2 = params
    bs, n_stk, n_stk_pnt, c = xy.shape
    L = n_stk * n_stk_pnt
    x = jnp.transpose(xy, (0, 3, 1, 2)).reshape(bs, c, L).astype(jnp.float32)
    x = jnp.pad(x, ((0, 0), (0, 0), (2, 2)), mode="edge")

    def conv_bn_act(x, w, b, bn):
        gamma, beta, mean, var = bn
        w_oik = jnp.transpose(w, (2, 1, 0))           # [out, in, k]
        y = lax.conv_general_dilated(
            x, w_oik, (1,), "VALID",
            dimension_numbers=("NCH", "OIH", "NCH"))
        y = y + b[None, :, None]
        y = (y - mean[None, :, None]) / jnp.sqrt(var[None, :, None] + 1e-5)
        y = y * gamma[None, :, None] + beta[None, :, None]
        return jax.nn.silu(y)

    y = conv_bn_act(x, w1, b1, bn1)
    y = conv_bn_act(y, w2, b2, bn2)
    y = y.reshape(bs, -1, n_stk, n_stk_pnt)
    return jnp.max(y, axis=3)


# ----------------------------- parameter init --------------------------------
def init_params(key, point_dim, sparse_out):
    mid = int((point_dim * sparse_out) ** 0.5)
    ks = jax.random.split(key, 10)
    w1 = 0.3 * jax.random.normal(ks[0], (3, point_dim, mid), jnp.float32)
    b1 = 0.1 * jax.random.normal(ks[1], (mid,), jnp.float32)
    bn1 = (1.0 + 0.1 * jax.random.normal(ks[2], (mid,), jnp.float32),   # gamma
           0.05 * jax.random.normal(ks[3], (mid,), jnp.float32),        # beta
           0.05 * jax.random.normal(ks[4], (mid,), jnp.float32),        # running_mean
           0.5 + jax.random.uniform(ks[5], (mid,), jnp.float32))        # running_var
    w2 = 0.3 * jax.random.normal(ks[6], (3, mid, sparse_out), jnp.float32)
    b2 = 0.1 * jax.random.normal(ks[7], (sparse_out,), jnp.float32)
    bn2 = (1.0 + 0.1 * jax.random.normal(ks[8], (sparse_out,), jnp.float32),
           0.05 * jax.random.normal(ks[9], (sparse_out,), jnp.float32),
           0.05 * jax.random.normal(ks[4], (sparse_out,), jnp.float32),
           0.5 + jax.random.uniform(ks[5], (sparse_out,), jnp.float32))
    return (w1, b1, bn1, w2, b2, bn2)


if __name__ == "__main__":
    key = jax.random.PRNGKey(0)
    k_x, k_p = jax.random.split(key)

    bs, n_stk, n_stk_pnt, point_dim = 2, 8, 16, 2
    sparse_out = 32

    xy = jax.random.normal(k_x, (bs, n_stk, n_stk_pnt, point_dim), jnp.float32)
    params = init_params(k_p, point_dim, sparse_out)

    out = jax.block_until_ready(point_to_sparse_forward(xy, params))
    ref = jax.block_until_ready(reference_forward(xy, params))

    assert out.shape == (bs, sparse_out, n_stk), out.shape
    # bf16 matmul operands (f32 accumulate) -> loose tolerance.
    np.testing.assert_allclose(np.asarray(out), np.asarray(ref),
                               rtol=2e-2, atol=2e-2)
    print("KERNEL_OK")
</pallas_src>

<mosaic_0001>
module attributes {stable_mosaic.version = 11 : i64} {
  func.func @_point_to_sparse_kernel(%arg0: i32, %arg1: memref<8x2x256xbf16, #tpu.memory_space<vmem>>, %arg2: memref<3x8x2xbf16, #tpu.memory_space<vmem>>, %arg3: memref<8x1xf32, #tpu.memory_space<vmem>>, %arg4: memref<3x32x8xbf16, #tpu.memory_space<vmem>>, %arg5: memref<32x1xf32, #tpu.memory_space<vmem>>, %arg6: memref<8x32x8xf32, #tpu.memory_space<vmem>>) attributes {dimension_semantics = [#tpu.dimension_semantics<parallel>], iteration_bounds = array<i64: 1>, scalar_prefetch = 0 : i64, scratch_operands = 0 : i64, tpu.core_type = #tpu.core_type<tc>, window_params = [{transform_indices = @transform_0, window_bounds = array<i64: 8, 2, 256>}, {pipeline_mode = #tpu.pipeline_mode<synchronous>, transform_indices = @transform_1, window_bounds = array<i64: 3, 8, 2>}, {pipeline_mode = #tpu.pipeline_mode<synchronous>, transform_indices = @transform_2, window_bounds = array<i64: 8, 1>}, {pipeline_mode = #tpu.pipeline_mode<synchronous>, transform_indices = @transform_3, window_bounds = array<i64: 3, 32, 8>}, {pipeline_mode = #tpu.pipeline_mode<synchronous>, transform_indices = @transform_4, window_bounds = array<i64: 32, 1>}, {transform_indices = @transform_5, window_bounds = array<i64: 8, 32, 8>}]} {
    %c0 = arith.constant 0 : index
    %c0_0 = arith.constant 0 : index
    %c0_1 = arith.constant 0 : index
    %0 = vector.load %arg1[%c0, %c0_0, %c0_1] : memref<8x2x256xbf16, #tpu.memory_space<vmem>>, vector<8x2x256xbf16>
    %1 = vector.extract_strided_slice %0 {offsets = [0, 0, 0], sizes = [8, 2, 130], strides = [1, 1, 1]} : vector<8x2x256xbf16> to vector<8x2x130xbf16>
    %c0_2 = arith.constant 0 : index
    %c0_3 = arith.constant 0 : index
    %c0_4 = arith.constant 0 : index
    %2 = vector.load %arg2[%c0_2, %c0_3, %c0_4] : memref<3x8x2xbf16, #tpu.memory_space<vmem>>, vector<1x8x2xbf16>
    %3 = vector.shape_cast %2 : vector<1x8x2xbf16> to vector<8x2xbf16>
    %4 = vector.shape_cast %3 : vector<8x2xbf16> to vector<1x8x2xbf16>
    %5 = vector.shape_cast %4 : vector<1x8x2xbf16> to vector<1x8x2xbf16>
    %6 = vector.broadcast %5 : vector<1x8x2xbf16> to vector<8x8x2xbf16>
    "tpu.trace_start"() <{level = 10 : i32, message = "bmc,bcl->bml"}> : () -> ()
    %cst = arith.constant dense<0.000000e+00> : vector<8x8x130xf32>
    %7 = tpu.matmul %6, %1, %cst {dimension_numbers = #tpu.dot_dimension_numbers<[2], [1], [1], [2], [0, 0, 0, 1, 1, 2], [0], [0]>} : vector<8x8x2xbf16>, vector<8x2x130xbf16>, vector<8x8x130xf32> -> vector<8x8x130xf32>
    "tpu.trace_stop"() : () -> ()
    %8 = vector.extract_strided_slice %0 {offsets = [0, 0, 1], sizes = [8, 2, 130], strides = [1, 1, 1]} : vector<8x2x256xbf16> to vector<8x2x130xbf16>
    %c1 = arith.constant 1 : index
    %c0_5 = arith.constant 0 : index
    %c0_6 = arith.constant 0 : index
    %9 = vector.load %arg2[%c1, %c0_5, %c0_6] : memref<3x8x2xbf16, #tpu.memory_space<vmem>>, vector<1x8x2xbf16>
    %10 = vector.shape_cast %9 : vector<1x8x2xbf16> to vector<8x2xbf16>
    %11 = vector.shape_cast %10 : vector<8x2xbf16> to vector<1x8x2xbf16>
    %12 = vector.shape_cast %11 : vector<1x8x2xbf16> to vector<1x8x2xbf16>
    %13 = vector.broadcast %12 : vector<1x8x2xbf16> to vector<8x8x2xbf16>
    "tpu.trace_start"() <{level = 10 : i32, message = "bmc,bcl->bml"}> : () -> ()
    %cst_7 = arith.constant dense<0.000000e+00> : vector<8x8x130xf32>
    %14 = tpu.matmul %13, %8, %cst_7 {dimension_numbers = #tpu.dot_dimension_numbers<[2], [1], [1], [2], [0, 0, 0, 1, 1, 2], [0], [0]>} : vector<8x8x2xbf16>, vector<8x2x130xbf16>, vector<8x8x130xf32> -> vector<8x8x130xf32>
    "tpu.trace_stop"() : () -> ()
    %15 = arith.addf %7, %14 : vector<8x8x130xf32>
    %16 = vector.extract_strided_slice %0 {offsets = [0, 0, 2], sizes = [8, 2, 130], strides = [1, 1, 1]} : vector<8x2x256xbf16> to vector<8x2x130xbf16>
    %c2 = arith.constant 2 : index
    %c0_8 = arith.constant 0 : index
    %c0_9 = arith.constant 0 : index
    %17 = vector.load %arg2[%c2, %c0_8, %c0_9] : memref<3x8x2xbf16, #tpu.memory_space<vmem>>, vector<1x8x2xbf16>
    %18 = vector.shape_cast %17 : vector<1x8x2xbf16> to vector<8x2xbf16>
    %19 = vector.shape_cast %18 : vector<8x2xbf16> to vector<1x8x2xbf16>
    %20 = vector.shape_cast %19 : vector<1x8x2xbf16> to vector<1x8x2xbf16>
    %21 = vector.broadcast %20 : vector<1x8x2xbf16> to vector<8x8x2xbf16>
    "tpu.trace_start"() <{level = 10 : i32, message = "bmc,bcl->bml"}> : () -> ()
    %cst_10 = arith.constant dense<0.000000e+00> : vector<8x8x130xf32>
    %22 = tpu.matmul %21, %16, %cst_10 {dimension_numbers = #tpu.dot_dimension_numbers<[2], [1], [1], [2], [0, 0, 0, 1, 1, 2], [0], [0]>} : vector<8x8x2xbf16>, vector<8x2x130xbf16>, vector<8x8x130xf32> -> vector<8x8x130xf32>
    "tpu.trace_stop"() : () -> ()
    %23 = arith.addf %15, %22 : vector<8x8x130xf32>
    %c0_11 = arith.constant 0 : index
    %c0_12 = arith.constant 0 : index
    %24 = vector.load %arg3[%c0_11, %c0_12] : memref<8x1xf32, #tpu.memory_space<vmem>>, vector<8x1xf32>
    %25 = vector.shape_cast %24 : vector<8x1xf32> to vector<1x8x1xf32>
    %26 = vector.broadcast %25 : vector<1x8x1xf32> to vector<8x8x130xf32>
    %27 = arith.addf %23, %26 : vector<8x8x130xf32>
    %28 = arith.negf %27 : vector<8x8x130xf32>
    %29 = math.exp %28 : vector<8x8x130xf32>
    %cst_13 = arith.constant 1.000000e+00 : f32
    %30 = vector.broadcast %cst_13 : f32 to vector<8x8x130xf32>
    %31 = arith.addf %30, %29 : vector<8x8x130xf32>
    %32 = arith.divf %30, %31 : vector<8x8x130xf32>
    %33 = arith.mulf %27, %32 : vector<8x8x130xf32>
    %34 = arith.truncf %33 : vector<8x8x130xf32> to vector<8x8x130xbf16>
    %35 = vector.extract_strided_slice %34 {offsets = [0, 0, 0], sizes = [8, 8, 128], strides = [1, 1, 1]} : vector<8x8x130xbf16> to vector<8x8x128xbf16>
    %c0_14 = arith.constant 0 : index
    %c0_15 = arith.constant 0 : index
    %c0_16 = arith.constant 0 : index
    %36 = vector.load %arg4[%c0_14, %c0_15, %c0_16] : memref<3x32x8xbf16, #tpu.memory_space<vmem>>, vector<1x32x8xbf16>
    %37 = vector.shape_cast %36 : vector<1x32x8xbf16> to vector<32x8xbf16>
    %38 = vector.shape_cast %37 : vector<32x8xbf16> to vector<1x32x8xbf16>
    %39 = vector.shape_cast %38 : vector<1x32x8xbf16> to vector<1x32x8xbf16>
    %40 = vector.broadcast %39 : vector<1x32x8xbf16> to vector<8x32x8xbf16>
    "tpu.trace_start"() <{level = 10 : i32, message = "bom,bml->bol"}> : () -> ()
    %cst_17 = arith.constant dense<0.000000e+00> : vector<8x32x128xf32>
    %41 = tpu.matmul %40, %35, %cst_17 {dimension_numbers = #tpu.dot_dimension_numbers<[2], [1], [1], [2], [0, 0, 0, 1, 1, 2], [0], [0]>} : vector<8x32x8xbf16>, vector<8x8x128xbf16>, vector<8x32x128xf32> -> vector<8x32x128xf32>
    "tpu.trace_stop"() : () -> ()
    %42 = vector.extract_strided_slice %34 {offsets = [0, 0, 1], sizes = [8, 8, 128], strides = [1, 1, 1]} : vector<8x8x130xbf16> to vector<8x8x128xbf16>
    %c1_18 = arith.constant 1 : index
    %c0_19 = arith.constant 0 : index
    %c0_20 = arith.constant 0 : index
    %43 = vector.load %arg4[%c1_18, %c0_19, %c0_20] : memref<3x32x8xbf16, #tpu.memory_space<vmem>>, vector<1x32x8xbf16>
    %44 = vector.shape_cast %43 : vector<1x32x8xbf16> to vector<32x8xbf16>
    %45 = vector.shape_cast %44 : vector<32x8xbf16> to vector<1x32x8xbf16>
    %46 = vector.shape_cast %45 : vector<1x32x8xbf16> to vector<1x32x8xbf16>
    %47 = vector.broadcast %46 : vector<1x32x8xbf16> to vector<8x32x8xbf16>
    "tpu.trace_start"() <{level = 10 : i32, message = "bom,bml->bol"}> : () -> ()
    %cst_21 = arith.constant dense<0.000000e+00> : vector<8x32x128xf32>
    %48 = tpu.matmul %47, %42, %cst_21 {dimension_numbers = #tpu.dot_dimension_numbers<[2], [1], [1], [2], [0, 0, 0, 1, 1, 2], [0], [0]>} : vector<8x32x8xbf16>, vector<8x8x128xbf16>, vector<8x32x128xf32> -> vector<8x32x128xf32>
    "tpu.trace_stop"() : () -> ()
    %49 = arith.addf %41, %48 : vector<8x32x128xf32>
    %50 = vector.extract_strided_slice %34 {offsets = [0, 0, 2], sizes = [8, 8, 128], strides = [1, 1, 1]} : vector<8x8x130xbf16> to vector<8x8x128xbf16>
    %c2_22 = arith.constant 2 : index
    %c0_23 = arith.constant 0 : index
    %c0_24 = arith.constant 0 : index
    %51 = vector.load %arg4[%c2_22, %c0_23, %c0_24] : memref<3x32x8xbf16, #tpu.memory_space<vmem>>, vector<1x32x8xbf16>
    %52 = vector.shape_cast %51 : vector<1x32x8xbf16> to vector<32x8xbf16>
    %53 = vector.shape_cast %52 : vector<32x8xbf16> to vector<1x32x8xbf16>
    %54 = vector.shape_cast %53 : vector<1x32x8xbf16> to vector<1x32x8xbf16>
    %55 = vector.broadcast %54 : vector<1x32x8xbf16> to vector<8x32x8xbf16>
    "tpu.trace_start"() <{level = 10 : i32, message = "bom,bml->bol"}> : () -> ()
    %cst_25 = arith.constant dense<0.000000e+00> : vector<8x32x128xf32>
    %56 = tpu.matmul %55, %50, %cst_25 {dimension_numbers = #tpu.dot_dimension_numbers<[2], [1], [1], [2], [0, 0, 0, 1, 1, 2], [0], [0]>} : vector<8x32x8xbf16>, vector<8x8x128xbf16>, vector<8x32x128xf32> -> vector<8x32x128xf32>
    "tpu.trace_stop"() : () -> ()
    %57 = arith.addf %49, %56 : vector<8x32x128xf32>
    %c0_26 = arith.constant 0 : index
    %c0_27 = arith.constant 0 : index
    %58 = vector.load %arg5[%c0_26, %c0_27] : memref<32x1xf32, #tpu.memory_space<vmem>>, vector<32x1xf32>
    %59 = vector.shape_cast %58 : vector<32x1xf32> to vector<1x32x1xf32>
    %60 = vector.broadcast %59 : vector<1x32x1xf32> to vector<8x32x128xf32>
    %61 = arith.addf %57, %60 : vector<8x32x128xf32>
    %62 = arith.negf %61 : vector<8x32x128xf32>
    %63 = math.exp %62 : vector<8x32x128xf32>
    %cst_28 = arith.constant 1.000000e+00 : f32
    %64 = vector.broadcast %cst_28 : f32 to vector<8x32x128xf32>
    %65 = arith.addf %64, %63 : vector<8x32x128xf32>
    %66 = arith.divf %64, %65 : vector<8x32x128xf32>
    %67 = arith.mulf %61, %66 : vector<8x32x128xf32>
    %68 = vector.extract_strided_slice %67 {offsets = [0, 0, 0], sizes = [8, 32, 16], strides = [1, 1, 1]} : vector<8x32x128xf32> to vector<8x32x16xf32>
    %cst_29 = arith.constant dense<0xFF800000> : vector<8x32xf32>
    %69 = vector.multi_reduction <maximumf>, %68, %cst_29 [2] : vector<8x32x16xf32> to vector<8x32xf32>
    %70 = vector.shape_cast %69 : vector<8x32xf32> to vector<8x32x1xf32>
    %c0_30 = arith.constant 0 : index
    %c0_31 = arith.constant 0 : index
    %c0_32 = arith.constant 0 : index
    %71 = vector.load %arg6[%c0_30, %c0_31, %c0_32] : memref<8x32x8xf32, #tpu.memory_space<vmem>>, vector<8x32x1xf32>
    tpu.vector_store %arg6[%c0_30, %c0_31, %c0_32], %70 {strides = array<i32>} : memref<8x32x8xf32, #tpu.memory_space<vmem>>, vector<8x32x1xf32>,
    %72 = vector.extract_strided_slice %67 {offsets = [0, 0, 16], sizes = [8, 32, 16], strides = [1, 1, 1]} : vector<8x32x128xf32> to vector<8x32x16xf32>
    %cst_33 = arith.constant dense<0xFF800000> : vector<8x32xf32>
    %73 = vector.multi_reduction <maximumf>, %72, %cst_33 [2] : vector<8x32x16xf32> to vector<8x32xf32>
    %74 = vector.shape_cast %73 : vector<8x32xf32> to vector<8x32x1xf32>
    %c0_34 = arith.constant 0 : index
    %c0_35 = arith.constant 0 : index
    %c1_36 = arith.constant 1 : index
    %75 = vector.load %arg6[%c0_34, %c0_35, %c1_36] : memref<8x32x8xf32, #tpu.memory_space<vmem>>, vector<8x32x1xf32>
    tpu.vector_store %arg6[%c0_34, %c0_35, %c1_36], %74 {strides = array<i32>} : memref<8x32x8xf32, #tpu.memory_space<vmem>>, vector<8x32x1xf32>,
    %76 = vector.extract_strided_slice %67 {offsets = [0, 0, 32], sizes = [8, 32, 16], strides = [1, 1, 1]} : vector<8x32x128xf32> to vector<8x32x16xf32>
    %cst_37 = arith.constant dense<0xFF800000> : vector<8x32xf32>
    %77 = vector.multi_reduction <maximumf>, %76, %cst_37 [2] : vector<8x32x16xf32> to vector<8x32xf32>
    %78 = vector.shape_cast %77 : vector<8x32xf32> to vector<8x32x1xf32>
    %c0_38 = arith.constant 0 : index
    %c0_39 = arith.constant 0 : index
    %c2_40 = arith.constant 2 : index
    %79 = vector.load %arg6[%c0_38, %c0_39, %c2_40] : memref<8x32x8xf32, #tpu.memory_space<vmem>>, vector<8x32x1xf32>
    tpu.vector_store %arg6[%c0_38, %c0_39, %c2_40], %78 {strides = array<i32>} : memref<8x32x8xf32, #tpu.memory_space<vmem>>, vector<8x32x1xf32>,
    %80 = vector.extract_strided_slice %67 {offsets = [0, 0, 48], sizes = [8, 32, 16], strides = [1, 1, 1]} : vector<8x32x128xf32> to vector<8x32x16xf32>
    %cst_41 = arith.constant dense<0xFF800000> : vector<8x32xf32>
    %81 = vector.multi_reduction <maximumf>, %80, %cst_41 [2] : vector<8x32x16xf32> to vector<8x32xf32>
    %82 = vector.shape_cast %81 : vector<8x32xf32> to vector<8x32x1xf32>
    %c0_42 = arith.constant 0 : index
    %c0_43 = arith.constant 0 : index
    %c3 = arith.constant 3 : index
    %83 = vector.load %arg6[%c0_42, %c0_43, %c3] : memref<8x32x8xf32, #tpu.memory_space<vmem>>, vector<8x32x1xf32>
    tpu.vector_store %arg6[%c0_42, %c0_43, %c3], %82 {strides = array<i32>} : memref<8x32x8xf32, #tpu.memory_space<vmem>>, vector<8x32x1xf32>,
    %84 = vector.extract_strided_slice %67 {offsets = [0, 0, 64], sizes = [8, 32, 16], strides = [1, 1, 1]} : vector<8x32x128xf32> to vector<8x32x16xf32>
    %cst_44 = arith.constant dense<0xFF800000> : vector<8x32xf32>
    %85 = vector.multi_reduction <maximumf>, %84, %cst_44 [2] : vector<8x32x16xf32> to vector<8x32xf32>
    %86 = vector.shape_cast %85 : vector<8x32xf32> to vector<8x32x1xf32>
    %c0_45 = arith.constant 0 : index
    %c0_46 = arith.constant 0 : index
    %c4 = arith.constant 4 : index
    %87 = vector.load %arg6[%c0_45, %c0_46, %c4] : memref<8x32x8xf32, #tpu.memory_space<vmem>>, vector<8x32x1xf32>
    tpu.vector_store %arg6[%c0_45, %c0_46, %c4], %86 {strides = array<i32>} : memref<8x32x8xf32, #tpu.memory_space<vmem>>, vector<8x32x1xf32>,
    %88 = vector.extract_strided_slice %67 {offsets = [0, 0, 80], sizes = [8, 32, 16], strides = [1, 1, 1]} : vector<8x32x128xf32> to vector<8x32x16xf32>
    %cst_47 = arith.constant dense<0xFF800000> : vector<8x32xf32>
    %89 = vector.multi_reduction <maximumf>, %88, %cst_47 [2] : vector<8x32x16xf32> to vector<8x32xf32>
    %90 = vector.shape_cast %89 : vector<8x32xf32> to vector<8x32x1xf32>
    %c0_48 = arith.constant 0 : index
    %c0_49 = arith.constant 0 : index
    %c5 = arith.constant 5 : index
    %91 = vector.load %arg6[%c0_48, %c0_49, %c5] : memref<8x32x8xf32, #tpu.memory_space<vmem>>, vector<8x32x1xf32>
    tpu.vector_store %arg6[%c0_48, %c0_49, %c5], %90 {strides = array<i32>} : memref<8x32x8xf32, #tpu.memory_space<vmem>>, vector<8x32x1xf32>,
    %92 = vector.extract_strided_slice %67 {offsets = [0, 0, 96], sizes = [8, 32, 16], strides = [1, 1, 1]} : vector<8x32x128xf32> to vector<8x32x16xf32>
    %cst_50 = arith.constant dense<0xFF800000> : vector<8x32xf32>
    %93 = vector.multi_reduction <maximumf>, %92, %cst_50 [2] : vector<8x32x16xf32> to vector<8x32xf32>
    %94 = vector.shape_cast %93 : vector<8x32xf32> to vector<8x32x1xf32>
    %c0_51 = arith.constant 0 : index
    %c0_52 = arith.constant 0 : index
    %c6 = arith.constant 6 : index
    %95 = vector.load %arg6[%c0_51, %c0_52, %c6] : memref<8x32x8xf32, #tpu.memory_space<vmem>>, vector<8x32x1xf32>
    tpu.vector_store %arg6[%c0_51, %c0_52, %c6], %94 {strides = array<i32>} : memref<8x32x8xf32, #tpu.memory_space<vmem>>, vector<8x32x1xf32>,
    %96 = vector.extract_strided_slice %67 {offsets = [0, 0, 112], sizes = [8, 32, 16], strides = [1, 1, 1]} : vector<8x32x128xf32> to vector<8x32x16xf32>
    %cst_53 = arith.constant dense<0xFF800000> : vector<8x32xf32>
    %97 = vector.multi_reduction <maximumf>, %96, %cst_53 [2] : vector<8x32x16xf32> to vector<8x32xf32>
    %98 = vector.shape_cast %97 : vector<8x32xf32> to vector<8x32x1xf32>
    %c0_54 = arith.constant 0 : index
    %c0_55 = arith.constant 0 : index
    %c7 = arith.constant 7 : index
    %99 = vector.load %arg6[%c0_54, %c0_55, %c7] : memref<8x32x8xf32, #tpu.memory_space<vmem>>, vector<8x32x1xf32>
    tpu.vector_store %arg6[%c0_54, %c0_55, %c7], %98 {strides = array<i32>} : memref<8x32x8xf32, #tpu.memory_space<vmem>>, vector<8x32x1xf32>,
    return
  }
  func.func @transform_0(%arg0: i32) -> (i32, i32, i32) {
    %c0_i32 = arith.constant 0 : i32
    %c0_i32_0 = arith.constant 0 : i32
    %c0_i32_1 = arith.constant 0 : i32
    return %arg0, %c0_i32, %c0_i32_0 : i32, i32, i32
  }
  func.func @transform_1(%arg0: i32) -> (i32, i32, i32) {
    %c0_i32 = arith.constant 0 : i32
    %c0_i32_0 = arith.constant 0 : i32
    %c0_i32_1 = arith.constant 0 : i32
    %c0_i32_2 = arith.constant 0 : i32
    return %c0_i32, %c0_i32_0, %c0_i32_1 : i32, i32, i32
  }
  func.func @transform_2(%arg0: i32) -> (i32, i32) {
    %c0_i32 = arith.constant 0 : i32
    %c0_i32_0 = arith.constant 0 : i32
    %c0_i32_1 = arith.constant 0 : i32
    return %c0_i32, %c0_i32_0 : i32, i32
  }
  func.func @transform_3(%arg0: i32) -> (i32, i32, i32) {
    %c0_i32 = arith.constant 0 : i32
    %c0_i32_0 = arith.constant 0 : i32
    %c0_i32_1 = arith.constant 0 : i32
    %c0_i32_2 = arith.constant 0 : i32
    return %c0_i32, %c0_i32_0, %c0_i32_1 : i32, i32, i32
  }
  func.func @transform_4(%arg0: i32) -> (i32, i32) {
    %c0_i32 = arith.constant 0 : i32
    %c0_i32_0 = arith.constant 0 : i32
    %c0_i32_1 = arith.constant 0 : i32
    return %c0_i32, %c0_i32_0 : i32, i32
  }
  func.func @transform_5(%arg0: i32) -> (i32, i32, i32) {
    %c0_i32 = arith.constant 0 : i32
    %c0_i32_0 = arith.constant 0 : i32
    %c0_i32_1 = arith.constant 0 : i32
    return %arg0, %c0_i32, %c0_i32_0 : i32, i32, i32
  }
}

</mosaic_0001>

<bundles_post_ra>
// kernel: point_to_sparse_forward.1
= control target key start
LH: loop header
LB: loop body
LE: loop exit
PB: predicated region body
PF: predicated region fallthrough
CT: control target
= control target key end

     0   :  { %v44_v0 = vlaneseq  ;;  %v5045_v1 = vmov 1966171168   ;;  %v5046_v7 = vmov 0   ;;  %s5047_s24 = smov 127   ;;  %vm65_vm0 = vcmask 1040384   ;;  %s7565_s0 = inlined_call_operand.vmem [shape: bf16[8,2,256], index: 0, kind: input, shape index: {}]   ;;  %s7566_s2 = inlined_call_operand.vmem [shape: f32[8,1], index: 2, kind: input, shape index: {}]   ;;  %s7567_s4 = inlined_call_operand.vmem [shape: f32[32,1], index: 4, kind: input, shape index: {}]   ;;  %s7568_s1 = inlined_call_operand.vmem [shape: bf16[3,8,2], index: 1, kind: input, shape index: {}]   ;;  %s7569_s3 = inlined_call_operand.vmem [shape: bf16[3,32,8], index: 3, kind: input, shape index: {}]   ;;  %s7570_s5 = inlined_call_operand.vmem [shape: f32[8,32,8], index: 5, kind: output, shape index: {}]  }
   0x1   :  { %v42_v2 = vunpack.c.l.s4 %v5045_v1  ;;  %v4373_v4 = vld.sshfl [vmem:[%s7565_s0 + $0x2] sm:$0x11 pattern:$0x75316420]  ;;  %104 = vmatprep.mubr.bf16.mxu0 %v5046_v7  ;;  %179 = vmatprep.mubr.bf16.mxu1 %v5046_v7  ;;  %v3047_v41 = vld [vmem:[%s7567_s4 + $0x10] sm:$0xff]  ;;  %vm59_vm1 = vcmask 1039360  }
   0x2   :  { %v45_v3 = vshrl.u32 %v44_v0, 7  ;;  %v4370_v6 = vld.sshfl [vmem:[%s7565_s0] sm:$0x11 pattern:$0x75316420]  ;;  %v121_v9 = vcombine.high %v4373_v4, %v4373_v4  ;;  %4845 = vset.pattern.permute.xlu0 %v5046_v7  ;;  %4846 = vset.pattern.permute.xlu1 %v5046_v7  ;;  %vm61_vm2 = vcmask 15360  }
   0x3   :  { %v43_v5 = vunpack.c.0.s8 %v42_v2  ;;  %v40_v10 = vcombine.high %v4370_v6, %v4370_v6  ;;  %v4376_v11 = vld.sshfl [vmem:[%s7565_s0 + $0x4] sm:$0x11 pattern:$0x75316420]  ;;  %vm1023_vm3 = vcmask 1031168   ;;  %vm1631_vm4 = vcmask 64512  }
   0x4   :  { %v196_v16 = vcombine.high %v4376_v11, %v4376_v11  ;;  %v4379_v17 = vld.sshfl [vmem:[%s7565_s0 + $0x6] sm:$0x11 pattern:$0x75316420]  ;;  %vm1638_vm5 = vcmask 1043456   ;;  %vm3325_vm6 = vcmask 130048  }
   0x5   :  { %v46_v8 = vsub.s32 %v43_v5, %v45_v3  ;;  %v271_v20 = vcombine.high %v4379_v17, %v4379_v17  ;;  %v4382_v21 = vld.sshfl [vmem:[%s7565_s0 + $0x8] sm:$0x11 pattern:$0x75316420]  ;;  %v1455_v39 = vld [vmem:[%s7566_s2] sm:$0xff]  ;;  %vm3455_vm7 = vcmask 261248  }
   0x6   :  { %v346_v24 = vcombine.high %v4382_v21, %v4382_v21  ;;  %v4385_v25 = vld.sshfl [vmem:[%s7565_s0 + $0xa] sm:$0x11 pattern:$0x75316420]  ;;  %v3045_v40 = vld [vmem:[%s7567_s4] sm:$0xff]  ;;  %vm3585_vm8 = vcmask 392448  }
   0x7   :  { %v5092_v12 = vrot.slane %v4373_v4, %v46_v8  ;;  %v5094_v13 = vrot.slane %v4370_v6, %v46_v8  ;;  %v5100_v14 = vrot.slane %v121_v9, %v46_v8  ;;  %v5102_v15 = vrot.slane %v40_v10, %v46_v8  ;;  %v4388_v29 = vld.sshfl [vmem:[%s7565_s0 + $0xc] sm:$0x11 pattern:$0x75316420]  ;;  %v4369_v50 = vld [vmem:[%s7568_s1 + $0x4] sm:$0xf] }
   0x8   :  { %v5111_v18 = vrot.slane %v196_v16, %v46_v8  ;;  %v5113_v19 = vrot.slane %v4376_v11, %v46_v8  ;;  %v5122_v22 = vrot.slane %v271_v20, %v46_v8  ;;  %v5124_v23 = vrot.slane %v4379_v17, %v46_v8  ;;  %v4391_v33 = vld.sshfl [vmem:[%s7565_s0 + $0xe] sm:$0x11 pattern:$0x75316420]  ;;  %s5048_s0 = smov 126  }
   0x9   :  { %136 = vrot.lane.b32.xlu1 %v5092_v12, %s5047_s24  ;;  %55 = vrot.lane.b32.xlu0 %v5094_v13, %s5047_s24  ;;  %v5133_v26 = vrot.slane %v346_v24, %v46_v8  ;;  %v5135_v27 = vrot.slane %v4382_v21, %v46_v8  ;;  %v421_v28 = vcombine.high %v4385_v25, %v4385_v25  ;;  %v642_v16 = vsel %vm65_vm0, %v5094_v13, 0 }
   0xa   :  { %v5146_v31 = vrot.slane %v4385_v25, %v46_v8  ;;  %v496_v32 = vcombine.high %v4388_v29, %v4388_v29  ;;  %v5157_v35 = vrot.slane %v4388_v29, %v46_v8  ;;  %v571_v36 = vcombine.high %v4391_v33, %v4391_v33 }
   0xb   :  { %v5144_v30 = vrot.slane %v421_v28, %v46_v8  ;;  %v5165_v38 = vrot.slane %v4391_v33, %v46_v8  ;;  %v689_v17 = vsel %vm65_vm0, %v5092_v12, 0  ;;  %v830_v21 = vsel %vm65_vm0, %v5135_v27, 0 }
   0xc   :  { %v5155_v34 = vrot.slane %v496_v32, %v46_v8  ;;  %v5163_v37 = vrot.slane %v571_v36, %v46_v8  ;;  %v924_v25 = vsel %vm65_vm0, %v5157_v35, 0  ;;  %vm3715_vm9 = vcmask 523648  }
   0xd   :  { %138 = vrot.lane.b32.xlu1 %v5100_v14, %s5047_s24  ;;  %57 = vrot.lane.b32.xlu0 %v5102_v15, %s5047_s24  ;;  %vm3845_vm10 = vcmask 654848   ;;  %vm3975_vm11 = vcmask 786048   ;;  %vm4105_vm12 = vcmask 917248   ;;  %vm4235_vm13 = vcmask 1048448  }
   0xe   :  { %vm3422_vm14 = vcmask 7168   ;;  %vm3552_vm15 = vcmask 15368  }
  0x11   :  { %213 = vrot.lane.b32.xlu1 %v5111_v18, %s5047_s24  ;;  %211 = vrot.lane.b32.xlu0 %v5113_v19, %s5047_s24 }
  0x15   :  { %288 = vrot.lane.b32.xlu1 %v5122_v22, %s5047_s24  ;;  %286 = vrot.lane.b32.xlu0 %v5124_v23, %s5047_s24 }
  0x19   :  { %363 = vrot.lane.b32.xlu1 %v5133_v26, %s5047_s24  ;;  %361 = vrot.lane.b32.xlu0 %v5135_v27, %s5047_s24 }
  0x1d   :  { %438 = vrot.lane.b32.xlu1 %v5144_v30, %s5047_s24  ;;  %436 = vrot.lane.b32.xlu0 %v5146_v31, %s5047_s24 }
  0x21   :  { %513 = vrot.lane.b32.xlu1 %v5155_v34, %s5047_s24  ;;  %511 = vrot.lane.b32.xlu0 %v5157_v35, %s5047_s24 }
  0x25   :  { %588 = vrot.lane.b32.xlu1 %v5163_v37, %s5047_s24  ;;  %586 = vrot.lane.b32.xlu0 %v5165_v38, %s5047_s24 }
  0x29   :  { %1021 = vrot.lane.b32.xlu1 %v5102_v15, %s5048_s0  ;;  %1019 = vrot.lane.b32.xlu0 %v5094_v13, %s5048_s0  ;;  %v736_v13 = vsel %vm65_vm0, %v5113_v19, 0 }
  0x2d   :  { %1077 = vrot.lane.b32.xlu1 %v5100_v14, %s5048_s0  ;;  %1075 = vrot.lane.b32.xlu0 %v5092_v12, %s5048_s0  ;;  %v29_v12 = vld [vmem:[%s7568_s1] sm:$0xf] }
  0x31   :  { %1129 = vrot.lane.b32.xlu1 %v5111_v18, %s5048_s0  ;;  %1127 = vrot.lane.b32.xlu0 %v5113_v19, %s5048_s0 }
  0x35   :  { %1181 = vrot.lane.b32.xlu1 %v5122_v22, %s5048_s0  ;;  %1179 = vrot.lane.b32.xlu0 %v5124_v23, %s5048_s0 }
  0x39   :  { %1233 = vrot.lane.b32.xlu1 %v5133_v26, %s5048_s0  ;;  %1231 = vrot.lane.b32.xlu0 %v5135_v27, %s5048_s0 }
  0x3d   :  { %1285 = vrot.lane.b32.xlu1 %v5144_v30, %s5048_s0  ;;  %1283 = vrot.lane.b32.xlu0 %v5146_v31, %s5048_s0 }
  0x41   :  { %1337 = vrot.lane.b32.xlu1 %v5155_v34, %s5048_s0  ;;  %1335 = vrot.lane.b32.xlu0 %v5157_v35, %s5048_s0 }
  0x45   :  { %1389 = vrot.lane.b32.xlu1 %v5163_v37, %s5048_s0  ;;  %1387 = vrot.lane.b32.xlu0 %v5165_v38, %s5048_s0 }
  0x49   :  { %1458 = vperm.xlu0 %4845, %v1455_v39   ;;  %v4410_v39 = vld [vmem:[%s7568_s1 + $0x8] sm:$0xf] }
  0x4d   :  { %3051 = vperm.xlu0 %4845, %v3045_v40  }
  0x51   :  { %3061 = vperm.xlu0 %4845, %v3047_v41  }
  0x7b   :  { %v137_v42 = vpop.permute.xlu1 %136  ;;  %v56_v43 = vpop.permute.xlu0 %55 }
  0x7f   :  { %v139_v44 = vpop.permute.xlu1 %138  ;;  %v58_v45 = vpop.permute.xlu0 %57 }
  0x80   :  { %4371 = vmatprep.subr.msk.bf16.mxu0 %vm65_vm0, %v58_v45  ;;  %4374 = vmatprep.subr.msk.bf16.mxu1 %vm65_vm0, %v139_v44  ;;  %v60_v46 = vsel %vm59_vm1, %v56_v43, %v58_v45  ;;  %v140_v47 = vsel %vm59_vm1, %v137_v42, %v139_v44 }
  0x81   :  { %v67_v48 = vsel %vm65_vm0, %v60_v46, 0  ;;  %v142_v49 = vsel %vm65_vm0, %v140_v47, 0 }
  0x82   :  { %73 = vmatpush1.bf16.msra.mxu0 %v67_v48  ;;  %148 = vmatpush1.bf16.msra.mxu1 %v142_v49 }
  0x83   :  { %v214_v51 = vpop.permute.xlu1 %213  ;;  %v212_v52 = vpop.permute.xlu0 %211 }
  0x84   :  { %v215_v53 = vsel %vm59_vm1, %v212_v52, %v214_v51  ;;  %4377 = vmatprep.subr.msk.bf16.mxu0 %vm65_vm0, %v214_v51 }
  0x85   :  { %v217_v54 = vsel %vm65_vm0, %v215_v53, 0  ;;  %4372 = vmatmul.mubr.msk.bf16.vlgmr.msra.gmra.mrb[0].mxu0 %vm61_vm2, %v4369_v50  ;;  %4375 = vmatmul.mubr.msk.bf16.vlgmr.msra.gmra.mrb[0].mxu1 %vm61_vm2, %v4369_v50 }
  0x86   :  { %223 = vmatpush1.bf16.msra.mxu0 %v217_v54  ;;  %254 = vmatprep.mubr.bf16.mxu0 %v5046_v7  ;;  %v3046_v54 = vld [vmem:[%s7567_s4 + $0x8] sm:$0xff] }
  0x87   :  { %v289_v55 = vpop.permute.xlu1 %288  ;;  %v287_v56 = vpop.permute.xlu0 %286  ;;  %329 = vmatprep.mubr.bf16.mxu1 %v5046_v7  ;;  %3056 = vperm.xlu1 %4846, %v3046_v54  }
  0x88   :  { %v290_v57 = vsel %vm59_vm1, %v287_v56, %v289_v55  ;;  %4380 = vmatprep.subr.msk.bf16.mxu1 %vm65_vm0, %v289_v55  ;;  %v3048_v55 = vld [vmem:[%s7567_s4 + $0x18] sm:$0xff] }
  0x89   :  { %v292_v58 = vsel %vm65_vm0, %v290_v57, 0 }
  0x8a   :  { %298 = vmatpush1.bf16.msra.mxu1 %v292_v58 }
  0x8b   :  { %v364_v59 = vpop.permute.xlu1 %363  ;;  %v362_v60 = vpop.permute.xlu0 %361  ;;  %3066 = vperm.xlu1 %4846, %v3048_v55  }
  0x8c   :  { %v365_v61 = vsel %vm59_vm1, %v362_v60, %v364_v59  ;;  %4383 = vmatprep.subr.msk.bf16.mxu0 %vm65_vm0, %v364_v59 }
  0x8d   :  { %v367_v62 = vsel %vm65_vm0, %v365_v61, 0  ;;  %4378 = vmatmul.mubr.msk.bf16.vlgmr.msra.gmra.mrb[4].mxu0 %vm61_vm2, %v4369_v50  ;;  %4381 = vmatmul.mubr.msk.bf16.vlgmr.msra.gmra.mrb[4].mxu1 %vm61_vm2, %v4369_v50 }
  0x8e   :  { %373 = vmatpush1.bf16.msra.mxu0 %v367_v62  ;;  %404 = vmatprep.mubr.bf16.mxu0 %v5046_v7 }
  0x8f   :  { %v439_v63 = vpop.permute.xlu1 %438  ;;  %v437_v0 = vpop.permute.xlu0 %436  ;;  %479 = vmatprep.mubr.bf16.mxu1 %v5046_v7 }
  0x90   :  { %v440_v1 = vsel %vm59_vm1, %v437_v0, %v439_v63  ;;  %4386 = vmatprep.subr.msk.bf16.mxu1 %vm65_vm0, %v439_v63 }
  0x91   :  { %v442_v2 = vsel %vm65_vm0, %v440_v1, 0 }
  0x92   :  { %448 = vmatpush1.bf16.msra.mxu1 %v442_v2 }
  0x93   :  { %v514_v3 = vpop.permute.xlu1 %513  ;;  %v512_v4 = vpop.permute.xlu0 %511 }
  0x94   :  { %v515_v5 = vsel %vm59_vm1, %v512_v4, %v514_v3  ;;  %4389 = vmatprep.subr.msk.bf16.mxu0 %vm65_vm0, %v514_v3 }
  0x95   :  { %v517_v6 = vsel %vm65_vm0, %v515_v5, 0  ;;  %4384 = vmatmul.mubr.msk.bf16.vlgmr.msra.gmra.mrb[8].mxu0 %vm61_vm2, %v4369_v50  ;;  %4387 = vmatmul.mubr.msk.bf16.vlgmr.msra.gmra.mrb[8].mxu1 %vm61_vm2, %v4369_v50 }
  0x96   :  { %523 = vmatpush1.bf16.msra.mxu0 %v517_v6  ;;  %554 = vmatprep.mubr.bf16.mxu0 %v5046_v7 }
  0x97   :  { %v589_v8 = vpop.permute.xlu1 %588  ;;  %v587_v9 = vpop.permute.xlu0 %586  ;;  %629 = vmatprep.mubr.bf16.mxu1 %v5046_v7  ;;  %4394 = vmatprep.subr.msk.bf16.mxu0 %vm65_vm0, %v5102_v15 }
  0x98   :  { %v590_v10 = vsel %vm59_vm1, %v587_v9, %v589_v8  ;;  %4392 = vmatprep.subr.msk.bf16.mxu1 %vm65_vm0, %v589_v8 }
  0x99   :  { %v592_v11 = vsel %vm65_vm0, %v590_v10, 0 }
  0x9a   :  { %598 = vmatpush1.bf16.msra.mxu1 %v592_v11 }
  0x9b   :  { %4396 = vmatprep.subr.msk.bf16.mxu1 %vm65_vm0, %v5100_v14  ;;  %v783_v14 = vsel %vm65_vm0, %v5124_v23, 0  ;;  %v1022_v15 = vpop.permute.xlu1 %1021  ;;  %v1020_v20 = vpop.permute.xlu0 %1019 }
  0x9c   :  { %v1024_v29 = vsel %vm1023_vm3, %v1020_v20, %v1022_v15 }
  0x9d   :  { %4390 = vmatmul.mubr.msk.bf16.vlgmr.msra.gmra.mrb[12].mxu0 %vm61_vm2, %v4369_v50  ;;  %4393 = vmatmul.mubr.msk.bf16.vlgmr.msra.gmra.mrb[12].mxu1 %vm61_vm2, %v4369_v50 }
  0x9e   :  { %648 = vmatpush1.bf16.msra.mxu0 %v642_v16  ;;  %695 = vmatpush1.bf16.msra.mxu1 %v689_v17 }
  0x9f   :  { %679 = vmatprep.mubr.bf16.mxu0 %v5046_v7  ;;  %726 = vmatprep.mubr.bf16.mxu1 %v5046_v7  ;;  %v1076_v19 = vpop.permute.xlu0 %1075 }
  0xa0   :  { %4398 = vmatprep.subr.msk.bf16.mxu0 %vm65_vm0, %v5111_v18  ;;  %4400 = vmatprep.subr.msk.bf16.mxu1 %vm65_vm0, %v5122_v22  ;;  %v1078_v18 = vpop.permute.xlu1 %1077  ;;  %v877_v22 = vsel %vm65_vm0, %v5146_v31, 0  ;;  %v1029_v31 = vsel %vm65_vm0, %v1024_v29, 0 }
  0xa3   :  { %v1128_v24 = vpop.permute.xlu0 %1127 }
  0xa4   :  { %v1130_v23 = vpop.permute.xlu1 %1129 }
  0xa5   :  { %4395 = vmatmul.mubr.msk.bf16.vlgmr.msra.gmra.mrb[16].mxu0 %vm61_vm2, %v29_v12  ;;  %4397 = vmatmul.mubr.msk.bf16.vlgmr.msra.gmra.mrb[16].mxu1 %vm61_vm2, %v29_v12  ;;  %v1131_v35 = vsel %vm1023_vm3, %v1128_v24, %v1130_v23 }
  0xa6   :  { %742 = vmatpush1.bf16.msra.mxu0 %v736_v13  ;;  %789 = vmatpush1.bf16.msra.mxu1 %v783_v14  ;;  %v1133_v40 = vsel %vm65_vm0, %v1131_v35, 0 }
  0xa7   :  { %773 = vmatprep.mubr.bf16.mxu0 %v5046_v7  ;;  %820 = vmatprep.mubr.bf16.mxu1 %v5046_v7  ;;  %v1180_v28 = vpop.permute.xlu0 %1179 }
  0xa8   :  { %4402 = vmatprep.subr.msk.bf16.mxu0 %vm65_vm0, %v5133_v26  ;;  %4404 = vmatprep.subr.msk.bf16.mxu1 %vm65_vm0, %v5144_v30  ;;  %v971_v26 = vsel %vm65_vm0, %v5165_v38, 0  ;;  %v1182_v27 = vpop.permute.xlu1 %1181  ;;  %v1079_v30 = vsel %vm1023_vm3, %v1076_v19, %v1078_v18 }
  0xa9   :  { %v1081_v32 = vsel %vm65_vm0, %v1079_v30, 0  ;;  %v1183_v36 = vsel %vm1023_vm3, %v1180_v28, %v1182_v27 }
  0xaa   :  { %v1185_v41 = vsel %vm65_vm0, %v1183_v36, 0 }
  0xac   :  { %v1234_v33 = vpop.permute.xlu1 %1233 }
  0xad   :  { %4399 = vmatmul.mubr.msk.bf16.vlgmr.msra.gmra.mrb[20].mxu0 %vm61_vm2, %v29_v12  ;;  %4401 = vmatmul.mubr.msk.bf16.vlgmr.msra.gmra.mrb[20].mxu1 %vm61_vm2, %v29_v12 }
  0xae   :  { %836 = vmatpush1.bf16.msra.mxu0 %v830_v21  ;;  %883 = vmatpush1.bf16.msra.mxu1 %v877_v22 }
  0xaf   :  { %867 = vmatprep.mubr.bf16.mxu0 %v5046_v7  ;;  %914 = vmatprep.mubr.bf16.mxu1 %v5046_v7 }
  0xb0   :  { %4406 = vmatprep.subr.msk.bf16.mxu0 %vm65_vm0, %v5155_v34  ;;  %4408 = vmatprep.subr.msk.bf16.mxu1 %vm65_vm0, %v5163_v37  ;;  %v1232_v34 = vpop.permute.xlu0 %1231  ;;  %v1286_v37 = vpop.permute.xlu1 %1285 }
  0xb1   :  { %v1235_v44 = vsel %vm1023_vm3, %v1232_v34, %v1234_v33 }
  0xb2   :  { %v1237_v46 = vsel %vm65_vm0, %v1235_v44, 0 }
  0xb4   :  { %v1284_v38 = vpop.permute.xlu0 %1283  ;;  %v1338_v42 = vpop.permute.xlu1 %1337 }
  0xb5   :  { %4403 = vmatmul.mubr.msk.bf16.vlgmr.msra.gmra.mrb[24].mxu0 %vm61_vm2, %v29_v12  ;;  %4405 = vmatmul.mubr.msk.bf16.vlgmr.msra.gmra.mrb[24].mxu1 %vm61_vm2, %v29_v12  ;;  %v1287_v45 = vsel %vm1023_vm3, %v1284_v38, %v1286_v37 }
  0xb6   :  { %930 = vmatpush1.bf16.msra.mxu0 %v924_v25  ;;  %977 = vmatpush1.bf16.msra.mxu1 %v971_v26  ;;  %v1289_v47 = vsel %vm65_vm0, %v1287_v45, 0 }
  0xb7   :  { %961 = vmatprep.mubr.bf16.mxu0 %v5046_v7  ;;  %1008 = vmatprep.mubr.bf16.mxu1 %v5046_v7 }
  0xb8   :  { %4411 = vmatprep.subr.msk.bf16.mxu0 %vm65_vm0, %v1022_v15  ;;  %4413 = vmatprep.subr.msk.bf16.mxu1 %vm65_vm0, %v1078_v18  ;;  %v1336_v43 = vpop.permute.xlu0 %1335  ;;  %v1390_v48 = vpop.permute.xlu1 %1389 }
  0xb9   :  { %v1339_v50 = vsel %vm1023_vm3, %v1336_v43, %v1338_v42 }
  0xba   :  { %v1341_v52 = vsel %vm65_vm0, %v1339_v50, 0 }
  0xbc   :  { %v1388_v49 = vpop.permute.xlu0 %1387 }
  0xbd   :  { %4407 = vmatmul.mubr.msk.bf16.vlgmr.msra.gmra.mrb[28].mxu0 %vm61_vm2, %v29_v12  ;;  %4409 = vmatmul.mubr.msk.bf16.vlgmr.msra.gmra.mrb[28].mxu1 %vm61_vm2, %v29_v12  ;;  %v1391_v51 = vsel %vm1023_vm3, %v1388_v49, %v1390_v48 }
  0xbe   :  { %1035 = vmatpush1.bf16.msra.mxu0 %v1029_v31  ;;  %1087 = vmatpush1.bf16.msra.mxu1 %v1081_v32  ;;  %v1393_v53 = vsel %vm65_vm0, %v1391_v51, 0 }
  0xbf   :  { %1066 = vmatprep.mubr.bf16.mxu0 %v5046_v7  ;;  %1118 = vmatprep.mubr.bf16.mxu1 %v5046_v7 }
  0xc0   :  { %4415 = vmatprep.subr.msk.bf16.mxu0 %vm65_vm0, %v1130_v23  ;;  %4417 = vmatprep.subr.msk.bf16.mxu1 %vm65_vm0, %v1182_v27 }
  0xc5   :  { %4412 = vmatmul.mubr.msk.bf16.vlgmr.msra.gmra.mrb[32].mxu0 %vm61_vm2, %v4410_v39  ;;  %4414 = vmatmul.mubr.msk.bf16.vlgmr.msra.gmra.mrb[32].mxu1 %vm61_vm2, %v4410_v39 }
  0xc6   :  { %1139 = vmatpush1.bf16.msra.mxu0 %v1133_v40  ;;  %1191 = vmatpush1.bf16.msra.mxu1 %v1185_v41 }
  0xc7   :  { %1170 = vmatprep.mubr.bf16.mxu0 %v5046_v7  ;;  %1222 = vmatprep.mubr.bf16.mxu1 %v5046_v7 }
  0xc8   :  { %4419 = vmatprep.subr.msk.bf16.mxu0 %vm65_vm0, %v1234_v33  ;;  %4421 = vmatprep.subr.msk.bf16.mxu1 %vm65_vm0, %v1286_v37 }
  0xcd   :  { %4416 = vmatmul.mubr.msk.bf16.vlgmr.msra.gmra.mrb[36].mxu0 %vm61_vm2, %v4410_v39  ;;  %4418 = vmatmul.mubr.msk.bf16.vlgmr.msra.gmra.mrb[36].mxu1 %vm61_vm2, %v4410_v39 }
  0xce   :  { %1243 = vmatpush1.bf16.msra.mxu0 %v1237_v46  ;;  %1295 = vmatpush1.bf16.msra.mxu1 %v1289_v47 }
  0xcf   :  { %1274 = vmatprep.mubr.bf16.mxu0 %v5046_v7  ;;  %1326 = vmatprep.mubr.bf16.mxu1 %v5046_v7 }
  0xd0   :  { %4423 = vmatprep.subr.msk.bf16.mxu0 %vm65_vm0, %v1338_v42  ;;  %4425 = vmatprep.subr.msk.bf16.mxu1 %vm65_vm0, %v1390_v48  ;;  %vm3682_vm0 = vcmask 23568  }
  0xd5   :  { %4420 = vmatmul.mubr.msk.bf16.vlgmr.msra.gmra.mrb[40].mxu0 %vm61_vm2, %v4410_v39  ;;  %4422 = vmatmul.mubr.msk.bf16.vlgmr.msra.gmra.mrb[40].mxu1 %vm61_vm2, %v4410_v39 }
  0xd6   :  { %1347 = vmatpush1.bf16.msra.mxu0 %v1341_v52  ;;  %1399 = vmatpush1.bf16.msra.mxu1 %v1393_v53 }
  0xd7   :  { %1378 = vmatprep.mubr.bf16.mxu0 %v5046_v7  ;;  %1430 = vmatprep.mubr.bf16.mxu1 %v5046_v7 }
  0xdd   :  { %4424 = vmatmul.mubr.msk.bf16.vlgmr.msra.gmra.mrb[44].mxu0 %vm61_vm2, %v4410_v39  ;;  %4426 = vmatmul.mubr.msk.bf16.vlgmr.msra.gmra.mrb[44].mxu1 %vm61_vm2, %v4410_v39  ;;  %vm3942_vm2 = vcmask 39968  }
 0x158   :  { %v106_v56 = vpop.f32.mrb[0].mxu0  ;;  %v181_v57 = vpop.f32.mrb[0].mxu1 }
 0x159   :  { %v108_v58 = vpop.f32.mrb[1].mxu0  ;;  %v183_v59 = vpop.f32.mrb[1].mxu1 }
 0x15a   :  { %v110_v60 = vpop.f32.mrb[2].mxu0  ;;  %v185_v7 = vpop.f32.mrb[2].mxu1 }
 0x15b   :  { %v111_v61 = vpop.f32.mrb[3].mxu0  ;;  %v186_v62 = vpop.f32.mrb[3].mxu1 }
 0x160   :  { %v256_v63 = vpop.f32.mrb[4].mxu0  ;;  %v331_v0 = vpop.f32.mrb[4].mxu1 }
 0x161   :  { %v258_v1 = vpop.f32.mrb[5].mxu0  ;;  %v333_v2 = vpop.f32.mrb[5].mxu1 }
 0x162   :  { %v260_v3 = vpop.f32.mrb[6].mxu0  ;;  %v335_v4 = vpop.f32.mrb[6].mxu1 }
 0x163   :  { %v261_v5 = vpop.f32.mrb[7].mxu0  ;;  %v336_v6 = vpop.f32.mrb[7].mxu1 }
 0x168   :  { %v406_v8 = vpop.f32.mrb[8].mxu0  ;;  %v481_v9 = vpop.f32.mrb[8].mxu1 }
 0x169   :  { %v408_v10 = vpop.f32.mrb[9].mxu0  ;;  %v483_v11 = vpop.f32.mrb[9].mxu1 }
 0x16a   :  { %v410_v16 = vpop.f32.mrb[10].mxu0  ;;  %v485_v17 = vpop.f32.mrb[10].mxu1 }
 0x16b   :  { %v411_v12 = vpop.f32.mrb[11].mxu0  ;;  %v486_v13 = vpop.f32.mrb[11].mxu1 }
 0x170   :  { %v556_v14 = vpop.f32.mrb[12].mxu0  ;;  %v631_v15 = vpop.f32.mrb[12].mxu1 }
 0x171   :  { %v558_v20 = vpop.f32.mrb[13].mxu0  ;;  %v633_v18 = vpop.f32.mrb[13].mxu1 }
 0x172   :  { %v560_v19 = vpop.f32.mrb[14].mxu0  ;;  %v635_v21 = vpop.f32.mrb[14].mxu1 }
 0x173   :  { %v561_v22 = vpop.f32.mrb[15].mxu0  ;;  %v636_v23 = vpop.f32.mrb[15].mxu1 }
 0x178   :  { %v681_v24 = vpop.f32.mrb[16].mxu0  ;;  %v728_v25 = vpop.f32.mrb[16].mxu1 }
 0x179   :  { %v682_v26 = vadd.f32 %v681_v24, %v106_v56  ;;  %v729_v27 = vadd.f32 %v728_v25, %v181_v57  ;;  %v683_v28 = vpop.f32.mrb[17].mxu0  ;;  %v730_v29 = vpop.f32.mrb[17].mxu1 }
 0x17a   :  { %v684_v30 = vadd.f32 %v683_v28, %v108_v58  ;;  %v731_v31 = vadd.f32 %v730_v29, %v183_v59  ;;  %v685_v32 = vpop.f32.mrb[18].mxu0  ;;  %v732_v33 = vpop.f32.mrb[18].mxu1 }
 0x17b   :  { %v686_v34 = vpop.f32.mrb[19].mxu0  ;;  %v733_v35 = vpop.f32.mrb[19].mxu1 }
 0x180   :  { %v775_v36 = vpop.f32.mrb[20].mxu0  ;;  %v822_v37 = vpop.f32.mrb[20].mxu1 }
 0x181   :  { %v776_v38 = vadd.f32 %v775_v36, %v256_v63  ;;  %v823_v39 = vadd.f32 %v822_v37, %v331_v0  ;;  %v777_v40 = vpop.f32.mrb[21].mxu0  ;;  %v824_v41 = vpop.f32.mrb[21].mxu1 }
 0x182   :  { %v778_v42 = vadd.f32 %v777_v40, %v258_v1  ;;  %v825_v43 = vadd.f32 %v824_v41, %v333_v2  ;;  %v779_v44 = vpop.f32.mrb[22].mxu0  ;;  %v826_v45 = vpop.f32.mrb[22].mxu1 }
 0x183   :  { %v780_v46 = vpop.f32.mrb[23].mxu0  ;;  %v827_v47 = vpop.f32.mrb[23].mxu1 }
 0x188   :  { %v869_v48 = vpop.f32.mrb[24].mxu0  ;;  %v916_v49 = vpop.f32.mrb[24].mxu1 }
 0x189   :  { %v5353_v50 = vadd.f32 %v869_v48, %v406_v8  ;;  %v5355_v51 = vadd.f32 %v916_v49, %v481_v9  ;;  %v871_v52 = vpop.f32.mrb[25].mxu0  ;;  %v918_v53 = vpop.f32.mrb[25].mxu1 }
 0x18a   :  { %v5357_v54 = vadd.f32 %v871_v52, %v408_v10  ;;  %v5359_v55 = vadd.f32 %v918_v53, %v483_v11  ;;  %v873_v56 = vpop.f32.mrb[26].mxu0  ;;  %v920_v57 = vpop.f32.mrb[26].mxu1 }
 0x18b   :  { %v874_v58 = vpop.f32.mrb[27].mxu0  ;;  %v921_v59 = vpop.f32.mrb[27].mxu1 }
 0x18c   :  { %v5369_v8 = vpop.permute.xlu0 %1458 }
 0x190   :  { %v963_v60 = vpop.f32.mrb[28].mxu0  ;;  %v1010_v7 = vpop.f32.mrb[28].mxu1 }
 0x191   :  { %v5361_v61 = vadd.f32 %v963_v60, %v556_v14  ;;  %v5363_v62 = vadd.f32 %v1010_v7, %v631_v15  ;;  %v965_v63 = vpop.f32.mrb[29].mxu0  ;;  %v1012_v0 = vpop.f32.mrb[29].mxu1 }
 0x192   :  { %v5365_v1 = vadd.f32 %v965_v63, %v558_v20  ;;  %v5367_v2 = vadd.f32 %v1012_v0, %v633_v18  ;;  %v967_v3 = vpop.f32.mrb[30].mxu0  ;;  %v1014_v4 = vpop.f32.mrb[30].mxu1 }
 0x193   :  { %v968_v5 = vpop.f32.mrb[31].mxu0  ;;  %v1015_v6 = vpop.f32.mrb[31].mxu1 }
 0x198   :  { %v1068_v9 = vpop.f32.mrb[32].mxu0  ;;  %v1120_v10 = vpop.f32.mrb[32].mxu1 }
 0x199   :  { %v1439_v11 = vadd.f32 %v1068_v9, %v682_v26  ;;  %v1441_v16 = vadd.f32 %v1120_v10, %v729_v27  ;;  %v1070_v17 = vpop.f32.mrb[33].mxu0  ;;  %v1122_v12 = vpop.f32.mrb[33].mxu1 }
 0x19a   :  { %v1440_v13 = vadd.f32 %v1070_v17, %v684_v30  ;;  %v1442_v14 = vadd.f32 %v1122_v12, %v731_v31  ;;  %v1072_v15 = vpop.f32.mrb[34].mxu0  ;;  %v1124_v19 = vpop.f32.mrb[34].mxu1 }
 0x19b   :  { %v5372_v20 = vadd.f32 %v5369_v8, %v1439_v11  ;;  %v5375_v18 = vadd.f32 %v5369_v8, %v1441_v16  ;;  %v1073_v21 = vpop.f32.mrb[35].mxu0  ;;  %v1125_v22 = vpop.f32.mrb[35].mxu1 }
 0x19c   :  { %v5378_v23 = vadd.f32 %v5369_v8, %v1440_v13  ;;  %v5381_v24 = vadd.f32 %v5369_v8, %v1442_v14 }
 0x19d   :  { %v4427_v25 = vmul.f32 -1.442695, %v5372_v20  ;;  %v4429_v26 = vmul.f32 -1.442695, %v5375_v18 }
 0x19e   :  { %v4428_v27 = vmul.f32 -1.442695, %v5378_v23  ;;  %v4430_v28 = vmul.f32 -1.442695, %v5381_v24 }
 0x19f   :  { %4853 = vpow2.f32 %v4427_v25 }
 0x1a0   :  { %4855 = vpow2.f32 %v4429_v26  ;;  %v1172_v29 = vpop.f32.mrb[36].mxu0  ;;  %v1224_v30 = vpop.f32.mrb[36].mxu1 }
 0x1a1   :  { %4857 = vpow2.f32 %v4428_v27  ;;  %v1443_v31 = vadd.f32 %v1172_v29, %v776_v38  ;;  %v1445_v32 = vadd.f32 %v1224_v30, %v823_v39  ;;  %v1174_v33 = vpop.f32.mrb[37].mxu0  ;;  %v1226_v34 = vpop.f32.mrb[37].mxu1 }
 0x1a2   :  { %4859 = vpow2.f32 %v4430_v28  ;;  %v1444_v35 = vadd.f32 %v1174_v33, %v778_v42  ;;  %v1446_v36 = vadd.f32 %v1226_v34, %v825_v43  ;;  %v1176_v37 = vpop.f32.mrb[38].mxu0  ;;  %v1228_v40 = vpop.f32.mrb[38].mxu1 }
 0x1a3   :  { %v5388_v41 = vadd.f32 %v5369_v8, %v1443_v31  ;;  %v5391_v44 = vadd.f32 %v5369_v8, %v1445_v32  ;;  %v1177_v45 = vpop.f32.mrb[39].mxu0  ;;  %v1229_v46 = vpop.f32.mrb[39].mxu1 }
 0x1a4   :  { %v5394_v47 = vadd.f32 %v5369_v8, %v1444_v35  ;;  %v5400_v43 = vadd.f32 %v5369_v8, %v1446_v36 }
 0x1a5   :  { %v4431_v38 = vmul.f32 -1.442695, %v5388_v41  ;;  %v4433_v39 = vmul.f32 -1.442695, %v5391_v44 }
 0x1a6   :  { %v4432_v42 = vmul.f32 -1.442695, %v5394_v47  ;;  %v4434_v6 = vmul.f32 -1.442695, %v5400_v43 }
 0x1a7   :  { %4861 = vpow2.f32 %v4431_v38 }
 0x1a8   :  { %4863 = vpow2.f32 %v4433_v39  ;;  %v1276_v48 = vpop.f32.mrb[40].mxu0  ;;  %v1328_v49 = vpop.f32.mrb[40].mxu1 }
 0x1a9   :  { %v4854_v52 = vpop.eup %4853  ;;  %v1447_v53 = vadd.f32 %v1276_v48, %v5353_v50  ;;  %v1449_v56 = vadd.f32 %v1328_v49, %v5355_v51  ;;  %v1278_v57 = vpop.f32.mrb[41].mxu0  ;;  %4865 = vpow2.f32 %v4432_v42 }
 0x1aa   :  { %v1330_v58 = vpop.f32.mrb[41].mxu1  ;;  %v4856_v59 = vpop.eup %4855  ;;  %v1525_v60 = vadd.f32 1.0, %v4854_v52  ;;  %v1448_v7 = vadd.f32 %v1278_v57, %v5357_v54 }
 0x1ab   :  { %v1450_v63 = vadd.f32 %v1330_v58, %v5359_v55  ;;  %v1280_v0 = vpop.f32.mrb[42].mxu0  ;;  %v1332_v3 = vpop.f32.mrb[42].mxu1  ;;  %v1527_v5 = vadd.f32 1.0, %v4856_v59  ;;  %v5408_v11 = vadd.f32 %v5369_v8, %v1447_v53  ;;  %v5411_v54 = vadd.f32 %v5369_v8, %v1449_v56 }
 0x1ac   :  { %v4858_v4 = vpop.eup %4857  ;;  %v1281_v9 = vpop.f32.mrb[43].mxu0  ;;  %4867 = vrcp.f32 %v1525_v60  ;;  %v5415_v17 = vadd.f32 %v5369_v8, %v1448_v7 }
 0x1ad   :  { %v1333_v10 = vpop.f32.mrb[43].mxu1  ;;  %v4860_v50 = vpop.eup %4859  ;;  %v1526_v51 = vadd.f32 1.0, %v4858_v4  ;;  %4869 = vrcp.f32 %v1527_v5  ;;  %v4435_v55 = vmul.f32 -1.442695, %v5408_v11  ;;  %v4437_v31 = vmul.f32 -1.442695, %v5411_v54 }
 0x1ae   :  { %v1528_v16 = vadd.f32 1.0, %v4860_v50 }
 0x1af   :  { %4871 = vrcp.f32 %v1526_v51 }
 0x1b0   :  { %4873 = vpow2.f32 %v4434_v6  ;;  %v1380_v12 = vpop.f32.mrb[44].mxu0  ;;  %v1432_v13 = vpop.f32.mrb[44].mxu1  ;;  %v5463_v6 = vld [vmem:[%s7569_s3 + $0x10] sm:$0xff]  }
 0x1b1   :  { %4875 = vrcp.f32 %v1528_v16  ;;  %v4862_v14 = vpop.eup %4861  ;;  %v1451_v15 = vadd.f32 %v1380_v12, %v5361_v61  ;;  %v1453_v19 = vadd.f32 %v1432_v13, %v5363_v62  ;;  %v1382_v21 = vpop.f32.mrb[45].mxu0  ;;  %v4436_v61 = vmul.f32 -1.442695, %v5415_v17  ;;  %4611 = vmatprep.mubr.msk.bf16.mxu0 %vm1631_vm4, %v5463_v6  ;;  %4617 = vmatprep.mubr.msk.bf16.mxu1 %vm1631_vm4, %v5463_v6 }
 0x1b2   :  { %v1434_v22 = vpop.f32.mrb[45].mxu1  ;;  %v4864_v25 = vpop.eup %4863  ;;  %v1529_v26 = vadd.f32 1.0, %v4862_v14  ;;  %v1452_v27 = vadd.f32 %v1382_v21, %v5365_v1  ;;  %4877 = vpow2.f32 %v4435_v55  ;;  %v5427_v1 = vadd.f32 %v5369_v8, %v1450_v63 }
 0x1b3   :  { %v5421_v28 = vadd.f32 %v1434_v22, %v5367_v2  ;;  %v1384_v29 = vpop.f32.mrb[46].mxu0  ;;  %v1436_v30 = vpop.f32.mrb[46].mxu1  ;;  %v1531_v62 = vadd.f32 1.0, %v4864_v25  ;;  %v5445_v57 = vadd.f32 %v5369_v8, %v1453_v19 }
 0x1b4   :  { %v1385_v32 = vpop.f32.mrb[47].mxu0  ;;  %v1437_v33 = vpop.f32.mrb[47].mxu1  ;;  %4879 = vrcp.f32 %v1529_v26  ;;  %v5448_v58 = vadd.f32 %v5369_v8, %v1452_v27 }
 0x1b5   :  { %v4866_v34 = vpop.eup %4865  ;;  %4881 = vpow2.f32 %v4437_v31  ;;  %v4441_v4 = vmul.f32 -1.442695, %v5445_v57  ;;  %v5474_v16 = vadd.f32 %v5369_v8, %v5421_v28 }
 0x1b6   :  { %v4868_v35 = vpop.eup %4867  ;;  %v1530_v45 = vadd.f32 1.0, %v4866_v34  ;;  %4883 = vpow2.f32 %v4436_v61  ;;  %v4440_v5 = vmul.f32 -1.442695, %v5448_v58 }
 0x1b7   :  { %v4870_v36 = vpop.eup %4869  ;;  %v1573_v37 = vmul.f32 %v4868_v35, %v5372_v20  ;;  %4885 = vrcp.f32 %v1531_v62  ;;  %v4438_v20 = vmul.f32 -1.442695, %v5427_v1  ;;  %v4442_v14 = vmul.f32 -1.442695, %v5474_v16 }
 0x1b8   :  { %v1575_v40 = vmul.f32 %v4870_v36, %v5375_v18  ;;  %4887 = vrcp.f32 %v1530_v45  ;;  %v5439_v18 = vadd.f32 %v5369_v8, %v1451_v15 }
 0x1b9   :  { %v4872_v2 = vpop.eup %4871  ;;  %v5430_v38 = vpack.c.bf16 %v1573_v37, %v1573_v37  ;;  %4889 = vpow2.f32 %v4438_v20 }
 0x1ba   :  { %v4874_v46 = vpop.eup %4873  ;;  %v1574_v39 = vmul.f32 %v4872_v2, %v5378_v23  ;;  %v5433_v48 = vpack.c.bf16 %v1575_v40, %v1575_v40  ;;  %v4439_v59 = vmul.f32 -1.442695, %v5439_v18 }
 0x1bb   :  { %v4876_v42 = vpop.eup %4875  ;;  %1626 = vrot.lane.b32.xlu1 %v5430_v38, %s5047_s24  ;;  %v1532_v49 = vadd.f32 1.0, %v4874_v46 }
 0x1bc   :  { %1693 = vrot.lane.b32.xlu0 %v5433_v48, %s5047_s24  ;;  %v1590_v52 = vpack.c.bf16 %v1574_v39, %v1574_v39  ;;  %v1576_v53 = vmul.f32 %v4876_v42, %v5381_v24  ;;  %v4878_v23 = vpop.eup %4877 }
 0x1bd   :  { %4891 = vrcp.f32 %v1532_v49  ;;  %v1533_v7 = vadd.f32 1.0, %v4878_v23  ;;  %v5537_v23 = vpop.permute.xlu0 %3051 }
 0x1be   :  { %v4880_v56 = vpop.eup %4879  ;;  %v1592_v24 = vpack.c.bf16 %v1576_v53, %v1576_v53  ;;  %4893 = vpow2.f32 %v4439_v59  ;;  %v5535_v53 = vpop.permute.xlu1 %3056 }
 0x1bf   :  { %1628 = vrot.lane.b32.xlu1 %v1590_v52, %s5047_s24  ;;  %v4882_v60 = vpop.eup %4881  ;;  %v1577_v0 = vmul.f32 %v4880_v56, %v5388_v41  ;;  %4895 = vrcp.f32 %v1533_v7 }
 0x1c0   :  { %2551 = vrot.lane.b32.xlu0 %v5430_v38, %s5048_s0  ;;  %v4884_v63 = vpop.eup %4883  ;;  %v1535_v9 = vadd.f32 1.0, %v4882_v60  ;;  %4897 = vpow2.f32 %v4441_v4 }
 0x1c1   :  { %v4886_v3 = vpop.eup %4885  ;;  %v5465_v10 = vpack.c.bf16 %v1577_v0, %v1577_v0  ;;  %v1534_v51 = vadd.f32 1.0, %v4884_v63  ;;  %v5551_v0 = vld [vmem:[%s7569_s3 + $0x18] sm:$0xff]  }
 0x1c2   :  { %v4888_v41 = vpop.eup %4887  ;;  %v1579_v50 = vmul.f32 %v4886_v3, %v5391_v44  ;;  %4899 = vrcp.f32 %v1535_v9  ;;  %v5539_v56 = vpop.permute.xlu1 %3066 }
 0x1c3   :  { %1695 = vrot.lane.b32.xlu1 %v1592_v24, %s5047_s24  ;;  %v4890_v55 = vpop.eup %4889  ;;  %v1578_v44 = vmul.f32 %v4888_v41, %v5394_v47  ;;  %4901 = vpow2.f32 %v4440_v5 }
 0x1c4   :  { %2614 = vrot.lane.b32.xlu0 %v5433_v48, %s5048_s0  ;;  %v5480_v13 = vpack.c.bf16 %v1579_v50, %v1579_v50  ;;  %4903 = vrcp.f32 %v1534_v51  ;;  %v1536_v8 = vadd.f32 1.0, %v4890_v55 }
 0x1c5   :  { %v1594_v15 = vpack.c.bf16 %v1578_v44, %v1578_v44  ;;  %4905 = vpow2.f32 %v4442_v14 }
 0x1c6   :  { %4907 = vrcp.f32 %v1536_v8 }
 0x1c7   :  { %2553 = vrot.lane.b32.xlu1 %v1590_v52, %s5048_s0  ;;  %v4892_v12 = vpop.eup %4891 }
 0x1c8   :  { %1752 = vrot.lane.b32.xlu0 %v5465_v10, %s5047_s24  ;;  %v1580_v19 = vmul.f32 %v4892_v12, %v5400_v43  ;;  %v4894_v21 = vpop.eup %4893 }
 0x1c9   :  { %v4896_v22 = vpop.eup %4895  ;;  %v1537_v47 = vadd.f32 1.0, %v4894_v21 }
 0x1ca   :  { %v1596_v25 = vpack.c.bf16 %v1580_v19, %v1580_v19  ;;  %v4898_v26 = vpop.eup %4897  ;;  %v1581_v27 = vmul.f32 %v4896_v22, %v5408_v11 }
 0x1cb   :  { %2616 = vrot.lane.b32.xlu1 %v1592_v24, %s5048_s0  ;;  %4909 = vrcp.f32 %v1537_v47  ;;  %v1539_v29 = vadd.f32 1.0, %v4898_v26 }
 0x1cc   :  { %1811 = vrot.lane.b32.xlu0 %v5480_v13, %s5047_s24  ;;  %v4900_v28 = vpop.eup %4899  ;;  %v5494_v31 = vpack.c.bf16 %v1581_v27, %v1581_v27 }
 0x1cd   :  { %v4902_v43 = vpop.eup %4901  ;;  %v1583_v32 = vmul.f32 %v4900_v28, %v5411_v54  ;;  %4911 = vrcp.f32 %v1539_v29 }
 0x1ce   :  { %v4904_v30 = vpop.eup %4903  ;;  %v1538_v33 = vadd.f32 1.0, %v4902_v43 }
 0x1cf   :  { %1754 = vrot.lane.b32.xlu1 %v1594_v15, %s5047_s24  ;;  %v4906_v11 = vpop.eup %4905  ;;  %v1582_v61 = vmul.f32 %v4904_v30, %v5415_v17  ;;  %v5501_v62 = vpack.c.bf16 %v1583_v32, %v1583_v32 }
 0x1d0   :  { %2671 = vrot.lane.b32.xlu0 %v5465_v10, %s5048_s0  ;;  %v4908_v34 = vpop.eup %4907  ;;  %4913 = vrcp.f32 %v1538_v33  ;;  %v1540_v35 = vadd.f32 1.0, %v4906_v11 }
 0x1d1   :  { %v1598_v54 = vpack.c.bf16 %v1582_v61, %v1582_v61  ;;  %v1584_v36 = vmul.f32 %v4908_v34, %v5427_v1 }
 0x1d2   :  { %4915 = vrcp.f32 %v1540_v35 }
 0x1d3   :  { %1813 = vrot.lane.b32.xlu1 %v1596_v25, %s5047_s24  ;;  %v1600_v17 = vpack.c.bf16 %v1584_v36, %v1584_v36 }
 0x1d4   :  { %2728 = vrot.lane.b32.xlu0 %v5480_v13, %s5048_s0 }
 0x1d5   :  { %v4910_v37 = vpop.eup %4909 }
 0x1d6   :  { %v1585_v2 = vmul.f32 %v4910_v37, %v5439_v18 }
 0x1d7   :  { %2673 = vrot.lane.b32.xlu1 %v1594_v15, %s5048_s0  ;;  %v4912_v40 = vpop.eup %4911 }
 0x1d8   :  { %1870 = vrot.lane.b32.xlu0 %v5494_v31, %s5047_s24  ;;  %v5514_v46 = vpack.c.bf16 %v1585_v2, %v1585_v2  ;;  %v1587_v1 = vmul.f32 %v4912_v40, %v5445_v57  ;;  %v5541_v57 = vpop.permute.xlu0 %3061 }
 0x1da   :  { %v4914_v45 = vpop.eup %4913  ;;  %v5521_v20 = vpack.c.bf16 %v1587_v1, %v1587_v1  ;;  %v2121_v1 = vsel %vm1638_vm5, %v5430_v38, 0 }
 0x1db   :  { %2730 = vrot.lane.b32.xlu1 %v1596_v25, %s5048_s0  ;;  %v1586_v39 = vmul.f32 %v4914_v45, %v5448_v58 }
 0x1dc   :  { %1929 = vrot.lane.b32.xlu0 %v5501_v62, %s5047_s24  ;;  %v4916_v42 = vpop.eup %4915 }
 0x1dd   :  { %v1602_v49 = vpack.c.bf16 %v1586_v39, %v1586_v39  ;;  %v1588_v18 = vmul.f32 %v4916_v42, %v5474_v16  ;;  %v2173_v39 = vsel %vm1638_vm5, %v5433_v48, 0  ;;  %v2225_v42 = vsel %vm1638_vm5, %v5465_v10, 0 }
 0x1df   :  { %1872 = vrot.lane.b32.xlu1 %v1598_v54, %s5047_s24  ;;  %v1604_v52 = vpack.c.bf16 %v1588_v18, %v1588_v18 }
 0x1e0   :  { %2785 = vrot.lane.b32.xlu0 %v5494_v31, %s5048_s0 }
 0x1e3   :  { %1931 = vrot.lane.b32.xlu1 %v1600_v17, %s5047_s24 }
 0x1e4   :  { %2842 = vrot.lane.b32.xlu0 %v5501_v62, %s5048_s0 }
 0x1e7   :  { %2787 = vrot.lane.b32.xlu1 %v1598_v54, %s5048_s0 }
 0x1e8   :  { %1988 = vrot.lane.b32.xlu0 %v5514_v46, %s5047_s24 }
 0x1eb   :  { %2844 = vrot.lane.b32.xlu1 %v1600_v17, %s5048_s0 }
 0x1ec   :  { %2047 = vrot.lane.b32.xlu0 %v5521_v20, %s5047_s24 }
 0x1ef   :  { %1990 = vrot.lane.b32.xlu1 %v1602_v49, %s5047_s24 }
 0x1f0   :  { %2899 = vrot.lane.b32.xlu0 %v5514_v46, %s5048_s0 }
 0x1f3   :  { %2049 = vrot.lane.b32.xlu1 %v1604_v52, %s5047_s24 }
 0x1f4   :  { %2956 = vrot.lane.b32.xlu0 %v5521_v20, %s5048_s0 }
 0x1f7   :  { %2901 = vrot.lane.b32.xlu1 %v1602_v49, %s5048_s0 }
 0x1fb   :  { %2958 = vrot.lane.b32.xlu1 %v1604_v52, %s5048_s0 }
 0x22d   :  { %v1627_v58 = vpop.permute.xlu1 %1626 }
 0x22e   :  { %v1694_v59 = vpop.permute.xlu0 %1693 }
 0x231   :  { %v1629_v60 = vpop.permute.xlu1 %1628 }
 0x232   :  { %v1630_v7 = vsel %vm59_vm1, %v1627_v58, %v1629_v60  ;;  %v5544_v24 = vpop.permute.xlu0 %2551 }
 0x233   :  { %v1640_v63 = vsel %vm1638_vm5, %v1630_v7, 0  ;;  %4817 = vmatprep.subr.msk.bf16.mxu0 %vm1638_vm5, %v1630_v7 }
 0x234   :  { %4610 = vmatpush3.bf16.msra.mxu0 %v1640_v63 }
 0x235   :  { %v1696_v3 = vpop.permute.xlu1 %1695 }
 0x236   :  { %v1697_v4 = vsel %vm59_vm1, %v1694_v59, %v1696_v3  ;;  %v5554_v5 = vpop.permute.xlu0 %2614  ;;  %v4852_v59 = vld [vmem:[%s7569_s3 + $0x28] sm:$0xff]  }
 0x237   :  { %v1699_v9 = vsel %vm1638_vm5, %v1697_v4, 0  ;;  %4818 = vmatprep.subr.msk.bf16.mxu1 %vm1638_vm5, %v1697_v4  ;;  %4612 = vmatmul.mubr.msk.bf16.vlgmr.msra.gmra.mrb[48].mxu0 %vm1631_vm4, %v5551_v0 }
 0x238   :  { %4616 = vmatpush3.bf16.msra.mxu1 %v1699_v9  ;;  %4623 = vmatprep.mubr.msk.bf16.mxu0 %vm1631_vm4, %v5463_v6 }
 0x239   :  { %v5562_v41 = vpop.permute.xlu1 %2553 }
 0x23a   :  { %v1753_v50 = vpop.permute.xlu0 %1752  ;;  %v2555_v49 = vsel %vm1023_vm3, %v5544_v24, %v5562_v41 }
 0x23b   :  { %4618 = vmatmul.mubr.msk.bf16.vlgmr.msra.gmra.mrb[48].mxu1 %vm1631_vm4, %v5551_v0  ;;  %v2563_v52 = vsel %vm1638_vm5, %v2555_v49, 0 }
 0x23c   :  { %4629 = vmatprep.mubr.msk.bf16.mxu1 %vm1631_vm4, %v5463_v6 }
 0x23d   :  { %v5568_v51 = vpop.permute.xlu1 %2616 }
 0x23e   :  { %v1812_v16 = vpop.permute.xlu0 %1811  ;;  %v2618_v18 = vsel %vm1023_vm3, %v5554_v5, %v5568_v51 }
 0x23f   :  { %v2620_v58 = vsel %vm1638_vm5, %v2618_v18, 0 }
 0x241   :  { %v1755_v55 = vpop.permute.xlu1 %1754 }
 0x242   :  { %v1756_v44 = vsel %vm59_vm1, %v1753_v50, %v1755_v55  ;;  %v5571_v12 = vpop.permute.xlu0 %2671 }
 0x243   :  { %v1758_v14 = vsel %vm1638_vm5, %v1756_v44, 0  ;;  %4819 = vmatprep.subr.msk.bf16.mxu0 %vm1638_vm5, %v1756_v44 }
 0x244   :  { %4622 = vmatpush3.bf16.msra.mxu0 %v1758_v14 }
 0x245   :  { %v1814_v8 = vpop.permute.xlu1 %1813 }
 0x246   :  { %v1815_v15 = vsel %vm59_vm1, %v1812_v16, %v1814_v8  ;;  %v5576_v19 = vpop.permute.xlu0 %2728 }
 0x247   :  { %v1817_v21 = vsel %vm1638_vm5, %v1815_v15, 0  ;;  %4820 = vmatprep.subr.msk.bf16.mxu1 %vm1638_vm5, %v1815_v15  ;;  %4624 = vmatmul.mubr.msk.bf16.vlgmr.msra.gmra.mrb[52].mxu0 %vm1631_vm4, %v5551_v0 }
 0x248   :  { %4628 = vmatpush3.bf16.msra.mxu1 %v1817_v21  ;;  %4635 = vmatprep.mubr.msk.bf16.mxu0 %vm1631_vm4, %v5463_v6 }
 0x249   :  { %v5584_v22 = vpop.permute.xlu1 %2673 }
 0x24a   :  { %v1871_v47 = vpop.permute.xlu0 %1870 }
 0x24b   :  { %4630 = vmatmul.mubr.msk.bf16.vlgmr.msra.gmra.mrb[52].mxu1 %vm1631_vm4, %v5551_v0 }
 0x24c   :  { %4641 = vmatprep.mubr.msk.bf16.mxu1 %vm1631_vm4, %v5463_v6 }
 0x24d   :  { %v5590_v25 = vpop.permute.xlu1 %2730 }
 0x24e   :  { %v1930_v26 = vpop.permute.xlu0 %1929  ;;  %v2732_v60 = vsel %vm1023_vm3, %v5576_v19, %v5590_v25 }
 0x24f   :  { %v2734_v63 = vsel %vm1638_vm5, %v2732_v60, 0 }
 0x251   :  { %v1873_v27 = vpop.permute.xlu1 %1872 }
 0x252   :  { %v1874_v28 = vsel %vm59_vm1, %v1871_v47, %v1873_v27  ;;  %v5594_v29 = vpop.permute.xlu0 %2785 }
 0x253   :  { %v1876_v43 = vsel %vm1638_vm5, %v1874_v28, 0  ;;  %4821 = vmatprep.subr.msk.bf16.mxu0 %vm1638_vm5, %v1874_v28 }
 0x254   :  { %4634 = vmatpush3.bf16.msra.mxu0 %v1876_v43 }
 0x255   :  { %v1932_v30 = vpop.permute.xlu1 %1931 }
 0x256   :  { %v1933_v32 = vsel %vm59_vm1, %v1930_v26, %v1932_v30  ;;  %v5604_v11 = vpop.permute.xlu0 %2842 }
 0x257   :  { %v1935_v33 = vsel %vm1638_vm5, %v1933_v32, 0  ;;  %4822 = vmatprep.subr.msk.bf16.mxu1 %vm1638_vm5, %v1933_v32  ;;  %4636 = vmatmul.mubr.msk.bf16.vlgmr.msra.gmra.mrb[56].mxu0 %vm1631_vm4, %v5551_v0 }
 0x258   :  { %4640 = vmatpush3.bf16.msra.mxu1 %v1935_v33  ;;  %4647 = vmatprep.mubr.msk.bf16.mxu0 %vm1631_vm4, %v5463_v6 }
 0x259   :  { %v5606_v61 = vpop.permute.xlu1 %2787 }
 0x25a   :  { %v1989_v35 = vpop.permute.xlu0 %1988  ;;  %v2789_v24 = vsel %vm1023_vm3, %v5594_v29, %v5606_v61 }
 0x25b   :  { %4642 = vmatmul.mubr.msk.bf16.vlgmr.msra.gmra.mrb[56].mxu1 %vm1631_vm4, %v5551_v0  ;;  %v2791_v5 = vsel %vm1638_vm5, %v2789_v24, 0 }
 0x25c   :  { %4653 = vmatprep.mubr.msk.bf16.mxu1 %vm1631_vm4, %v5463_v6  ;;  %v4849_v6 = vld [vmem:[%s7569_s3] sm:$0xff]  }
 0x25d   :  { %v5612_v34 = vpop.permute.xlu1 %2844 }
 0x25e   :  { %v2048_v17 = vpop.permute.xlu0 %2047  ;;  %v2846_v3 = vsel %vm1023_vm3, %v5604_v11, %v5612_v34 }
 0x25f   :  { %v2848_v50 = vsel %vm1638_vm5, %v2846_v3, 0 }
 0x261   :  { %v1991_v54 = vpop.permute.xlu1 %1990 }
 0x262   :  { %v1992_v36 = vsel %vm59_vm1, %v1989_v35, %v1991_v54  ;;  %v2900_v4 = vpop.permute.xlu0 %2899 }
 0x263   :  { %v1994_v37 = vsel %vm1638_vm5, %v1992_v36, 0  ;;  %4823 = vmatprep.subr.msk.bf16.mxu0 %vm1638_vm5, %v1992_v36 }
 0x264   :  { %4646 = vmatpush3.bf16.msra.mxu0 %v1994_v37 }
 0x265   :  { %v2050_v2 = vpop.permute.xlu1 %2049  ;;  %4825 = vmatprep.subr.msk.bf16.mxu0 %vm1638_vm5, %v5430_v38  ;;  %v4850_v38 = vld [vmem:[%s7569_s3 + $0x8] sm:$0xff]  }
 0x266   :  { %v2051_v40 = vsel %vm59_vm1, %v2048_v17, %v2050_v2  ;;  %v2957_v51 = vpop.permute.xlu0 %2956  ;;  %vm3812_vm1 = vcmask 31768  }
 0x267   :  { %v2053_v45 = vsel %vm1638_vm5, %v2051_v40, 0  ;;  %4648 = vmatmul.mubr.msk.bf16.vlgmr.msra.gmra.mrb[60].mxu0 %vm1631_vm4, %v5551_v0  ;;  %4824 = vmatprep.subr.msk.bf16.mxu1 %vm1638_vm5, %v2051_v40 }
 0x268   :  { %4652 = vmatpush3.bf16.msra.mxu1 %v2053_v45  ;;  %4658 = vmatpush3.bf16.msra.mxu0 %v2121_v1 }
 0x269   :  { %4826 = vmatprep.subr.msk.bf16.mxu1 %vm1638_vm5, %v5433_v48  ;;  %4827 = vmatprep.subr.msk.bf16.mxu0 %vm1638_vm5, %v5465_v10  ;;  %v2277_v48 = vsel %vm1638_vm5, %v5480_v13, 0  ;;  %v2329_v10 = vsel %vm1638_vm5, %v5494_v31, 0 }
 0x26a   :  { %4659 = vmatprep.mubr.msk.bf16.mxu0 %vm1631_vm4, %v4849_v6 }
 0x26b   :  { %4654 = vmatmul.mubr.msk.bf16.vlgmr.msra.gmra.mrb[60].mxu1 %vm1631_vm4, %v5551_v0  ;;  %v2902_v0 = vpop.permute.xlu1 %2901 }
 0x26c   :  { %4664 = vmatpush3.bf16.msra.mxu1 %v2173_v39  ;;  %4665 = vmatprep.mubr.msk.bf16.mxu1 %vm1631_vm4, %v4849_v6  ;;  %v2903_v9 = vsel %vm1023_vm3, %v2900_v4, %v2902_v0 }
 0x26d   :  { %4828 = vmatprep.subr.msk.bf16.mxu1 %vm1638_vm5, %v5480_v13  ;;  %v2381_v13 = vsel %vm1638_vm5, %v5501_v62, 0  ;;  %v2905_v55 = vsel %vm1638_vm5, %v2903_v9, 0 }
 0x26f   :  { %4660 = vmatmul.mubr.msk.bf16.vlgmr.msra.gmra.mrb[48].mxu0 %vm1631_vm4, %v4850_v38  ;;  %v2959_v41 = vpop.permute.xlu1 %2958 }
 0x270   :  { %4670 = vmatpush3.bf16.msra.mxu0 %v2225_v42  ;;  %4671 = vmatprep.mubr.msk.bf16.mxu0 %vm1631_vm4, %v4849_v6  ;;  %v2960_v16 = vsel %vm1023_vm3, %v2957_v51, %v2959_v41 }
 0x271   :  { %4829 = vmatprep.subr.msk.bf16.mxu0 %vm1638_vm5, %v5494_v31  ;;  %v2433_v31 = vsel %vm1638_vm5, %v5514_v46, 0  ;;  %v2962_v44 = vsel %vm1638_vm5, %v2960_v16, 0 }
 0x273   :  { %4666 = vmatmul.mubr.msk.bf16.vlgmr.msra.gmra.mrb[48].mxu1 %vm1631_vm4, %v4850_v38 }
 0x274   :  { %4676 = vmatpush3.bf16.msra.mxu1 %v2277_v48  ;;  %4677 = vmatprep.mubr.msk.bf16.mxu1 %vm1631_vm4, %v4849_v6 }
 0x275   :  { %4830 = vmatprep.subr.msk.bf16.mxu1 %vm1638_vm5, %v5501_v62  ;;  %v2485_v62 = vsel %vm1638_vm5, %v5521_v20, 0 }
 0x277   :  { %4672 = vmatmul.mubr.msk.bf16.vlgmr.msra.gmra.mrb[52].mxu0 %vm1631_vm4, %v4850_v38 }
 0x278   :  { %4682 = vmatpush3.bf16.msra.mxu0 %v2329_v10  ;;  %4683 = vmatprep.mubr.msk.bf16.mxu0 %vm1631_vm4, %v4849_v6 }
 0x279   :  { %4831 = vmatprep.subr.msk.bf16.mxu0 %vm1638_vm5, %v5514_v46  ;;  %v4851_v46 = vld [vmem:[%s7569_s3 + $0x20] sm:$0xff]  }
 0x27b   :  { %4678 = vmatmul.mubr.msk.bf16.vlgmr.msra.gmra.mrb[52].mxu1 %vm1631_vm4, %v4850_v38 }
 0x27c   :  { %4688 = vmatpush3.bf16.msra.mxu1 %v2381_v13  ;;  %4689 = vmatprep.mubr.msk.bf16.mxu1 %vm1631_vm4, %v4849_v6 }
 0x27d   :  { %4832 = vmatprep.subr.msk.bf16.mxu1 %vm1638_vm5, %v5521_v20  ;;  %v2675_v20 = vsel %vm1023_vm3, %v5571_v12, %v5584_v22  ;;  %vm4072_vm3 = vcmask 48168  }
 0x27e   :  { %v2677_v7 = vsel %vm1638_vm5, %v2675_v20, 0 }
 0x27f   :  { %4684 = vmatmul.mubr.msk.bf16.vlgmr.msra.gmra.mrb[56].mxu0 %vm1631_vm4, %v4850_v38 }
 0x280   :  { %4694 = vmatpush3.bf16.msra.mxu0 %v2433_v31  ;;  %4695 = vmatprep.mubr.msk.bf16.mxu0 %vm1631_vm4, %v4849_v6 }
 0x281   :  { %4833 = vmatprep.subr.msk.bf16.mxu0 %vm1638_vm5, %v2555_v49 }
 0x283   :  { %4690 = vmatmul.mubr.msk.bf16.vlgmr.msra.gmra.mrb[56].mxu1 %vm1631_vm4, %v4850_v38 }
 0x284   :  { %4700 = vmatpush3.bf16.msra.mxu1 %v2485_v62  ;;  %4701 = vmatprep.mubr.msk.bf16.mxu1 %vm1631_vm4, %v4849_v6 }
 0x285   :  { %4834 = vmatprep.subr.msk.bf16.mxu1 %vm1638_vm5, %v2618_v18 }
 0x287   :  { %4696 = vmatmul.mubr.msk.bf16.vlgmr.msra.gmra.mrb[60].mxu0 %vm1631_vm4, %v4850_v38 }
 0x288   :  { %4706 = vmatpush3.bf16.msra.mxu0 %v2563_v52  ;;  %4707 = vmatprep.mubr.msk.bf16.mxu0 %vm1631_vm4, %v4851_v46 }
 0x289   :  { %4835 = vmatprep.subr.msk.bf16.mxu0 %vm1638_vm5, %v2675_v20 }
 0x28b   :  { %4702 = vmatmul.mubr.msk.bf16.vlgmr.msra.gmra.mrb[60].mxu1 %vm1631_vm4, %v4850_v38 }
 0x28c   :  { %4712 = vmatpush3.bf16.msra.mxu1 %v2620_v58  ;;  %4713 = vmatprep.mubr.msk.bf16.mxu1 %vm1631_vm4, %v4851_v46 }
 0x28d   :  { %4836 = vmatprep.subr.msk.bf16.mxu1 %vm1638_vm5, %v2732_v60 }
 0x28f   :  { %4708 = vmatmul.mubr.msk.bf16.vlgmr.msra.gmra.mrb[48].mxu0 %vm1631_vm4, %v4852_v59 }
 0x290   :  { %4718 = vmatpush3.bf16.msra.mxu0 %v2677_v7  ;;  %4719 = vmatprep.mubr.msk.bf16.mxu0 %vm1631_vm4, %v4851_v46 }
 0x291   :  { %4837 = vmatprep.subr.msk.bf16.mxu0 %vm1638_vm5, %v2789_v24 }
 0x293   :  { %4714 = vmatmul.mubr.msk.bf16.vlgmr.msra.gmra.mrb[48].mxu1 %vm1631_vm4, %v4852_v59 }
 0x294   :  { %4724 = vmatpush3.bf16.msra.mxu1 %v2734_v63  ;;  %4725 = vmatprep.mubr.msk.bf16.mxu1 %vm1631_vm4, %v4851_v46 }
 0x295   :  { %4838 = vmatprep.subr.msk.bf16.mxu1 %vm1638_vm5, %v2846_v3 }
 0x297   :  { %4720 = vmatmul.mubr.msk.bf16.vlgmr.msra.gmra.mrb[52].mxu0 %vm1631_vm4, %v4852_v59 }
 0x298   :  { %4730 = vmatpush3.bf16.msra.mxu0 %v2791_v5  ;;  %4731 = vmatprep.mubr.msk.bf16.mxu0 %vm1631_vm4, %v4851_v46 }
 0x299   :  { %4839 = vmatprep.subr.msk.bf16.mxu0 %vm1638_vm5, %v2903_v9 }
 0x29b   :  { %4726 = vmatmul.mubr.msk.bf16.vlgmr.msra.gmra.mrb[52].mxu1 %vm1631_vm4, %v4852_v59 }
 0x29c   :  { %4736 = vmatpush3.bf16.msra.mxu1 %v2848_v50  ;;  %4737 = vmatprep.mubr.msk.bf16.mxu1 %vm1631_vm4, %v4851_v46 }
 0x29d   :  { %4840 = vmatprep.subr.msk.bf16.mxu1 %vm1638_vm5, %v2960_v16  ;;  %vm4332_vm5 = vcmask 64568  }
 0x29f   :  { %4732 = vmatmul.mubr.msk.bf16.vlgmr.msra.gmra.mrb[56].mxu0 %vm1631_vm4, %v4852_v59 }
 0x2a0   :  { %4742 = vmatpush3.bf16.msra.mxu0 %v2905_v55  ;;  %4743 = vmatprep.mubr.msk.bf16.mxu0 %vm1631_vm4, %v4851_v46 }
 0x2a3   :  { %4738 = vmatmul.mubr.msk.bf16.vlgmr.msra.gmra.mrb[56].mxu1 %vm1631_vm4, %v4852_v59 }
 0x2a4   :  { %4748 = vmatpush3.bf16.msra.mxu1 %v2962_v44  ;;  %4749 = vmatprep.mubr.msk.bf16.mxu1 %vm1631_vm4, %v4851_v46 }
 0x2a7   :  { %4744 = vmatmul.mubr.msk.bf16.vlgmr.msra.gmra.mrb[60].mxu0 %vm1631_vm4, %v4852_v59 }
 0x2ab   :  { %4750 = vmatmul.mubr.msk.bf16.vlgmr.msra.gmra.mrb[60].mxu1 %vm1631_vm4, %v4852_v59  ;;  %vm4202_vm4 = vcmask 56368  }
 0x362   :  { %v4709_v12 = vpop.f32.mrb[48].mxu0 }
 0x363   :  { %v3071_v14 = vadd.f32 %v4709_v12, %v5541_v57  ;;  %v2599_v8 = vpop.f32.mrb[49].mxu0 }
 0x364   :  { %v5738_v15 = vadd.f32 %v5537_v23, %v2599_v8  ;;  %v4710_v19 = vpop.f32.mrb[50].mxu0 }
 0x365   :  { %v4507_v21 = vmul.f32 -1.442695, %v3071_v14  ;;  %v5741_v22 = vadd.f32 %v4710_v19, %v5539_v56  ;;  %v5743_v47 = vpop.f32.mrb[51].mxu0 }
 0x366   :  { %v4505_v25 = vmul.f32 -1.442695, %v5738_v15  ;;  %v4715_v26 = vpop.f32.mrb[48].mxu1 }
 0x367   :  { %4917 = vpow2.f32 %v4507_v21  ;;  %v4508_v27 = vmul.f32 -1.442695, %v5741_v22  ;;  %v3075_v28 = vadd.f32 %v4715_v26, %v5541_v57  ;;  %v5748_v43 = vpop.f32.mrb[49].mxu1 }
 0x368   :  { %4919 = vpow2.f32 %v4505_v25  ;;  %v4716_v29 = vpop.f32.mrb[50].mxu1 }
 0x369   :  { %4921 = vpow2.f32 %v4508_v27  ;;  %v4511_v30 = vmul.f32 -1.442695, %v3075_v28  ;;  %v5751_v32 = vadd.f32 %v4716_v29, %v5539_v56  ;;  %v5753_v33 = vpop.f32.mrb[51].mxu1 }
 0x36a   :  { %v5755_v11 = vpop.f32.mrb[52].mxu0 }
 0x36b   :  { %4923 = vpow2.f32 %v4511_v30  ;;  %v4512_v61 = vmul.f32 -1.442695, %v5751_v32  ;;  %v5758_v34 = vpop.f32.mrb[53].mxu0  ;;  %v3073_v30 = vadd.f32 %v5537_v23, %v5748_v43 }
 0x36c   :  { %v5760_v35 = vpop.f32.mrb[54].mxu0 }
 0x36d   :  { %4925 = vpow2.f32 %v4512_v61  ;;  %v5762_v54 = vpop.f32.mrb[55].mxu0 }
 0x36e   :  { %v5764_v36 = vpop.f32.mrb[52].mxu1 }
 0x36f   :  { %v5766_v37 = vpop.f32.mrb[53].mxu1 }
 0x370   :  { %v5768_v17 = vpop.f32.mrb[54].mxu1 }
 0x371   :  { %v4918_v2 = vpop.eup %4917  ;;  %v5770_v40 = vpop.f32.mrb[55].mxu1 }
 0x372   :  { %v4920_v6 = vpop.eup %4919  ;;  %v3199_v45 = vadd.f32 1.0, %v4918_v2  ;;  %v5772_v1 = vpop.f32.mrb[56].mxu0  ;;  %v4509_v2 = vmul.f32 -1.442695, %v3073_v30 }
 0x373   :  { %v4922_v39 = vpop.eup %4921  ;;  %v3197_v38 = vadd.f32 1.0, %v4920_v6  ;;  %v5774_v42 = vpop.f32.mrb[57].mxu0 }
 0x374   :  { %4927 = vrcp.f32 %v3199_v45  ;;  %v5776_v48 = vpop.f32.mrb[58].mxu0  ;;  %v3200_v31 = vadd.f32 1.0, %v4922_v39  ;;  %v3074_v39 = vadd.f32 %v5535_v53, %v5753_v33 }
 0x375   :  { %v4924_v10 = vpop.eup %4923  ;;  %v5778_v13 = vpop.f32.mrb[59].mxu0  ;;  %4929 = vrcp.f32 %v3197_v38 }
 0x376   :  { %v3203_v49 = vadd.f32 1.0, %v4924_v10  ;;  %v5780_v62 = vpop.f32.mrb[56].mxu1 }
 0x377   :  { %v4926_v18 = vpop.eup %4925  ;;  %v5782_v46 = vpop.f32.mrb[57].mxu1 }
 0x378   :  { %4931 = vrcp.f32 %v3203_v49  ;;  %v5784_v52 = vpop.f32.mrb[58].mxu1  ;;  %v3204_v58 = vadd.f32 1.0, %v4926_v18  ;;  %v4510_v49 = vmul.f32 -1.442695, %v3074_v39 }
 0x379   :  { %v5786_v20 = vpop.f32.mrb[59].mxu1  ;;  %4933 = vrcp.f32 %v3200_v31  ;;  %v3070_v31 = vadd.f32 %v5535_v53, %v5743_v47 }
 0x37a   :  { %v5788_v59 = vpop.f32.mrb[60].mxu0  ;;  %4935 = vrcp.f32 %v3204_v58 }
 0x37b   :  { %v5790_v60 = vpop.f32.mrb[61].mxu0  ;;  %4937 = vpow2.f32 %v4509_v2 }
 0x37c   :  { %v5792_v7 = vpop.f32.mrb[62].mxu0  ;;  %4939 = vpow2.f32 %v4510_v49 }
 0x37d   :  { %v5794_v24 = vpop.f32.mrb[63].mxu0 }
 0x37e   :  { %v4928_v63 = vpop.eup %4927  ;;  %v5796_v0 = vpop.f32.mrb[60].mxu1 }
 0x37f   :  { %v5798_v3 = vmul.f32 %v4928_v63, %v3071_v14  ;;  %v5800_v4 = vpop.f32.mrb[61].mxu1  ;;  %v4930_v5 = vpop.eup %4929  ;;  %v4506_v63 = vmul.f32 -1.442695, %v3070_v31 }
 0x380   :  { %v5802_v9 = vpop.f32.mrb[62].mxu1  ;;  %v5807_v51 = vmul.f32 %v4930_v5, %v5738_v15 }
 0x381   :  { %v5804_v41 = vpop.f32.mrb[63].mxu1  ;;  %v3332_v55 = vsel %vm3325_vm6, %v5798_v3, -inf  ;;  %v3462_v19 = vsel %vm3455_vm7, %v5798_v3, -inf  ;;  %v3592_v27 = vsel %vm3585_vm8, %v5798_v3, -inf  ;;  %v3722_v61 = vsel %vm3715_vm9, %v5798_v3, -inf }
 0x382   :  { %v4932_v50 = vpop.eup %4931  ;;  %3333 = vmax.xlane.f32.xlu0 %v3332_v55  ;;  %v3326_v8 = vsel %vm3325_vm6, %v5807_v51, -inf  ;;  %v3852_v38 = vsel %vm3845_vm10, %v5798_v3, -inf  ;;  %v3982_v5 = vsel %vm3975_vm11, %v5798_v3, -inf  ;;  %4941 = vpow2.f32 %v4506_v63 }
 0x383   :  { %v5809_v16 = vmul.f32 %v4932_v50, %v3075_v28  ;;  %v4934_v44 = vpop.eup %4933  ;;  %v5915_v63 = vadd.f32 %v5755_v11, %v5541_v57  ;;  %v5930_v11 = vadd.f32 %v5760_v35, %v5539_v56 }
 0x384   :  { %v5816_v14 = vmul.f32 %v4934_v44, %v5741_v22  ;;  %v4936_v15 = vpop.eup %4935 }
 0x385   :  { %v3344_v12 = vsel %vm3325_vm6, %v5809_v16, -inf  ;;  %v5823_v21 = vmul.f32 %v4936_v15, %v5751_v32  ;;  %v3474_v22 = vsel %vm3455_vm7, %v5809_v16, -inf  ;;  %v3604_v29 = vsel %vm3585_vm8, %v5809_v16, -inf  ;;  %v4938_v58 = vpop.eup %4937 }
 0x386   :  { %3345 = vmax.xlane.f32.xlu1 %v3344_v12  ;;  %3327 = vmax.xlane.f32.xlu0 %v3326_v8  ;;  %v3335_v25 = vsel %vm3325_vm6, %v5816_v14, -inf  ;;  %v3465_v28 = vsel %vm3455_vm7, %v5816_v14, -inf  ;;  %v3595_v6 = vsel %vm3585_vm8, %v5816_v14, -inf  ;;  %v3734_v45 = vsel %vm3715_vm9, %v5809_v16, -inf  ;;  %v4940_v8 = vpop.eup %4939 }
 0x387   :  { %v3347_v26 = vsel %vm3325_vm6, %v5823_v21, -inf  ;;  %v3477_v32 = vsel %vm3455_vm7, %v5823_v21, -inf  ;;  %v3607_v43 = vsel %vm3585_vm8, %v5823_v21, -inf  ;;  %v3725_v10 = vsel %vm3715_vm9, %v5816_v14, -inf }
 0x388   :  { %v3864_v18 = vsel %vm3845_vm10, %v5809_v16, -inf  ;;  %v3737_v33 = vsel %vm3715_vm9, %v5823_v21, -inf  ;;  %v3855_v47 = vsel %vm3845_vm10, %v5816_v14, -inf  ;;  %v3201_v50 = vadd.f32 1.0, %v4938_v58 }
 0x389   :  { %v3994_v55 = vsel %vm3975_vm11, %v5809_v16, -inf  ;;  %v3867_v44 = vsel %vm3845_vm10, %v5823_v21, -inf  ;;  %v4112_v12 = vsel %vm4105_vm12, %v5798_v3, -inf  ;;  %v3985_v15 = vsel %vm3975_vm11, %v5816_v14, -inf }
 0x38a   :  { %3463 = vmax.xlane.f32.xlu1 %v3462_v19  ;;  %3336 = vmax.xlane.f32.xlu0 %v3335_v25  ;;  %4943 = vrcp.f32 %v3201_v50  ;;  %v4124_v19 = vsel %vm4105_vm12, %v5809_v16, -inf  ;;  %v3202_v25 = vadd.f32 1.0, %v4940_v8  ;;  %v4254_v2 = vsel %vm4235_vm13, %v5809_v16, -inf }
 0x38b   :  { %v3716_v58 = vsel %vm3715_vm9, %v5807_v51, -inf  ;;  %v4515_v50 = vmul.f32 -1.442695, %v5915_v63 }
 0x38c   :  { %4945 = vrcp.f32 %v3202_v25 }
 0x38e   :  { %3475 = vmax.xlane.f32.xlu1 %v3474_v22  ;;  %3348 = vmax.xlane.f32.xlu0 %v3347_v26  ;;  %v4942_v22 = vpop.eup %4941  ;;  %v3997_v26 = vsel %vm3975_vm11, %v5823_v21, -inf }
 0x392   :  { %3593 = vmax.xlane.f32.xlu1 %v3592_v27  ;;  %3466 = vmax.xlane.f32.xlu0 %v3465_v28  ;;  %v4242_v27 = vsel %vm4235_vm13, %v5798_v3, -inf }
 0x394   :  { %v4944_v28 = vpop.eup %4943 }
 0x396   :  { %3605 = vmax.xlane.f32.xlu1 %v3604_v29  ;;  %3478 = vmax.xlane.f32.xlu0 %v3477_v32  ;;  %v3198_v29 = vadd.f32 1.0, %v4942_v22  ;;  %v4115_v32 = vsel %vm4105_vm12, %v5816_v14, -inf }
 0x398   :  { %4947 = vrcp.f32 %v3198_v29 }
 0x399   :  { %4949 = vpow2.f32 %v4515_v50 }
 0x39a   :  { %3723 = vmax.xlane.f32.xlu1 %v3722_v61  ;;  %3596 = vmax.xlane.f32.xlu0 %v3595_v6  ;;  %v5881_v61 = vmul.f32 %v4944_v28, %v3073_v30  ;;  %v4127_v6 = vsel %vm4105_vm12, %v5823_v21, -inf  ;;  %v3456_v30 = vsel %vm3455_vm7, %v5807_v51, -inf }
 0x39c   :  { %v3338_v3 = vsel %vm3325_vm6, %v5881_v61, -inf  ;;  %v3468_v49 = vsel %vm3455_vm7, %v5881_v61, -inf  ;;  %v3858_v35 = vsel %vm3845_vm10, %v5881_v61, -inf  ;;  %v3988_v28 = vsel %vm3975_vm11, %v5881_v61, -inf }
 0x39e   :  { %3735 = vmax.xlane.f32.xlu1 %v3734_v45  ;;  %3608 = vmax.xlane.f32.xlu0 %v3607_v43  ;;  %v4245_v45 = vsel %vm4235_vm13, %v5816_v14, -inf  ;;  %v4946_v43 = vpop.eup %4945 }
 0x39f   :  { %v5893_v16 = vmul.f32 %v4946_v43, %v3074_v39 }
 0x3a1   :  { %v3341_v14 = vsel %vm3325_vm6, %v5893_v16, -inf  ;;  %v3731_v25 = vsel %vm3715_vm9, %v5893_v16, -inf  ;;  %v3861_v29 = vsel %vm3845_vm10, %v5893_v16, -inf }
 0x3a2   :  { %3853 = vmax.xlane.f32.xlu1 %v3852_v38  ;;  %3726 = vmax.xlane.f32.xlu0 %v3725_v10  ;;  %v4257_v38 = vsel %vm4235_vm13, %v5823_v21, -inf  ;;  %v4948_v10 = vpop.eup %4947  ;;  %v3598_v21 = vsel %vm3585_vm8, %v5881_v61, -inf }
 0x3a6   :  { %3865 = vmax.xlane.f32.xlu1 %v3864_v18  ;;  %3738 = vmax.xlane.f32.xlu0 %v3737_v33  ;;  %v5899_v18 = vmul.f32 %v4948_v10, %v3070_v31  ;;  %v3586_v33 = vsel %vm3585_vm8, %v5807_v51, -inf  ;;  %v3471_v31 = vsel %vm3455_vm7, %v5893_v16, -inf }
 0x3a8   :  { %v3459_v39 = vsel %vm3455_vm7, %v5899_v18, -inf  ;;  %v4239_v50 = vsel %vm4235_vm13, %v5899_v18, -inf }
 0x3aa   :  { %3983 = vmax.xlane.f32.xlu1 %v3982_v5  ;;  %3856 = vmax.xlane.f32.xlu0 %v3855_v47  ;;  %v3589_v5 = vsel %vm3585_vm8, %v5899_v18, -inf  ;;  %v3728_v47 = vsel %vm3715_vm9, %v5881_v61, -inf }
 0x3ae   :  { %3995 = vmax.xlane.f32.xlu1 %v3994_v55  ;;  %3868 = vmax.xlane.f32.xlu0 %v3867_v44  ;;  %v5924_v55 = vadd.f32 %v5764_v36, %v5541_v57  ;;  %v3601_v44 = vsel %vm3585_vm8, %v5893_v16, -inf  ;;  %v4516_v36 = vmul.f32 -1.442695, %v5930_v11 }
 0x3b0   :  { %v4519_v8 = vmul.f32 -1.442695, %v5924_v55 }
 0x3b2   :  { %4113 = vmax.xlane.f32.xlu1 %v4112_v12  ;;  %3986 = vmax.xlane.f32.xlu0 %v3985_v15  ;;  %v3846_v12 = vsel %vm3845_vm10, %v5807_v51, -inf  ;;  %v3719_v15 = vsel %vm3715_vm9, %v5899_v18, -inf  ;;  %4951 = vpow2.f32 %v4519_v8  ;;  %v4251_v8 = vsel %vm4235_vm13, %v5893_v16, -inf }
 0x3b3   :  { %4953 = vpow2.f32 %v4516_v36 }
 0x3b6   :  { %4125 = vmax.xlane.f32.xlu1 %v4124_v19  ;;  %3998 = vmax.xlane.f32.xlu0 %v3997_v26  ;;  %v3084_v19 = vadd.f32 %v5768_v17, %v5539_v56  ;;  %v3976_v26 = vsel %vm3975_vm11, %v5807_v51, -inf  ;;  %v4950_v17 = vpop.eup %4949 }
 0x3b8   :  { %v4520_v22 = vmul.f32 -1.442695, %v3084_v19 }
 0x3ba   :  { %4243 = vmax.xlane.f32.xlu1 %v4242_v27  ;;  %4116 = vmax.xlane.f32.xlu0 %v4115_v32  ;;  %v3849_v27 = vsel %vm3845_vm10, %v5899_v18, -inf  ;;  %4955 = vpow2.f32 %v4520_v22  ;;  %v3207_v32 = vadd.f32 1.0, %v4950_v17 }
 0x3bc   :  { %4957 = vrcp.f32 %v3207_v32 }
 0x3be   :  { %4255 = vmax.xlane.f32.xlu1 %v4254_v2  ;;  %4128 = vmax.xlane.f32.xlu0 %v4127_v6  ;;  %v4952_v2 = vpop.eup %4951  ;;  %v4106_v6 = vsel %vm4105_vm12, %v5807_v51, -inf }
 0x3bf   :  { %v3211_v43 = vadd.f32 1.0, %v4952_v2 }
 0x3c1   :  { %4959 = vrcp.f32 %v3211_v43 }
 0x3c2   :  { %3339 = vmax.xlane.f32.xlu1 %v3338_v3  ;;  %4246 = vmax.xlane.f32.xlu0 %v4245_v45  ;;  %v4954_v3 = vpop.eup %4953  ;;  %v3979_v45 = vsel %vm3975_vm11, %v5899_v18, -inf }
 0x3c4   :  { %v4956_v10 = vpop.eup %4955 }
 0x3c6   :  { %3457 = vmax.xlane.f32.xlu1 %v3456_v30  ;;  %4258 = vmax.xlane.f32.xlu0 %v4257_v38  ;;  %v4118_v30 = vsel %vm4105_vm12, %v5881_v61, -inf  ;;  %v3208_v38 = vadd.f32 1.0, %v4954_v3 }
 0x3c8   :  { %4961 = vrcp.f32 %v3208_v38  ;;  %v6046_v38 = vadd.f32 %v5535_v53, %v5762_v54 }
 0x3ca   :  { %3469 = vmax.xlane.f32.xlu1 %v3468_v49  ;;  %3342 = vmax.xlane.f32.xlu0 %v3341_v14  ;;  %v3991_v49 = vsel %vm3975_vm11, %v5893_v16, -inf  ;;  %v4236_v14 = vsel %vm4235_vm13, %v5807_v51, -inf  ;;  %v3329_v51 = vsel %vm3325_vm6, %v5899_v18, -inf  ;;  %v4514_v54 = vmul.f32 -1.442695, %v6046_v38 }
 0x3ce   :  { %3587 = vmax.xlane.f32.xlu1 %v3586_v33  ;;  %3460 = vmax.xlane.f32.xlu0 %v3459_v39  ;;  %v3212_v33 = vadd.f32 1.0, %v4956_v10  ;;  %v4109_v39 = vsel %vm4105_vm12, %v5899_v18, -inf }
 0x3d0   :  { %4963 = vrcp.f32 %v3212_v33 }
 0x3d2   :  { %3599 = vmax.xlane.f32.xlu1 %v3598_v21  ;;  %3472 = vmax.xlane.f32.xlu0 %v3471_v31  ;;  %v4248_v21 = vsel %vm4235_vm13, %v5881_v61, -inf  ;;  %v4958_v31 = vpop.eup %4957 }
 0x3d6   :  { %3717 = vmax.xlane.f32.xlu1 %v3716_v58  ;;  %3590 = vmax.xlane.f32.xlu0 %v3589_v5  ;;  %v4121_v58 = vsel %vm4105_vm12, %v5893_v16, -inf  ;;  %v5969_v5 = vmul.f32 %v4958_v31, %v5915_v63 }
 0x3d8   :  { %v3616_v22 = vsel %vm3585_vm8, %v5969_v5, -inf  ;;  %v3746_v3 = vsel %vm3715_vm9, %v5969_v5, -inf  ;;  %v3876_v31 = vsel %vm3845_vm10, %v5969_v5, -inf }
 0x3da   :  { %3729 = vmax.xlane.f32.xlu1 %v3728_v47  ;;  %3602 = vmax.xlane.f32.xlu0 %v3601_v44  ;;  %v4960_v47 = vpop.eup %4959 }
 0x3db   :  { %v4962_v44 = vpop.eup %4961  ;;  %v5976_v61 = vmul.f32 %v4960_v47, %v5924_v55 }
 0x3dc   :  { %v5981_v63 = vmul.f32 %v4962_v44, %v5930_v11 }
 0x3dd   :  { %v3368_v18 = vsel %vm3325_vm6, %v5976_v61, -inf  ;;  %v3498_v16 = vsel %vm3455_vm7, %v5976_v61, -inf }
 0x3de   :  { %3847 = vmax.xlane.f32.xlu1 %v3846_v12  ;;  %3720 = vmax.xlane.f32.xlu0 %v3719_v15  ;;  %v3356_v12 = vsel %vm3325_vm6, %v5969_v5, -inf  ;;  %v4964_v15 = vpop.eup %4963  ;;  %v3359_v55 = vsel %vm3325_vm6, %v5981_v63, -inf  ;;  %v3619_v32 = vsel %vm3585_vm8, %v5981_v63, -inf  ;;  %v3879_v44 = vsel %vm3845_vm10, %v5981_v63, -inf }
 0x3df   :  { %v5987_v36 = vmul.f32 %v4964_v15, %v3084_v19  ;;  %v3489_v19 = vsel %vm3455_vm7, %v5981_v63, -inf }
 0x3e1   :  { %v3371_v11 = vsel %vm3325_vm6, %v5987_v36, -inf  ;;  %v3631_v43 = vsel %vm3585_vm8, %v5987_v36, -inf }
 0x3e2   :  { %3859 = vmax.xlane.f32.xlu1 %v3858_v35  ;;  %3732 = vmax.xlane.f32.xlu0 %v3731_v25  ;;  %v3486_v35 = vsel %vm3455_vm7, %v5969_v5, -inf }
 0x3e6   :  { %3977 = vmax.xlane.f32.xlu1 %v3976_v26  ;;  %3850 = vmax.xlane.f32.xlu0 %v3849_v27  ;;  %v3501_v26 = vsel %vm3455_vm7, %v5987_v36, -inf }
 0x3ea   :  { %3989 = vmax.xlane.f32.xlu1 %v3988_v28  ;;  %3862 = vmax.xlane.f32.xlu0 %v3861_v29  ;;  %v3628_v28 = vsel %vm3585_vm8, %v5976_v61, -inf  ;;  %v6019_v29 = vadd.f32 %v5537_v23, %v5758_v34 }
 0x3ec   :  { %v4513_v34 = vmul.f32 -1.442695, %v6019_v29 }
 0x3ee   :  { %4107 = vmax.xlane.f32.xlu1 %v4106_v6  ;;  %3980 = vmax.xlane.f32.xlu0 %v3979_v45  ;;  %v6036_v45 = vadd.f32 %v5537_v23, %v5766_v37  ;;  %4965 = vpow2.f32 %v4513_v34 }
 0x3f0   :  { %v4517_v37 = vmul.f32 -1.442695, %v6036_v45 }
 0x3f2   :  { %4119 = vmax.xlane.f32.xlu1 %v4118_v30  ;;  %3992 = vmax.xlane.f32.xlu0 %v3991_v49  ;;  %v3758_v49 = vsel %vm3715_vm9, %v5976_v61, -inf  ;;  %4967 = vpow2.f32 %v4517_v37 }
 0x3f3   :  { %4969 = vpow2.f32 %v4514_v54 }
 0x3f6   :  { %4237 = vmax.xlane.f32.xlu1 %v4236_v14  ;;  %4110 = vmax.xlane.f32.xlu0 %v4109_v39  ;;  %v3749_v14 = vsel %vm3715_vm9, %v5981_v63, -inf  ;;  %v6064_v39 = vadd.f32 %v5535_v53, %v5770_v40 }
 0x3f8   :  { %v4518_v40 = vmul.f32 -1.442695, %v6064_v39 }
 0x3fa   :  { %4249 = vmax.xlane.f32.xlu1 %v4248_v21  ;;  %4122 = vmax.xlane.f32.xlu0 %v4121_v58  ;;  %v3761_v58 = vsel %vm3715_vm9, %v5987_v36, -inf  ;;  %4971 = vpow2.f32 %v4518_v40 }
 0x3fe   :  { %3330 = vmax.xlane.f32.xlu1 %v3329_v51  ;;  %4240 = vmax.xlane.f32.xlu0 %v4239_v50  ;;  %v3888_v50 = vsel %vm3845_vm10, %v5976_v61, -inf }
 0x402   :  { %3357 = vmax.xlane.f32.xlu1 %v3356_v12  ;;  %4252 = vmax.xlane.f32.xlu0 %v4251_v8  ;;  %v4966_v8 = vpop.eup %4965 }
 0x406   :  { %3369 = vmax.xlane.f32.xlu1 %v3368_v18  ;;  %3360 = vmax.xlane.f32.xlu0 %v3359_v55  ;;  %v4006_v18 = vsel %vm3975_vm11, %v5969_v5, -inf  ;;  %v3891_v55 = vsel %vm3845_vm10, %v5987_v36, -inf }
 0x40a   :  { %3487 = vmax.xlane.f32.xlu1 %v3486_v35  ;;  %3372 = vmax.xlane.f32.xlu0 %v3371_v11  ;;  %v3205_v11 = vadd.f32 1.0, %v4966_v8  ;;  %v4281_v8 = vsel %vm4235_vm13, %v5987_v36, -inf }
 0x40c   :  { %4973 = vrcp.f32 %v3205_v11 }
 0x40e   :  { %3499 = vmax.xlane.f32.xlu1 %v3498_v16  ;;  %3490 = vmax.xlane.f32.xlu0 %v3489_v19  ;;  %v4968_v16 = vpop.eup %4967 }
 0x40f   :  { %v3334_v25 = vpop.xlane.xlu0 %3333 }
 0x410   :  { %3425 = vst.msk [vmem:[%s7570_s5 + $0x10] sm:$0xff] %vm3422_vm14, %v3334_v25  ;;  %v4018_v25 = vsel %vm3975_vm11, %v5976_v61, -inf }
 0x412   :  { %3617 = vmax.xlane.f32.xlu1 %v3616_v22  ;;  %3502 = vmax.xlane.f32.xlu0 %v3501_v26  ;;  %v4970_v22 = vpop.eup %4969  ;;  %v4009_v26 = vsel %vm3975_vm11, %v5981_v63, -inf }
 0x413   :  { %v3346_v27 = vpop.xlane.xlu1 %3345  ;;  %v3328_v17 = vpop.xlane.xlu0 %3327 }
 0x414   :  { %3429 = vst.msk [vmem:[%s7570_s5 + $0x30] sm:$0xff] %vm3422_vm14, %v3346_v27  ;;  %3423 = vst.msk [vmem:[%s7570_s5] sm:$0xff] %vm3422_vm14, %v3328_v17  ;;  %v3209_v17 = vadd.f32 1.0, %v4968_v16 }
 0x416   :  { %3629 = vmax.xlane.f32.xlu1 %v3628_v28  ;;  %3620 = vmax.xlane.f32.xlu0 %v3619_v32  ;;  %v4136_v32 = vsel %vm4105_vm12, %v5969_v5, -inf  ;;  %4975 = vrcp.f32 %v3209_v17 }
 0x417   :  { %v3464_v2 = vpop.xlane.xlu1 %3463  ;;  %v3337_v6 = vpop.xlane.xlu0 %3336 }
 0x418   :  { %3555 = vst.msk [vmem:[%s7570_s5 + $0x10] sm:$0xff] %vm3552_vm15, %v3464_v2  ;;  %v3206_v2 = vadd.f32 1.0, %v4970_v22 }
 0x419   :  { %3426 = vst.msk [vmem:[%s7570_s5 + $0x18] sm:$0xff] %vm3422_vm14, %v3337_v6  ;;  %v4972_v6 = vpop.eup %4971 }
 0x41a   :  { %3747 = vmax.xlane.f32.xlu1 %v3746_v3  ;;  %3632 = vmax.xlane.f32.xlu0 %v3631_v43  ;;  %v4021_v3 = vsel %vm3975_vm11, %v5987_v36, -inf  ;;  %4977 = vrcp.f32 %v3206_v2  ;;  %v4974_v54 = vpop.eup %4973 }
 0x41b   :  { %v3476_v30 = vpop.xlane.xlu1 %3475  ;;  %v3349_v10 = vpop.xlane.xlu0 %3348 }
 0x41c   :  { %3559 = vst.msk [vmem:[%s7570_s5 + $0x30] sm:$0xff] %vm3552_vm15, %v3476_v30  ;;  %v4148_v30 = vsel %vm4105_vm12, %v5976_v61, -inf }
 0x41d   :  { %3430 = vst.msk [vmem:[%s7570_s5 + $0x38] sm:$0xff] %vm3422_vm14, %v3349_v10  ;;  %v3210_v10 = vadd.f32 1.0, %v4972_v6 }
 0x41e   :  { %3759 = vmax.xlane.f32.xlu1 %v3758_v49  ;;  %3750 = vmax.xlane.f32.xlu0 %v3749_v14  ;;  %v4139_v49 = vsel %vm4105_vm12, %v5981_v63, -inf }
 0x41f   :  { %v3594_v33 = vpop.xlane.xlu1 %3593  ;;  %v3467_v21 = vpop.xlane.xlu0 %3466  ;;  %4979 = vrcp.f32 %v3210_v10 }
 0x420   :  { %3685 = vst.msk [vmem:[%s7570_s5 + $0x10] sm:$0xff] %vm3682_vm0, %v3594_v33  ;;  %v4266_v33 = vsel %vm4235_vm13, %v5969_v5, -inf  ;;  %v6152_v5 = vmul.f32 %v4974_v54, %v6019_v29  ;;  %v4976_v40 = vpop.eup %4975  ;;  %v6270_v54 = vadd.f32 %v5776_v48, %v5539_v56 }
 0x421   :  { %3556 = vst.msk [vmem:[%s7570_s5 + $0x18] sm:$0xff] %vm3552_vm15, %v3467_v21  ;;  %v4151_v21 = vsel %vm4105_vm12, %v5987_v36, -inf }
 0x422   :  { %3877 = vmax.xlane.f32.xlu1 %v3876_v31  ;;  %3762 = vmax.xlane.f32.xlu0 %v3761_v58  ;;  %v3480_v16 = vsel %vm3455_vm7, %v6152_v5, -inf  ;;  %v4524_v48 = vmul.f32 -1.442695, %v6270_v54 }
 0x423   :  { %v3606_v51 = vpop.xlane.xlu1 %3605  ;;  %v3479_v47 = vpop.xlane.xlu0 %3478 }
 0x424   :  { %3689 = vst.msk [vmem:[%s7570_s5 + $0x30] sm:$0xff] %vm3682_vm0, %v3606_v51  ;;  %v4278_v51 = vsel %vm4235_vm13, %v5976_v61, -inf  ;;  %v6167_v61 = vmul.f32 %v4976_v40, %v6036_v45  ;;  %v6286_v40 = vadd.f32 %v5784_v52, %v5539_v56 }
 0x425   :  { %3560 = vst.msk [vmem:[%s7570_s5 + $0x38] sm:$0xff] %vm3552_vm15, %v3479_v47  ;;  %v4269_v47 = vsel %vm4235_vm13, %v5981_v63, -inf }
 0x426   :  { %3889 = vmax.xlane.f32.xlu1 %v3888_v50  ;;  %3880 = vmax.xlane.f32.xlu0 %v3879_v44  ;;  %v4978_v44 = vpop.eup %4977  ;;  %v3492_v22 = vsel %vm3455_vm7, %v6167_v61, -inf  ;;  %v4528_v52 = vmul.f32 -1.442695, %v6286_v40 }
 0x427   :  { %v3724_v12 = vpop.xlane.xlu1 %3723  ;;  %v3597_v15 = vpop.xlane.xlu0 %3596  ;;  %v6176_v63 = vmul.f32 %v4978_v44, %v6046_v38 }
 0x428   :  { %3815 = vst.msk [vmem:[%s7570_s5 + $0x10] sm:$0xff] %vm3812_vm1, %v3724_v12  ;;  %v3350_v12 = vsel %vm3325_vm6, %v6152_v5, -inf }
 0x429   :  { %3686 = vst.msk [vmem:[%s7570_s5 + $0x18] sm:$0xff] %vm3682_vm0, %v3597_v15  ;;  %v3353_v38 = vsel %vm3325_vm6, %v6176_v63, -inf }
 0x42a   :  { %4007 = vmax.xlane.f32.xlu1 %v4006_v18  ;;  %3892 = vmax.xlane.f32.xlu0 %v3891_v55  ;;  %v4980_v18 = vpop.eup %4979  ;;  %v3362_v55 = vsel %vm3325_vm6, %v6167_v61, -inf }
 0x42b   :  { %v3736_v35 = vpop.xlane.xlu1 %3735  ;;  %v3609_v19 = vpop.xlane.xlu0 %3608  ;;  %v6191_v36 = vmul.f32 %v4980_v18, %v6064_v39 }
 0x42c   :  { %3819 = vst.msk [vmem:[%s7570_s5 + $0x30] sm:$0xff] %vm3812_vm1, %v3736_v35 }
 0x42d   :  { %3690 = vst.msk [vmem:[%s7570_s5 + $0x38] sm:$0xff] %vm3682_vm0, %v3609_v19  ;;  %v3365_v39 = vsel %vm3325_vm6, %v6191_v36, -inf  ;;  %v3755_v44 = vsel %vm3715_vm9, %v6191_v36, -inf }
 0x42e   :  { %4019 = vmax.xlane.f32.xlu1 %v4018_v25  ;;  %4010 = vmax.xlane.f32.xlu0 %v4009_v26  ;;  %v3483_v26 = vsel %vm3455_vm7, %v6176_v63, -inf }
 0x42f   :  { %v3854_v27 = vpop.xlane.xlu1 %3853  ;;  %v3727_v28 = vpop.xlane.xlu0 %3726 }
 0x430   :  { %3945 = vst.msk [vmem:[%s7570_s5 + $0x10] sm:$0xff] %vm3942_vm2, %v3854_v27 }
 0x431   :  { %3816 = vst.msk [vmem:[%s7570_s5 + $0x18] sm:$0xff] %vm3812_vm1, %v3727_v28  ;;  %v3610_v28 = vsel %vm3585_vm8, %v6152_v5, -inf }
 0x432   :  { %4137 = vmax.xlane.f32.xlu1 %v4136_v32  ;;  %4022 = vmax.xlane.f32.xlu0 %v4021_v3  ;;  %v3495_v32 = vsel %vm3455_vm7, %v6191_v36, -inf  ;;  %v3622_v3 = vsel %vm3585_vm8, %v6167_v61, -inf }
 0x433   :  { %v3866_v34 = vpop.xlane.xlu1 %3865  ;;  %v3739_v43 = vpop.xlane.xlu0 %3738 }
 0x434   :  { %3949 = vst.msk [vmem:[%s7570_s5 + $0x30] sm:$0xff] %vm3942_vm2, %v3866_v34  ;;  %v6243_v34 = vadd.f32 %v5772_v1, %v5541_v57 }
 0x435   :  { %3820 = vst.msk [vmem:[%s7570_s5 + $0x38] sm:$0xff] %vm3812_vm1, %v3739_v43  ;;  %v3613_v43 = vsel %vm3585_vm8, %v6176_v63, -inf }
 0x436   :  { %4149 = vmax.xlane.f32.xlu1 %v4148_v30  ;;  %4140 = vmax.xlane.f32.xlu0 %v4139_v49  ;;  %v3740_v49 = vsel %vm3715_vm9, %v6152_v5, -inf  ;;  %v4523_v1 = vmul.f32 -1.442695, %v6243_v34 }
 0x437   :  { %v3984_v37 = vpop.xlane.xlu1 %3983  ;;  %v3857_v14 = vpop.xlane.xlu0 %3856 }
 0x438   :  { %4075 = vst.msk [vmem:[%s7570_s5 + $0x10] sm:$0xff] %vm4072_vm3, %v3984_v37  ;;  %v6260_v37 = vadd.f32 %v5780_v62, %v5541_v57  ;;  %v3752_v62 = vsel %vm3715_vm9, %v6167_v61, -inf  ;;  %4981 = vpow2.f32 %v4523_v1  ;;  %v4133_v1 = vsel %vm4105_vm12, %v6176_v63, -inf }
 0x439   :  { %3946 = vst.msk [vmem:[%s7570_s5 + $0x18] sm:$0xff] %vm3942_vm2, %v3857_v14  ;;  %v3625_v14 = vsel %vm3585_vm8, %v6191_v36, -inf }
 0x43a   :  { %4267 = vmax.xlane.f32.xlu1 %v4266_v33  ;;  %4152 = vmax.xlane.f32.xlu0 %v4151_v21 }
 0x43b   :  { %v3996_v31 = vpop.xlane.xlu1 %3995  ;;  %v3869_v58 = vpop.xlane.xlu0 %3868 }
 0x43c   :  { %4079 = vst.msk [vmem:[%s7570_s5 + $0x30] sm:$0xff] %vm4072_vm3, %v3996_v31  ;;  %v4527_v31 = vmul.f32 -1.442695, %v6260_v37 }
 0x43d   :  { %3950 = vst.msk [vmem:[%s7570_s5 + $0x38] sm:$0xff] %vm3942_vm2, %v3869_v58  ;;  %v3743_v58 = vsel %vm3715_vm9, %v6176_v63, -inf }
 0x43e   :  { %4279 = vmax.xlane.f32.xlu1 %v4278_v51  ;;  %4270 = vmax.xlane.f32.xlu0 %v4269_v47  ;;  %4983 = vpow2.f32 %v4527_v31 }
 0x43f   :  { %v4114_v50 = vpop.xlane.xlu1 %4113  ;;  %v3987_v29 = vpop.xlane.xlu0 %3986  ;;  %4985 = vpow2.f32 %v4524_v48 }
 0x440   :  { %4205 = vst.msk [vmem:[%s7570_s5 + $0x10] sm:$0xff] %vm4202_vm4, %v4114_v50  ;;  %v3870_v50 = vsel %vm3845_vm10, %v6152_v5, -inf  ;;  %4987 = vpow2.f32 %v4528_v52 }
 0x441   :  { %4076 = vst.msk [vmem:[%s7570_s5 + $0x18] sm:$0xff] %vm4072_vm3, %v3987_v29 }
 0x442   :  { %3351 = vmax.xlane.f32.xlu1 %v3350_v12  ;;  %4282 = vmax.xlane.f32.xlu0 %v4281_v8  ;;  %v3882_v8 = vsel %vm3845_vm10, %v6167_v61, -inf }
 0x443   :  { %v4126_v15 = vpop.xlane.xlu1 %4125  ;;  %v3999_v45 = vpop.xlane.xlu0 %3998 }
 0x444   :  { %4209 = vst.msk [vmem:[%s7570_s5 + $0x30] sm:$0xff] %vm4202_vm4, %v4126_v15  ;;  %v3873_v15 = vsel %vm3845_vm10, %v6176_v63, -inf }
 0x445   :  { %4080 = vst.msk [vmem:[%s7570_s5 + $0x38] sm:$0xff] %vm4072_vm3, %v3999_v45  ;;  %v4982_v45 = vpop.eup %4981 }
 0x446   :  { %3363 = vmax.xlane.f32.xlu1 %v3362_v55  ;;  %3354 = vmax.xlane.f32.xlu0 %v3353_v38  ;;  %v4000_v38 = vsel %vm3975_vm11, %v6152_v5, -inf }
 0x447   :  { %v4244_v35 = vpop.xlane.xlu1 %4243  ;;  %v4117_v11 = vpop.xlane.xlu0 %4116 }
 0x448   :  { %4335 = vst.msk [vmem:[%s7570_s5 + $0x10] sm:$0xff] %vm4332_vm5, %v4244_v35  ;;  %v3885_v35 = vsel %vm3845_vm10, %v6191_v36, -inf }
 0x449   :  { %4206 = vst.msk [vmem:[%s7570_s5 + $0x18] sm:$0xff] %vm4202_vm4, %v4117_v11 }
 0x44a   :  { %3481 = vmax.xlane.f32.xlu1 %v3480_v16  ;;  %3366 = vmax.xlane.f32.xlu0 %v3365_v39  ;;  %v3215_v16 = vadd.f32 1.0, %v4982_v45  ;;  %v4984_v39 = vpop.eup %4983 }
 0x44b   :  { %v4256_v19 = vpop.xlane.xlu1 %4255  ;;  %v4129_v25 = vpop.xlane.xlu0 %4128 }
 0x44c   :  { %4339 = vst.msk [vmem:[%s7570_s5 + $0x30] sm:$0xff] %vm4332_vm5, %v4256_v19  ;;  %4989 = vrcp.f32 %v3215_v16 }
 0x44d   :  { %4210 = vst.msk [vmem:[%s7570_s5 + $0x38] sm:$0xff] %vm4202_vm4, %v4129_v25  ;;  %v4012_v25 = vsel %vm3975_vm11, %v6167_v61, -inf }
 0x44e   :  { %3493 = vmax.xlane.f32.xlu1 %v3492_v22  ;;  %3484 = vmax.xlane.f32.xlu0 %v3483_v26  ;;  %v4986_v22 = vpop.eup %4985  ;;  %v4003_v26 = vsel %vm3975_vm11, %v6176_v63, -inf }
 0x44f   :  { %v3340_v27 = vpop.xlane.xlu1 %3339  ;;  %v4247_v17 = vpop.xlane.xlu0 %4246 }
 0x450   :  { %3427 = vst.msk [vmem:[%s7570_s5 + $0x20] sm:$0xff] %vm3422_vm14, %v3340_v27 }
 0x451   :  { %4336 = vst.msk [vmem:[%s7570_s5 + $0x18] sm:$0xff] %vm4332_vm5, %v4247_v17  ;;  %v3219_v17 = vadd.f32 1.0, %v4984_v39 }
 0x452   :  { %3611 = vmax.xlane.f32.xlu1 %v3610_v28  ;;  %3496 = vmax.xlane.f32.xlu0 %v3495_v32  ;;  %v4130_v32 = vsel %vm4105_vm12, %v6152_v5, -inf }
 0x453   :  { %v3458_v2 = vpop.xlane.xlu1 %3457  ;;  %v4259_v6 = vpop.xlane.xlu0 %4258  ;;  %4991 = vrcp.f32 %v3219_v17 }
 0x454   :  { %3553 = vst.msk [vmem:[%s7570_s5] sm:$0xff] %vm3552_vm15, %v3458_v2  ;;  %v3216_v2 = vadd.f32 1.0, %v4986_v22 }
 0x455   :  { %4340 = vst.msk [vmem:[%s7570_s5 + $0x38] sm:$0xff] %vm4332_vm5, %v4259_v6  ;;  %v4988_v6 = vpop.eup %4987 }
 0x456   :  { %3623 = vmax.xlane.f32.xlu1 %v3622_v3  ;;  %3614 = vmax.xlane.f32.xlu0 %v3613_v43  ;;  %v4015_v3 = vsel %vm3975_vm11, %v6191_v36, -inf  ;;  %4993 = vrcp.f32 %v3216_v2  ;;  %v4990_v31 = vpop.eup %4989 }
 0x457   :  { %v3470_v30 = vpop.xlane.xlu1 %3469  ;;  %v3343_v10 = vpop.xlane.xlu0 %3342 }
 0x458   :  { %3557 = vst.msk [vmem:[%s7570_s5 + $0x20] sm:$0xff] %vm3552_vm15, %v3470_v30 }
 0x459   :  { %3428 = vst.msk [vmem:[%s7570_s5 + $0x28] sm:$0xff] %vm3422_vm14, %v3343_v10  ;;  %v4142_v10 = vsel %vm4105_vm12, %v6167_v61, -inf }
 0x45a   :  { %3741 = vmax.xlane.f32.xlu1 %v3740_v49  ;;  %3626 = vmax.xlane.f32.xlu0 %v3625_v14  ;;  %v3220_v49 = vadd.f32 1.0, %v4988_v6 }
 0x45b   :  { %v3588_v33 = vpop.xlane.xlu1 %3587  ;;  %v6272_v21 = vpop.xlane.xlu0 %3460 }
 0x45c   :  { %3683 = vst.msk [vmem:[%s7570_s5] sm:$0xff] %vm3682_vm0, %v3588_v33  ;;  %4995 = vrcp.f32 %v3220_v49 }
 0x45e   :  { %3753 = vmax.xlane.f32.xlu1 %v3752_v62  ;;  %3744 = vmax.xlane.f32.xlu0 %v3743_v58  ;;  %v4260_v62 = vsel %vm4235_vm13, %v6152_v5, -inf  ;;  %v4145_v58 = vsel %vm4105_vm12, %v6191_v36, -inf  ;;  %v6368_v5 = vmul.f32 %v4990_v31, %v6243_v34 }
 0x45f   :  { %v3600_v51 = vpop.xlane.xlu1 %3599  ;;  %v3473_v47 = vpop.xlane.xlu0 %3472 }
 0x460   :  { %3687 = vst.msk [vmem:[%s7570_s5 + $0x20] sm:$0xff] %vm3682_vm0, %v3600_v51 }
 0x461   :  { %3558 = vst.msk [vmem:[%s7570_s5 + $0x28] sm:$0xff] %vm3552_vm15, %v3473_v47  ;;  %v4272_v47 = vsel %vm4235_vm13, %v6167_v61, -inf  ;;  %v3380_v61 = vsel %vm3325_vm6, %v6368_v5, -inf }
 0x462   :  { %3871 = vmax.xlane.f32.xlu1 %v3870_v50  ;;  %3756 = vmax.xlane.f32.xlu0 %v3755_v44  ;;  %v4992_v50 = vpop.eup %4991  ;;  %v4263_v44 = vsel %vm4235_vm13, %v6176_v63, -inf }
 0x463   :  { %v3718_v29 = vpop.xlane.xlu1 %3717  ;;  %v6301_v12 = vpop.xlane.xlu0 %3590  ;;  %v6379_v34 = vmul.f32 %v4992_v50, %v6260_v37 }
 0x464   :  { %3813 = vst.msk [vmem:[%s7570_s5] sm:$0xff] %vm3812_vm1, %v3718_v29  ;;  %v4994_v52 = vpop.eup %4993 }
 0x465   :  { %v6388_v63 = vmul.f32 %v4994_v52, %v6270_v54 }
 0x466   :  { %3883 = vmax.xlane.f32.xlu1 %v3882_v8  ;;  %3874 = vmax.xlane.f32.xlu0 %v3873_v15  ;;  %v4275_v15 = vsel %vm4235_vm13, %v6191_v36, -inf  ;;  %v4996_v45 = vpop.eup %4995 }
 0x467   :  { %v3730_v18 = vpop.xlane.xlu1 %3729  ;;  %v3603_v55 = vpop.xlane.xlu0 %3602  ;;  %v3383_v54 = vsel %vm3325_vm6, %v6388_v63, -inf  ;;  %v3643_v2 = vsel %vm3585_vm8, %v6388_v63, -inf  ;;  %v3903_v52 = vsel %vm3845_vm10, %v6388_v63, -inf }
 0x468   :  { %3817 = vst.msk [vmem:[%s7570_s5 + $0x20] sm:$0xff] %vm3812_vm1, %v3730_v18 }
 0x469   :  { %3688 = vst.msk [vmem:[%s7570_s5 + $0x28] sm:$0xff] %vm3682_vm0, %v3603_v55  ;;  %v3392_v55 = vsel %vm3325_vm6, %v6379_v34, -inf }
 0x46a   :  { %4001 = vmax.xlane.f32.xlu1 %v4000_v38  ;;  %3886 = vmax.xlane.f32.xlu0 %v3885_v35  ;;  %v6399_v38 = vmul.f32 %v4996_v45, %v6286_v40 }
 0x46b   :  { %v3848_v11 = vpop.xlane.xlu1 %3847  ;;  %v6323_v19 = vpop.xlane.xlu0 %3720 }
 0x46c   :  { %3943 = vst.msk [vmem:[%s7570_s5] sm:$0xff] %vm3942_vm2, %v3848_v11  ;;  %v3510_v11 = vsel %vm3455_vm7, %v6368_v5, -inf  ;;  %v3395_v40 = vsel %vm3325_vm6, %v6399_v38, -inf  ;;  %v3915_v45 = vsel %vm3845_vm10, %v6399_v38, -inf }
 0x46e   :  { %4013 = vmax.xlane.f32.xlu1 %v4012_v25  ;;  %4004 = vmax.xlane.f32.xlu0 %v4003_v26  ;;  %v3522_v25 = vsel %vm3455_vm7, %v6379_v34, -inf  ;;  %v3525_v26 = vsel %vm3455_vm7, %v6399_v38, -inf }
 0x46f   :  { %v3860_v27 = vpop.xlane.xlu1 %3859  ;;  %v3733_v28 = vpop.xlane.xlu0 %3732 }
 0x470   :  { %3947 = vst.msk [vmem:[%s7570_s5 + $0x20] sm:$0xff] %vm3942_vm2, %v3860_v27 }
 0x471   :  { %3818 = vst.msk [vmem:[%s7570_s5 + $0x28] sm:$0xff] %vm3812_vm1, %v3733_v28  ;;  %v3652_v28 = vsel %vm3585_vm8, %v6379_v34, -inf }
 0x472   :  { %4131 = vmax.xlane.f32.xlu1 %v4130_v32  ;;  %4016 = vmax.xlane.f32.xlu0 %v4015_v3  ;;  %v6479_v32 = vadd.f32 %v5537_v23, %v5774_v42 }
 0x473   :  { %v3978_v43 = vpop.xlane.xlu1 %3977  ;;  %v6345_v30 = vpop.xlane.xlu0 %3850 }
 0x474   :  { %4073 = vst.msk [vmem:[%s7570_s5] sm:$0xff] %vm4072_vm3, %v3978_v43  ;;  %v3770_v43 = vsel %vm3715_vm9, %v6368_v5, -inf  ;;  %v4521_v42 = vmul.f32 -1.442695, %v6479_v32 }
 0x476   :  { %4143 = vmax.xlane.f32.xlu1 %v4142_v10  ;;  %4134 = vmax.xlane.f32.xlu0 %v4133_v1  ;;  %v3655_v10 = vsel %vm3585_vm8, %v6399_v38, -inf  ;;  %v6506_v1 = vadd.f32 %v5535_v53, %v5778_v13  ;;  %4997 = vpow2.f32 %v4521_v42 }
 0x477   :  { %v3990_v14 = vpop.xlane.xlu1 %3989  ;;  %v3863_v33 = vpop.xlane.xlu0 %3862 }
 0x478   :  { %4077 = vst.msk [vmem:[%s7570_s5 + $0x20] sm:$0xff] %vm4072_vm3, %v3990_v14  ;;  %v4522_v13 = vmul.f32 -1.442695, %v6506_v1 }
 0x479   :  { %3948 = vst.msk [vmem:[%s7570_s5 + $0x28] sm:$0xff] %vm3942_vm2, %v3863_v33  ;;  %v3782_v33 = vsel %vm3715_vm9, %v6379_v34, -inf }
 0x47a   :  { %4261 = vmax.xlane.f32.xlu1 %v4260_v62  ;;  %4146 = vmax.xlane.f32.xlu0 %v4145_v58  ;;  %v3773_v62 = vsel %vm3715_vm9, %v6388_v63, -inf  ;;  %v6524_v58 = vadd.f32 %v5535_v53, %v5786_v20 }
 0x47b   :  { %v4108_v51 = vpop.xlane.xlu1 %4107  ;;  %v3981_v48 = vpop.xlane.xlu0 %3980 }
 0x47c   :  { %4203 = vst.msk [vmem:[%s7570_s5] sm:$0xff] %vm4202_vm4, %v4108_v51  ;;  %v4526_v20 = vmul.f32 -1.442695, %v6524_v58 }
 0x47e   :  { %4273 = vmax.xlane.f32.xlu1 %v4272_v47  ;;  %4264 = vmax.xlane.f32.xlu0 %v4263_v44  ;;  %v3785_v47 = vsel %vm3715_vm9, %v6399_v38, -inf }
 0x47f   :  { %v4120_v29 = vpop.xlane.xlu1 %4119  ;;  %v3993_v8 = vpop.xlane.xlu0 %3992 }
 0x480   :  { %4207 = vst.msk [vmem:[%s7570_s5 + $0x20] sm:$0xff] %vm4202_vm4, %v4120_v29  ;;  %v3912_v29 = vsel %vm3845_vm10, %v6379_v34, -inf }
 0x481   :  { %4078 = vst.msk [vmem:[%s7570_s5 + $0x28] sm:$0xff] %vm4072_vm3, %v3993_v8 }
 0x482   :  { %3381 = vmax.xlane.f32.xlu1 %v3380_v61  ;;  %4276 = vmax.xlane.f32.xlu0 %v4275_v15  ;;  %v4998_v61 = vpop.eup %4997 }
 0x483   :  { %v4238_v18 = vpop.xlane.xlu1 %4237  ;;  %v4111_v37 = vpop.xlane.xlu0 %4110 }
 0x484   :  { %4333 = vst.msk [vmem:[%s7570_s5] sm:$0xff] %vm4332_vm5, %v4238_v18  ;;  %v4030_v18 = vsel %vm3975_vm11, %v6368_v5, -inf }
 0x486   :  { %3393 = vmax.xlane.f32.xlu1 %v3392_v55  ;;  %3384 = vmax.xlane.f32.xlu0 %v3383_v54  ;;  %v3213_v55 = vadd.f32 1.0, %v4998_v61 }
 0x487   :  { %v4250_v36 = vpop.xlane.xlu1 %4249  ;;  %v4123_v35 = vpop.xlane.xlu0 %4122 }
 0x488   :  { %4337 = vst.msk [vmem:[%s7570_s5 + $0x20] sm:$0xff] %vm4332_vm5, %v4250_v36 }
 0x489   :  { %4208 = vst.msk [vmem:[%s7570_s5 + $0x28] sm:$0xff] %vm4202_vm4, %v4123_v35  ;;  %v4042_v35 = vsel %vm3975_vm11, %v6379_v34, -inf }
 0x48a   :  { %3511 = vmax.xlane.f32.xlu1 %v3510_v11  ;;  %3396 = vmax.xlane.f32.xlu0 %v3395_v40  ;;  %v4033_v40 = vsel %vm3975_vm11, %v6388_v63, -inf }
 0x48b   :  { %v3331_v16 = vpop.xlane.xlu1 %3330  ;;  %v4241_v39 = vpop.xlane.xlu0 %4240 }
 0x48c   :  { %3424 = vst.msk [vmem:[%s7570_s5 + $0x8] sm:$0xff] %vm3422_vm14, %v3331_v16 }
 0x48d   :  { %3554 = vst.msk [vmem:[%s7570_s5 + $0x8] sm:$0xff] %vm3552_vm15, %v6272_v21  ;;  %v3513_v21 = vsel %vm3455_vm7, %v6388_v63, -inf }
 0x48e   :  { %3684 = vst.msk [vmem:[%s7570_s5 + $0x8] sm:$0xff] %vm3682_vm0, %v6301_v12  ;;  %3523 = vmax.xlane.f32.xlu1 %v3522_v25  ;;  %3514 = vmax.xlane.f32.xlu0 %v3513_v21  ;;  %v4160_v21 = vsel %vm4105_vm12, %v6368_v5, -inf }
 0x48f   :  { %3814 = vst.msk [vmem:[%s7570_s5 + $0x8] sm:$0xff] %vm3812_vm1, %v6323_v19  ;;  %v3358_v22 = vpop.xlane.xlu1 %3357  ;;  %v4253_v12 = vpop.xlane.xlu0 %4252  ;;  %v3640_v19 = vsel %vm3585_vm8, %v6368_v5, -inf }
 0x490   :  { %3944 = vst.msk [vmem:[%s7570_s5 + $0x8] sm:$0xff] %vm3942_vm2, %v6345_v30  ;;  %v6496_v30 = vadd.f32 %v5537_v23, %v5782_v46 }
 0x491   :  { %3433 = vst.msk [vmem:[%s7570_s5 + $0x50] sm:$0xff] %vm3422_vm14, %v3358_v22 }
 0x492   :  { %4074 = vst.msk [vmem:[%s7570_s5 + $0x8] sm:$0xff] %vm4072_vm3, %v3981_v48  ;;  %3641 = vmax.xlane.f32.xlu1 %v3640_v19  ;;  %3526 = vmax.xlane.f32.xlu0 %v3525_v26  ;;  %v4525_v46 = vmul.f32 -1.442695, %v6496_v30  ;;  %v3900_v48 = vsel %vm3845_vm10, %v6368_v5, -inf  ;;  %v4045_v19 = vsel %vm3975_vm11, %v6399_v38, -inf }
 0x493   :  { %4204 = vst.msk [vmem:[%s7570_s5 + $0x8] sm:$0xff] %vm4202_vm4, %v4111_v37  ;;  %v3370_v27 = vpop.xlane.xlu1 %3369  ;;  %v3361_v17 = vpop.xlane.xlu0 %3360 }
 0x494   :  { %4338 = vst.msk [vmem:[%s7570_s5 + $0x28] sm:$0xff] %vm4332_vm5, %v4253_v12  ;;  %4334 = vst.msk [vmem:[%s7570_s5 + $0x8] sm:$0xff] %vm4332_vm5, %v4241_v39  ;;  %4999 = vpow2.f32 %v4525_v46 }
 0x495   :  { %3437 = vst.msk [vmem:[%s7570_s5 + $0x70] sm:$0xff] %vm3422_vm14, %v3370_v27  ;;  %3434 = vst.msk [vmem:[%s7570_s5 + $0x58] sm:$0xff] %vm3422_vm14, %v3361_v17  ;;  %5001 = vpow2.f32 %v4522_v13  ;;  %v4172_v17 = vsel %vm4105_vm12, %v6379_v34, -inf }
 0x496   :  { %3653 = vmax.xlane.f32.xlu1 %v3652_v28  ;;  %3644 = vmax.xlane.f32.xlu0 %v3643_v2  ;;  %5003 = vpow2.f32 %v4526_v20  ;;  %v4163_v2 = vsel %vm4105_vm12, %v6388_v63, -inf }
 0x497   :  { %v3488_v6 = vpop.xlane.xlu1 %3487  ;;  %v3373_v3 = vpop.xlane.xlu0 %3372  ;;  %5005 = vrcp.f32 %v3213_v55 }
 0x498   :  { %3563 = vst.msk [vmem:[%s7570_s5 + $0x50] sm:$0xff] %vm3552_vm15, %v3488_v6 }
 0x499   :  { %3438 = vst.msk [vmem:[%s7570_s5 + $0x78] sm:$0xff] %vm3422_vm14, %v3373_v3 }
 0x49a   :  { %3771 = vmax.xlane.f32.xlu1 %v3770_v43  ;;  %3656 = vmax.xlane.f32.xlu0 %v3655_v10  ;;  %v4290_v43 = vsel %vm4235_vm13, %v6368_v5, -inf  ;;  %v4175_v10 = vsel %vm4105_vm12, %v6399_v38, -inf }
 0x49b   :  { %v3500_v49 = vpop.xlane.xlu1 %3499  ;;  %v3491_v14 = vpop.xlane.xlu0 %3490 }
 0x49c   :  { %3567 = vst.msk [vmem:[%s7570_s5 + $0x70] sm:$0xff] %vm3552_vm15, %v3500_v49  ;;  %3564 = vst.msk [vmem:[%s7570_s5 + $0x58] sm:$0xff] %vm3552_vm15, %v3491_v14 }
 0x49e   :  { %3783 = vmax.xlane.f32.xlu1 %v3782_v33  ;;  %3774 = vmax.xlane.f32.xlu0 %v3773_v62  ;;  %v5000_v54 = vpop.eup %4999  ;;  %v4302_v33 = vsel %vm4235_vm13, %v6379_v34, -inf  ;;  %v4293_v62 = vsel %vm4235_vm13, %v6388_v63, -inf }
 0x49f   :  { %v3618_v31 = vpop.xlane.xlu1 %3617  ;;  %v3503_v51 = vpop.xlane.xlu0 %3502  ;;  %v3217_v39 = vadd.f32 1.0, %v5000_v54 }
 0x4a0   :  { %3693 = vst.msk [vmem:[%s7570_s5 + $0x50] sm:$0xff] %vm3682_vm0, %v3618_v31  ;;  %v5002_v11 = vpop.eup %5001 }
 0x4a1   :  { %3568 = vst.msk [vmem:[%s7570_s5 + $0x78] sm:$0xff] %vm3552_vm15, %v3503_v51  ;;  %v3214_v22 = vadd.f32 1.0, %v5002_v11  ;;  %v5004_v12 = vpop.eup %5003  ;;  %5007 = vrcp.f32 %v3217_v39 }
 0x4a2   :  { %3901 = vmax.xlane.f32.xlu1 %v3900_v48  ;;  %3786 = vmax.xlane.f32.xlu0 %v3785_v47  ;;  %v3218_v28 = vadd.f32 1.0, %v5004_v12  ;;  %v5006_v42 = vpop.eup %5005  ;;  %v4305_v48 = vsel %vm4235_vm13, %v6399_v38, -inf }
 0x4a3   :  { %v3630_v50 = vpop.xlane.xlu1 %3629  ;;  %v3621_v44 = vpop.xlane.xlu0 %3620  ;;  %5009 = vrcp.f32 %v3214_v22  ;;  %v6612_v5 = vmul.f32 %v5006_v42, %v6479_v32  ;;  %v6720_v22 = vadd.f32 %v5796_v0, %v5541_v57 }
 0x4a4   :  { %3697 = vst.msk [vmem:[%s7570_s5 + $0x70] sm:$0xff] %vm3682_vm0, %v3630_v50  ;;  %3694 = vst.msk [vmem:[%s7570_s5 + $0x58] sm:$0xff] %vm3682_vm0, %v3621_v44  ;;  %5011 = vrcp.f32 %v3218_v28 }
 0x4a5   :  { %v3374_v51 = vsel %vm3325_vm6, %v6612_v5, -inf  ;;  %v3634_v55 = vsel %vm3585_vm8, %v6612_v5, -inf }
 0x4a6   :  { %3913 = vmax.xlane.f32.xlu1 %v3912_v29  ;;  %3904 = vmax.xlane.f32.xlu0 %v3903_v52  ;;  %v3504_v52 = vsel %vm3455_vm7, %v6612_v5, -inf }
 0x4a7   :  { %v3748_v8 = vpop.xlane.xlu1 %3747  ;;  %v3633_v15 = vpop.xlane.xlu0 %3632 }
 0x4a8   :  { %3823 = vst.msk [vmem:[%s7570_s5 + $0x50] sm:$0xff] %vm3812_vm1, %v3748_v8 }
 0x4a9   :  { %3698 = vst.msk [vmem:[%s7570_s5 + $0x78] sm:$0xff] %vm3682_vm0, %v3633_v15 }
 0x4aa   :  { %4031 = vmax.xlane.f32.xlu1 %v4030_v18  ;;  %3916 = vmax.xlane.f32.xlu0 %v3915_v45 }
 0x4ab   :  { %v3760_v37 = vpop.xlane.xlu1 %3759  ;;  %v3751_v36 = vpop.xlane.xlu0 %3750 }
 0x4ac   :  { %3827 = vst.msk [vmem:[%s7570_s5 + $0x70] sm:$0xff] %vm3812_vm1, %v3760_v37  ;;  %3824 = vst.msk [vmem:[%s7570_s5 + $0x58] sm:$0xff] %vm3812_vm1, %v3751_v36  ;;  %v5008_v46 = vpop.eup %5007 }
 0x4ad   :  { %v5010_v13 = vpop.eup %5009  ;;  %v6627_v34 = vmul.f32 %v5008_v46, %v6496_v30 }
 0x4ae   :  { %4043 = vmax.xlane.f32.xlu1 %v4042_v35  ;;  %4034 = vmax.xlane.f32.xlu0 %v4033_v40  ;;  %v6636_v63 = vmul.f32 %v5010_v13, %v6506_v1  ;;  %v5012_v50 = vpop.eup %5011  ;;  %v6703_v40 = vadd.f32 %v5788_v59, %v5541_v57  ;;  %v4535_v57 = vmul.f32 -1.442695, %v6720_v22 }
 0x4af   :  { %v3878_v16 = vpop.xlane.xlu1 %3877  ;;  %v3763_v25 = vpop.xlane.xlu0 %3762  ;;  %v3386_v20 = vsel %vm3325_vm6, %v6627_v34, -inf  ;;  %v6651_v38 = vmul.f32 %v5012_v50, %v6524_v58  ;;  %v3516_v15 = vsel %vm3455_vm7, %v6627_v34, -inf  ;;  %v3646_v11 = vsel %vm3585_vm8, %v6627_v34, -inf }
 0x4b0   :  { %3953 = vst.msk [vmem:[%s7570_s5 + $0x50] sm:$0xff] %vm3942_vm2, %v3878_v16  ;;  %v3377_v1 = vsel %vm3325_vm6, %v6636_v63, -inf  ;;  %v3507_v18 = vsel %vm3455_vm7, %v6636_v63, -inf  ;;  %v3637_v16 = vsel %vm3585_vm8, %v6636_v63, -inf  ;;  %v4531_v59 = vmul.f32 -1.442695, %v6703_v40 }
 0x4b1   :  { %3828 = vst.msk [vmem:[%s7570_s5 + $0x78] sm:$0xff] %vm3812_vm1, %v3763_v25  ;;  %v3389_v58 = vsel %vm3325_vm6, %v6651_v38, -inf  ;;  %v3519_v54 = vsel %vm3455_vm7, %v6651_v38, -inf  ;;  %v3649_v12 = vsel %vm3585_vm8, %v6651_v38, -inf  ;;  %v3767_v0 = vsel %vm3715_vm9, %v6636_v63, -inf }
 0x4b2   :  { %4161 = vmax.xlane.f32.xlu1 %v4160_v21  ;;  %4046 = vmax.xlane.f32.xlu0 %v4045_v19  ;;  %v3764_v21 = vsel %vm3715_vm9, %v6612_v5, -inf  ;;  %5013 = vpow2.f32 %v4531_v59  ;;  %v4287_v59 = vsel %vm4235_vm13, %v6636_v63, -inf }
 0x4b3   :  { %v3890_v26 = vpop.xlane.xlu1 %3889  ;;  %v3881_v27 = vpop.xlane.xlu0 %3880  ;;  %5015 = vpow2.f32 %v4535_v57 }
 0x4b4   :  { %3957 = vst.msk [vmem:[%s7570_s5 + $0x70] sm:$0xff] %vm3942_vm2, %v3890_v26  ;;  %3954 = vst.msk [vmem:[%s7570_s5 + $0x58] sm:$0xff] %vm3942_vm2, %v3881_v27  ;;  %v6730_v26 = vadd.f32 %v5792_v7, %v5539_v56 }
 0x4b6   :  { %4173 = vmax.xlane.f32.xlu1 %v4172_v17  ;;  %4164 = vmax.xlane.f32.xlu0 %v4163_v2  ;;  %v3776_v17 = vsel %vm3715_vm9, %v6627_v34, -inf  ;;  %v4532_v7 = vmul.f32 -1.442695, %v6730_v26  ;;  %v6748_v2 = vadd.f32 %v5802_v9, %v5539_v56 }
 0x4b7   :  { %v4008_v6 = vpop.xlane.xlu1 %4007  ;;  %v3893_v3 = vpop.xlane.xlu0 %3892 }
 0x4b8   :  { %4083 = vst.msk [vmem:[%s7570_s5 + $0x50] sm:$0xff] %vm4072_vm3, %v4008_v6  ;;  %5017 = vpow2.f32 %v4532_v7  ;;  %v4536_v56 = vmul.f32 -1.442695, %v6748_v2 }
 0x4b9   :  { %3958 = vst.msk [vmem:[%s7570_s5 + $0x78] sm:$0xff] %vm3942_vm2, %v3893_v3  ;;  %v3894_v3 = vsel %vm3845_vm10, %v6612_v5, -inf }
 0x4ba   :  { %4291 = vmax.xlane.f32.xlu1 %v4290_v43  ;;  %4176 = vmax.xlane.f32.xlu0 %v4175_v10  ;;  %v3779_v43 = vsel %vm3715_vm9, %v6651_v38, -inf  ;;  %v3906_v10 = vsel %vm3845_vm10, %v6627_v34, -inf  ;;  %5019 = vpow2.f32 %v4536_v56 }
 0x4bb   :  { %v4020_v49 = vpop.xlane.xlu1 %4019  ;;  %v4011_v14 = vpop.xlane.xlu0 %4010 }
 0x4bc   :  { %4087 = vst.msk [vmem:[%s7570_s5 + $0x70] sm:$0xff] %vm4072_vm3, %v4020_v49  ;;  %4084 = vst.msk [vmem:[%s7570_s5 + $0x58] sm:$0xff] %vm4072_vm3, %v4011_v14  ;;  %v3897_v49 = vsel %vm3845_vm10, %v6636_v63, -inf }
 0x4be   :  { %4303 = vmax.xlane.f32.xlu1 %v4302_v33  ;;  %4294 = vmax.xlane.f32.xlu0 %v4293_v62  ;;  %v5014_v33 = vpop.eup %5013  ;;  %v4024_v62 = vsel %vm3975_vm11, %v6612_v5, -inf }
 0x4bf   :  { %v4138_v31 = vpop.xlane.xlu1 %4137  ;;  %v4023_v32 = vpop.xlane.xlu0 %4022 }
 0x4c0   :  { %4213 = vst.msk [vmem:[%s7570_s5 + $0x50] sm:$0xff] %vm4202_vm4, %v4138_v31  ;;  %v3909_v31 = vsel %vm3845_vm10, %v6651_v38, -inf }
 0x4c1   :  { %4088 = vst.msk [vmem:[%s7570_s5 + $0x78] sm:$0xff] %vm4072_vm3, %v4023_v32  ;;  %v3223_v32 = vadd.f32 1.0, %v5014_v33  ;;  %v6915_v33 = vadd.f32 %v5537_v23, %v5790_v60 }
 0x4c2   :  { %3375 = vmax.xlane.f32.xlu1 %v3374_v51  ;;  %4306 = vmax.xlane.f32.xlu0 %v4305_v48  ;;  %v5016_v51 = vpop.eup %5015 }
 0x4c3   :  { %v4150_v47 = vpop.xlane.xlu1 %4149  ;;  %v4141_v30 = vpop.xlane.xlu0 %4140  ;;  %5021 = vrcp.f32 %v3223_v32  ;;  %v4529_v60 = vmul.f32 -1.442695, %v6915_v33  ;;  %v6932_v32 = vadd.f32 %v5537_v23, %v5800_v4 }
 0x4c4   :  { %4217 = vst.msk [vmem:[%s7570_s5 + $0x70] sm:$0xff] %vm4202_vm4, %v4150_v47  ;;  %4214 = vst.msk [vmem:[%s7570_s5 + $0x58] sm:$0xff] %vm4202_vm4, %v4141_v30  ;;  %v4036_v47 = vsel %vm3975_vm11, %v6627_v34, -inf  ;;  %v5018_v50 = vpop.eup %5017  ;;  %v4027_v30 = vsel %vm3975_vm11, %v6636_v63, -inf }
 0x4c5   :  { %v4533_v23 = vmul.f32 -1.442695, %v6932_v32 }
 0x4c6   :  { %3387 = vmax.xlane.f32.xlu1 %v3386_v20  ;;  %3378 = vmax.xlane.f32.xlu0 %v3377_v1  ;;  %v3227_v1 = vadd.f32 1.0, %v5016_v51 }
 0x4c7   :  { %v4268_v44 = vpop.xlane.xlu1 %4267  ;;  %v4153_v29 = vpop.xlane.xlu0 %4152 }
 0x4c8   :  { %4343 = vst.msk [vmem:[%s7570_s5 + $0x50] sm:$0xff] %vm4332_vm5, %v4268_v44  ;;  %5023 = vrcp.f32 %v3227_v1  ;;  %v6960_v1 = vadd.f32 %v5535_v53, %v5804_v41 }
 0x4c9   :  { %4218 = vst.msk [vmem:[%s7570_s5 + $0x78] sm:$0xff] %vm4202_vm4, %v4153_v29  ;;  %v4154_v29 = vsel %vm4105_vm12, %v6612_v5, -inf }
 0x4ca   :  { %3505 = vmax.xlane.f32.xlu1 %v3504_v52  ;;  %3390 = vmax.xlane.f32.xlu0 %v3389_v58  ;;  %v3224_v52 = vadd.f32 1.0, %v5018_v50  ;;  %v5020_v58 = vpop.eup %5019 }
 0x4cb   :  { %v4280_v8 = vpop.xlane.xlu1 %4279  ;;  %v4271_v61 = vpop.xlane.xlu0 %4270 }
 0x4cc   :  { %4347 = vst.msk [vmem:[%s7570_s5 + $0x70] sm:$0xff] %vm4332_vm5, %v4280_v8  ;;  %4344 = vst.msk [vmem:[%s7570_s5 + $0x58] sm:$0xff] %vm4332_vm5, %v4271_v61  ;;  %v4039_v8 = vsel %vm3975_vm11, %v6651_v38, -inf  ;;  %5025 = vrcp.f32 %v3224_v52 }
 0x4ce   :  { %3517 = vmax.xlane.f32.xlu1 %v3516_v15  ;;  %3508 = vmax.xlane.f32.xlu0 %v3507_v18  ;;  %v4166_v18 = vsel %vm4105_vm12, %v6627_v34, -inf }
 0x4cf   :  { %v3352_v45 = vpop.xlane.xlu1 %3351  ;;  %v4283_v37 = vpop.xlane.xlu0 %4282 }
 0x4d0   :  { %3431 = vst.msk [vmem:[%s7570_s5 + $0x40] sm:$0xff] %vm3422_vm14, %v3352_v45  ;;  %v3228_v45 = vadd.f32 1.0, %v5020_v58 }
 0x4d1   :  { %4348 = vst.msk [vmem:[%s7570_s5 + $0x78] sm:$0xff] %vm4332_vm5, %v4283_v37  ;;  %v4157_v37 = vsel %vm4105_vm12, %v6636_v63, -inf }
 0x4d2   :  { %3635 = vmax.xlane.f32.xlu1 %v3634_v55  ;;  %3520 = vmax.xlane.f32.xlu0 %v3519_v54  ;;  %5027 = vrcp.f32 %v3228_v45 }
 0x4d3   :  { %v3364_v36 = vpop.xlane.xlu1 %3363  ;;  %v3355_v35 = vpop.xlane.xlu0 %3354  ;;  %5029 = vpow2.f32 %v4529_v60 }
 0x4d4   :  { %3435 = vst.msk [vmem:[%s7570_s5 + $0x60] sm:$0xff] %vm3422_vm14, %v3364_v36  ;;  %3432 = vst.msk [vmem:[%s7570_s5 + $0x48] sm:$0xff] %vm3422_vm14, %v3355_v35  ;;  %v4284_v36 = vsel %vm4235_vm13, %v6612_v5, -inf  ;;  %v5022_v35 = vpop.eup %5021  ;;  %5031 = vpow2.f32 %v4533_v23 }
 0x4d5   :  { %v6836_v5 = vmul.f32 %v5022_v35, %v6703_v40 }
 0x4d6   :  { %3647 = vmax.xlane.f32.xlu1 %v3646_v11  ;;  %3638 = vmax.xlane.f32.xlu0 %v3637_v16  ;;  %v4169_v11 = vsel %vm4105_vm12, %v6651_v38, -inf }
 0x4d7   :  { %v3482_v39 = vpop.xlane.xlu1 %3481  ;;  %v3367_v25 = vpop.xlane.xlu0 %3366 }
 0x4d8   :  { %3561 = vst.msk [vmem:[%s7570_s5 + $0x40] sm:$0xff] %vm3552_vm15, %v3482_v39 }
 0x4d9   :  { %3436 = vst.msk [vmem:[%s7570_s5 + $0x68] sm:$0xff] %vm3422_vm14, %v3367_v25  ;;  %v4296_v25 = vsel %vm4235_vm13, %v6627_v34, -inf }
 0x4da   :  { %3765 = vmax.xlane.f32.xlu1 %v3764_v21  ;;  %3650 = vmax.xlane.f32.xlu0 %v3649_v12  ;;  %v5024_v21 = vpop.eup %5023 }
 0x4db   :  { %v3494_v19 = vpop.xlane.xlu1 %3493  ;;  %v3485_v27 = vpop.xlane.xlu0 %3484  ;;  %v6851_v34 = vmul.f32 %v5024_v21, %v6720_v22 }
 0x4dc   :  { %3565 = vst.msk [vmem:[%s7570_s5 + $0x60] sm:$0xff] %vm3552_vm15, %v3494_v19  ;;  %3562 = vst.msk [vmem:[%s7570_s5 + $0x48] sm:$0xff] %vm3552_vm15, %v3485_v27  ;;  %v5026_v19 = vpop.eup %5025  ;;  %v3404_v27 = vsel %vm3325_vm6, %v6836_v5, -inf }
 0x4dd   :  { %v6860_v63 = vmul.f32 %v5026_v19, %v6730_v26  ;;  %v3546_v56 = vsel %vm3455_vm7, %v6851_v34, -inf  ;;  %v4066_v19 = vsel %vm3975_vm11, %v6851_v34, -inf }
 0x4de   :  { %3777 = vmax.xlane.f32.xlu1 %v3776_v17  ;;  %3768 = vmax.xlane.f32.xlu0 %v3767_v0  ;;  %v4299_v17 = vsel %vm4235_vm13, %v6651_v38, -inf  ;;  %v5028_v0 = vpop.eup %5027 }
 0x4df   :  { %v3612_v28 = vpop.xlane.xlu1 %3611  ;;  %v3497_v6 = vpop.xlane.xlu0 %3496  ;;  %v6875_v38 = vmul.f32 %v5028_v0, %v6748_v2  ;;  %v3407_v26 = vsel %vm3325_vm6, %v6860_v63, -inf  ;;  %v3667_v51 = vsel %vm3585_vm8, %v6860_v63, -inf  ;;  %v3797_v52 = vsel %vm3715_vm9, %v6860_v63, -inf }
 0x4e0   :  { %3691 = vst.msk [vmem:[%s7570_s5 + $0x40] sm:$0xff] %vm3682_vm0, %v3612_v28  ;;  %v3416_v28 = vsel %vm3325_vm6, %v6851_v34, -inf  ;;  %v4317_v60 = vsel %vm4235_vm13, %v6860_v63, -inf }
 0x4e1   :  { %3566 = vst.msk [vmem:[%s7570_s5 + $0x68] sm:$0xff] %vm3552_vm15, %v3497_v6  ;;  %v3419_v2 = vsel %vm3325_vm6, %v6875_v38, -inf  ;;  %v3679_v4 = vsel %vm3585_vm8, %v6875_v38, -inf }
 0x4e2   :  { %3895 = vmax.xlane.f32.xlu1 %v3894_v3  ;;  %3780 = vmax.xlane.f32.xlu0 %v3779_v43  ;;  %v3534_v3 = vsel %vm3455_vm7, %v6836_v5, -inf }
 0x4e3   :  { %v3624_v42 = vpop.xlane.xlu1 %3623  ;;  %v3615_v9 = vpop.xlane.xlu0 %3614 }
 0x4e4   :  { %3695 = vst.msk [vmem:[%s7570_s5 + $0x60] sm:$0xff] %vm3682_vm0, %v3624_v42  ;;  %3692 = vst.msk [vmem:[%s7570_s5 + $0x48] sm:$0xff] %vm3682_vm0, %v3615_v9  ;;  %v3537_v9 = vsel %vm3455_vm7, %v6860_v63, -inf }
 0x4e6   :  { %3907 = vmax.xlane.f32.xlu1 %v3906_v10  ;;  %3898 = vmax.xlane.f32.xlu0 %v3897_v49 }
 0x4e7   :  { %v3742_v14 = vpop.xlane.xlu1 %3741  ;;  %v3627_v46 = vpop.xlane.xlu0 %3626 }
 0x4e8   :  { %3821 = vst.msk [vmem:[%s7570_s5 + $0x40] sm:$0xff] %vm3812_vm1, %v3742_v14  ;;  %v3664_v14 = vsel %vm3585_vm8, %v6836_v5, -inf }
 0x4e9   :  { %3696 = vst.msk [vmem:[%s7570_s5 + $0x68] sm:$0xff] %vm3682_vm0, %v3627_v46  ;;  %v3549_v46 = vsel %vm3455_vm7, %v6875_v38, -inf }
 0x4ea   :  { %4025 = vmax.xlane.f32.xlu1 %v4024_v62  ;;  %3910 = vmax.xlane.f32.xlu0 %v3909_v31 }
 0x4eb   :  { %v3754_v13 = vpop.xlane.xlu1 %3753  ;;  %v3745_v48 = vpop.xlane.xlu0 %3744 }
 0x4ec   :  { %3825 = vst.msk [vmem:[%s7570_s5 + $0x60] sm:$0xff] %vm3812_vm1, %v3754_v13  ;;  %3822 = vst.msk [vmem:[%s7570_s5 + $0x48] sm:$0xff] %vm3812_vm1, %v3745_v48  ;;  %v3676_v13 = vsel %vm3585_vm8, %v6851_v34, -inf }
 0x4ee   :  { %4037 = vmax.xlane.f32.xlu1 %v4036_v47  ;;  %4028 = vmax.xlane.f32.xlu0 %v4027_v30  ;;  %v6942_v47 = vadd.f32 %v5535_v53, %v5794_v24  ;;  %v3794_v30 = vsel %vm3715_vm9, %v6836_v5, -inf  ;;  %v4534_v53 = vmul.f32 -1.442695, %v6960_v1 }
 0x4ef   :  { %v3872_v20 = vpop.xlane.xlu1 %3871  ;;  %v3757_v44 = vpop.xlane.xlu0 %3756 }
 0x4f0   :  { %3951 = vst.msk [vmem:[%s7570_s5 + $0x40] sm:$0xff] %vm3942_vm2, %v3872_v20  ;;  %v4530_v24 = vmul.f32 -1.442695, %v6942_v47 }
 0x4f1   :  { %3826 = vst.msk [vmem:[%s7570_s5 + $0x68] sm:$0xff] %vm3812_vm1, %v3757_v44 }
 0x4f2   :  { %4155 = vmax.xlane.f32.xlu1 %v4154_v29  ;;  %4040 = vmax.xlane.f32.xlu0 %v4039_v8  ;;  %v3806_v29 = vsel %vm3715_vm9, %v6851_v34, -inf  ;;  %5033 = vpow2.f32 %v4530_v24  ;;  %v3924_v8 = vsel %vm3845_vm10, %v6836_v5, -inf }
 0x4f3   :  { %v3884_v61 = vpop.xlane.xlu1 %3883  ;;  %v3875_v15 = vpop.xlane.xlu0 %3874  ;;  %5035 = vpow2.f32 %v4534_v53 }
 0x4f4   :  { %3955 = vst.msk [vmem:[%s7570_s5 + $0x60] sm:$0xff] %vm3942_vm2, %v3884_v61  ;;  %3952 = vst.msk [vmem:[%s7570_s5 + $0x48] sm:$0xff] %vm3942_vm2, %v3875_v15  ;;  %v3809_v61 = vsel %vm3715_vm9, %v6875_v38, -inf }
 0x4f6   :  { %4167 = vmax.xlane.f32.xlu1 %v4166_v18  ;;  %4158 = vmax.xlane.f32.xlu0 %v4157_v37  ;;  %v5030_v18 = vpop.eup %5029  ;;  %v3936_v37 = vsel %vm3845_vm10, %v6851_v34, -inf }
 0x4f7   :  { %v4002_v55 = vpop.xlane.xlu1 %4001  ;;  %v3887_v54 = vpop.xlane.xlu0 %3886 }
 0x4f8   :  { %4081 = vst.msk [vmem:[%s7570_s5 + $0x40] sm:$0xff] %vm4072_vm3, %v4002_v55  ;;  %v3927_v55 = vsel %vm3845_vm10, %v6860_v63, -inf  ;;  %v5032_v35 = vpop.eup %5031 }
 0x4f9   :  { %3956 = vst.msk [vmem:[%s7570_s5 + $0x68] sm:$0xff] %vm3942_vm2, %v3887_v54 }
 0x4fa   :  { %4285 = vmax.xlane.f32.xlu1 %v4284_v36  ;;  %4170 = vmax.xlane.f32.xlu0 %v4169_v11  ;;  %v3221_v36 = vadd.f32 1.0, %v5030_v18 }
 0x4fb   :  { %v4014_v16 = vpop.xlane.xlu1 %4013  ;;  %v4005_v39 = vpop.xlane.xlu0 %4004 }
 0x4fc   :  { %4085 = vst.msk [vmem:[%s7570_s5 + $0x60] sm:$0xff] %vm4072_vm3, %v4014_v16  ;;  %4082 = vst.msk [vmem:[%s7570_s5 + $0x48] sm:$0xff] %vm4072_vm3, %v4005_v39  ;;  %v4054_v16 = vsel %vm3975_vm11, %v6836_v5, -inf  ;;  %v5034_v39 = vpop.eup %5033  ;;  %5037 = vrcp.f32 %v3221_v36 }
 0x4fe   :  { %4297 = vmax.xlane.f32.xlu1 %v4296_v25  ;;  %4288 = vmax.xlane.f32.xlu0 %v4287_v59  ;;  %v3939_v25 = vsel %vm3845_vm10, %v6875_v38, -inf  ;;  %v3225_v59 = vadd.f32 1.0, %v5032_v35 }
 0x4ff   :  { %v4132_v12 = vpop.xlane.xlu1 %4131  ;;  %v4017_v40 = vpop.xlane.xlu0 %4016 }
 0x500   :  { %4211 = vst.msk [vmem:[%s7570_s5 + $0x40] sm:$0xff] %vm4202_vm4, %v4132_v12  ;;  %5039 = vrcp.f32 %v3225_v59 }
 0x501   :  { %4086 = vst.msk [vmem:[%s7570_s5 + $0x68] sm:$0xff] %vm4072_vm3, %v4017_v40  ;;  %v3222_v40 = vadd.f32 1.0, %v5034_v39 }
 0x502   :  { %3405 = vmax.xlane.f32.xlu1 %v3404_v27  ;;  %4300 = vmax.xlane.f32.xlu0 %v4299_v17  ;;  %v5036_v27 = vpop.eup %5035  ;;  %v4057_v17 = vsel %vm3975_vm11, %v6860_v63, -inf }
 0x503   :  { %v4144_v57 = vpop.xlane.xlu1 %4143  ;;  %v4135_v22 = vpop.xlane.xlu0 %4134  ;;  %5041 = vrcp.f32 %v3222_v40 }
 0x504   :  { %4215 = vst.msk [vmem:[%s7570_s5 + $0x60] sm:$0xff] %vm4202_vm4, %v4144_v57  ;;  %4212 = vst.msk [vmem:[%s7570_s5 + $0x48] sm:$0xff] %vm4202_vm4, %v4135_v22  ;;  %v4184_v22 = vsel %vm4105_vm12, %v6836_v5, -inf }
 0x506   :  { %3417 = vmax.xlane.f32.xlu1 %v3416_v28  ;;  %3408 = vmax.xlane.f32.xlu0 %v3407_v26  ;;  %v3226_v28 = vadd.f32 1.0, %v5036_v27  ;;  %v4069_v26 = vsel %vm3975_vm11, %v6875_v38, -inf }
 0x507   :  { %v4262_v7 = vpop.xlane.xlu1 %4261  ;;  %v4147_v6 = vpop.xlane.xlu0 %4146 }
 0x508   :  { %4341 = vst.msk [vmem:[%s7570_s5 + $0x40] sm:$0xff] %vm4332_vm5, %v4262_v7  ;;  %5043 = vrcp.f32 %v3226_v28 }
 0x509   :  { %4216 = vst.msk [vmem:[%s7570_s5 + $0x68] sm:$0xff] %vm4202_vm4, %v4147_v6 }
 0x50a   :  { %3535 = vmax.xlane.f32.xlu1 %v3534_v3  ;;  %3420 = vmax.xlane.f32.xlu0 %v3419_v2  ;;  %v4196_v3 = vsel %vm4105_vm12, %v6851_v34, -inf  ;;  %v5038_v2 = vpop.eup %5037 }
 0x50b   :  { %v4274_v43 = vpop.xlane.xlu1 %4273  ;;  %v4265_v42 = vpop.xlane.xlu0 %4264 }
 0x50c   :  { %4345 = vst.msk [vmem:[%s7570_s5 + $0x60] sm:$0xff] %vm4332_vm5, %v4274_v43  ;;  %4342 = vst.msk [vmem:[%s7570_s5 + $0x48] sm:$0xff] %vm4332_vm5, %v4265_v42  ;;  %v4187_v43 = vsel %vm4105_vm12, %v6860_v63, -inf }
 0x50e   :  { %3547 = vmax.xlane.f32.xlu1 %v3546_v56  ;;  %3538 = vmax.xlane.f32.xlu0 %v3537_v9  ;;  %v7048_v56 = vmul.f32 %v5038_v2, %v6915_v33 }
 0x50f   :  { %v3382_v10 = vpop.xlane.xlu1 %3381  ;;  %v4277_v49 = vpop.xlane.xlu0 %4276 }
 0x510   :  { %3441 = vst.msk [vmem:[%s7570_s5 + $0x90] sm:$0xff] %vm3422_vm14, %v3382_v10  ;;  %v4314_v10 = vsel %vm4235_vm13, %v6836_v5, -inf  ;;  %v3658_v53 = vsel %vm3585_vm8, %v7048_v56, -inf }
 0x511   :  { %4346 = vst.msk [vmem:[%s7570_s5 + $0x68] sm:$0xff] %vm4332_vm5, %v4277_v49  ;;  %v5040_v49 = vpop.eup %5039 }
 0x512   :  { %3665 = vmax.xlane.f32.xlu1 %v3664_v14  ;;  %3550 = vmax.xlane.f32.xlu0 %v3549_v46  ;;  %v4199_v14 = vsel %vm4105_vm12, %v6875_v38, -inf  ;;  %v7063_v5 = vmul.f32 %v5040_v49, %v6932_v32 }
 0x513   :  { %v3394_v62 = vpop.xlane.xlu1 %3393  ;;  %v3385_v31 = vpop.xlane.xlu0 %3384 }
 0x514   :  { %3445 = vst.msk [vmem:[%s7570_s5 + $0xb0] sm:$0xff] %vm3422_vm14, %v3394_v62  ;;  %3442 = vst.msk [vmem:[%s7570_s5 + $0x98] sm:$0xff] %vm3422_vm14, %v3385_v31  ;;  %v5042_v62 = vpop.eup %5041  ;;  %v3398_v31 = vsel %vm3325_vm6, %v7048_v56, -inf  ;;  %v3930_v40 = vsel %vm3845_vm10, %v7063_v5, -inf  ;;  %v4190_v49 = vsel %vm4105_vm12, %v7063_v5, -inf }
 0x516   :  { %3677 = vmax.xlane.f32.xlu1 %v3676_v13  ;;  %3668 = vmax.xlane.f32.xlu0 %v3667_v51  ;;  %v7072_v13 = vmul.f32 %v5042_v62, %v6942_v47 }
 0x517   :  { %v3512_v48 = vpop.xlane.xlu1 %3511  ;;  %v3397_v50 = vpop.xlane.xlu0 %3396 }
 0x518   :  { %3571 = vst.msk [vmem:[%s7570_s5 + $0x90] sm:$0xff] %vm3552_vm15, %v3512_v48  ;;  %v5044_v48 = vpop.eup %5043  ;;  %v3401_v47 = vsel %vm3325_vm6, %v7072_v13, -inf  ;;  %v3661_v18 = vsel %vm3585_vm8, %v7072_v13, -inf  ;;  %v3921_v27 = vsel %vm3845_vm10, %v7072_v13, -inf }
 0x519   :  { %3446 = vst.msk [vmem:[%s7570_s5 + $0xb8] sm:$0xff] %vm3422_vm14, %v3397_v50  ;;  %v3410_v50 = vsel %vm3325_vm6, %v7063_v5, -inf  ;;  %v7087_v63 = vmul.f32 %v5044_v48, %v6960_v1  ;;  %v4311_v48 = vsel %vm4235_vm13, %v7072_v13, -inf }
 0x51a   :  { %3795 = vmax.xlane.f32.xlu1 %v3794_v30  ;;  %3680 = vmax.xlane.f32.xlu0 %v3679_v4  ;;  %v3528_v4 = vsel %vm3455_vm7, %v7048_v56, -inf }
 0x51b   :  { %v3524_v20 = vpop.xlane.xlu1 %3523  ;;  %v3515_v44 = vpop.xlane.xlu0 %3514  ;;  %v3803_v59 = vsel %vm3715_vm9, %v7087_v63, -inf }
 0x51c   :  { %3575 = vst.msk [vmem:[%s7570_s5 + $0xb0] sm:$0xff] %vm3552_vm15, %v3524_v20  ;;  %3572 = vst.msk [vmem:[%s7570_s5 + $0x98] sm:$0xff] %vm3552_vm15, %v3515_v44  ;;  %v3413_v20 = vsel %vm3325_vm6, %v7087_v63, -inf  ;;  %v3540_v44 = vsel %vm3455_vm7, %v7063_v5, -inf }
 0x51e   :  { %3807 = vmax.xlane.f32.xlu1 %v3806_v29  ;;  %3798 = vmax.xlane.f32.xlu0 %v3797_v52  ;;  %v3531_v29 = vsel %vm3455_vm7, %v7072_v13, -inf }
 0x51f   :  { %v3642_v58 = vpop.xlane.xlu1 %3641  ;;  %v3527_v41 = vpop.xlane.xlu0 %3526 }
 0x520   :  { %3701 = vst.msk [vmem:[%s7570_s5 + $0x90] sm:$0xff] %vm3682_vm0, %v3642_v58 }
 0x521   :  { %3576 = vst.msk [vmem:[%s7570_s5 + $0xb8] sm:$0xff] %vm3552_vm15, %v3527_v41  ;;  %v3543_v41 = vsel %vm3455_vm7, %v7087_v63, -inf }
 0x522   :  { %3925 = vmax.xlane.f32.xlu1 %v3924_v8  ;;  %3810 = vmax.xlane.f32.xlu0 %v3809_v61 }
 0x523   :  { %v3654_v15 = vpop.xlane.xlu1 %3653  ;;  %v3645_v45 = vpop.xlane.xlu0 %3644 }
 0x524   :  { %3705 = vst.msk [vmem:[%s7570_s5 + $0xb0] sm:$0xff] %vm3682_vm0, %v3654_v15  ;;  %3702 = vst.msk [vmem:[%s7570_s5 + $0x98] sm:$0xff] %vm3682_vm0, %v3645_v45  ;;  %v3670_v15 = vsel %vm3585_vm8, %v7063_v5, -inf }
 0x526   :  { %3937 = vmax.xlane.f32.xlu1 %v3936_v37  ;;  %3928 = vmax.xlane.f32.xlu0 %v3927_v55  ;;  %v3788_v55 = vsel %vm3715_vm9, %v7048_v56, -inf }
 0x527   :  { %v3772_v54 = vpop.xlane.xlu1 %3771  ;;  %v3657_v11 = vpop.xlane.xlu0 %3656 }
 0x528   :  { %3831 = vst.msk [vmem:[%s7570_s5 + $0x90] sm:$0xff] %vm3812_vm1, %v3772_v54  ;;  %v3673_v54 = vsel %vm3585_vm8, %v7087_v63, -inf }
 0x529   :  { %3706 = vst.msk [vmem:[%s7570_s5 + $0xb8] sm:$0xff] %vm3682_vm0, %v3657_v11  ;;  %v3800_v11 = vsel %vm3715_vm9, %v7063_v5, -inf }
 0x52a   :  { %4055 = vmax.xlane.f32.xlu1 %v4054_v16  ;;  %3940 = vmax.xlane.f32.xlu0 %v3939_v25  ;;  %v3791_v16 = vsel %vm3715_vm9, %v7072_v13, -inf }
 0x52b   :  { %v3784_v21 = vpop.xlane.xlu1 %3783  ;;  %v3775_v12 = vpop.xlane.xlu0 %3774 }
 0x52c   :  { %3835 = vst.msk [vmem:[%s7570_s5 + $0xb0] sm:$0xff] %vm3812_vm1, %v3784_v21  ;;  %3832 = vst.msk [vmem:[%s7570_s5 + $0x98] sm:$0xff] %vm3812_vm1, %v3775_v12  ;;  %v3918_v21 = vsel %vm3845_vm10, %v7048_v56, -inf }
 0x52e   :  { %4067 = vmax.xlane.f32.xlu1 %v4066_v19  ;;  %4058 = vmax.xlane.f32.xlu0 %v4057_v17 }
 0x52f   :  { %v3902_v57 = vpop.xlane.xlu1 %3901  ;;  %v3787_v0 = vpop.xlane.xlu0 %3786 }
 0x530   :  { %3961 = vst.msk [vmem:[%s7570_s5 + $0x90] sm:$0xff] %vm3942_vm2, %v3902_v57 }
 0x531   :  { %3836 = vst.msk [vmem:[%s7570_s5 + $0xb8] sm:$0xff] %vm3812_vm1, %v3787_v0  ;;  %v4048_v0 = vsel %vm3975_vm11, %v7048_v56, -inf }
 0x532   :  { %4185 = vmax.xlane.f32.xlu1 %v4184_v22  ;;  %4070 = vmax.xlane.f32.xlu0 %v4069_v26  ;;  %v3933_v22 = vsel %vm3845_vm10, %v7087_v63, -inf }
 0x533   :  { %v3914_v7 = vpop.xlane.xlu1 %3913  ;;  %v3905_v6 = vpop.xlane.xlu0 %3904 }
 0x534   :  { %3965 = vst.msk [vmem:[%s7570_s5 + $0xb0] sm:$0xff] %vm3942_vm2, %v3914_v7  ;;  %3962 = vst.msk [vmem:[%s7570_s5 + $0x98] sm:$0xff] %vm3942_vm2, %v3905_v6  ;;  %v4060_v7 = vsel %vm3975_vm11, %v7063_v5, -inf  ;;  %v4051_v6 = vsel %vm3975_vm11, %v7072_v13, -inf }
 0x536   :  { %4197 = vmax.xlane.f32.xlu1 %v4196_v3  ;;  %4188 = vmax.xlane.f32.xlu0 %v4187_v43  ;;  %v4178_v43 = vsel %vm4105_vm12, %v7048_v56, -inf }
 0x537   :  { %v4032_v42 = vpop.xlane.xlu1 %4031  ;;  %v3917_v9 = vpop.xlane.xlu0 %3916 }
 0x538   :  { %4091 = vst.msk [vmem:[%s7570_s5 + $0x90] sm:$0xff] %vm4072_vm3, %v4032_v42  ;;  %v4063_v42 = vsel %vm3975_vm11, %v7087_v63, -inf }
 0x539   :  { %3966 = vst.msk [vmem:[%s7570_s5 + $0xb8] sm:$0xff] %vm3942_vm2, %v3917_v9 }
 0x53a   :  { %4315 = vmax.xlane.f32.xlu1 %v4314_v10  ;;  %4200 = vmax.xlane.f32.xlu0 %v4199_v14  ;;  %v4181_v14 = vsel %vm4105_vm12, %v7072_v13, -inf  ;;  %v4323_v13 = vsel %vm4235_vm13, %v7087_v63, -inf }
 0x53b   :  { %v4044_v46 = vpop.xlane.xlu1 %4043  ;;  %v4035_v33 = vpop.xlane.xlu0 %4034 }
 0x53c   :  { %4095 = vst.msk [vmem:[%s7570_s5 + $0xb0] sm:$0xff] %vm4072_vm3, %v4044_v46  ;;  %4092 = vst.msk [vmem:[%s7570_s5 + $0x98] sm:$0xff] %vm4072_vm3, %v4035_v33  ;;  %v4308_v33 = vsel %vm4235_vm13, %v7048_v56, -inf  ;;  %v4320_v56 = vsel %vm4235_vm13, %v7063_v5, -inf  ;;  %v4326_v5 = vsel %vm4235_vm13, %v6851_v34, -inf  ;;  %v4329_v34 = vsel %vm4235_vm13, %v6875_v38, -inf }
 0x53e   :  { %3399 = vmax.xlane.f32.xlu1 %v3398_v31  ;;  %4318 = vmax.xlane.f32.xlu0 %v4317_v60  ;;  %v4193_v31 = vsel %vm4105_vm12, %v7087_v63, -inf }
 0x53f   :  { %v4162_v51 = vpop.xlane.xlu1 %4161  ;;  %v4047_v32 = vpop.xlane.xlu0 %4046 }
 0x540   :  { %4221 = vst.msk [vmem:[%s7570_s5 + $0x90] sm:$0xff] %vm4202_vm4, %v4162_v51 }
 0x541   :  { %4096 = vst.msk [vmem:[%s7570_s5 + $0xb8] sm:$0xff] %vm4072_vm3, %v4047_v32 }
 0x542   :  { %3411 = vmax.xlane.f32.xlu1 %v3410_v50  ;;  %3402 = vmax.xlane.f32.xlu0 %v3401_v47 }
 0x543   :  { %v4174_v30 = vpop.xlane.xlu1 %4173  ;;  %v4165_v23 = vpop.xlane.xlu0 %4164 }
 0x544   :  { %4225 = vst.msk [vmem:[%s7570_s5 + $0xb0] sm:$0xff] %vm4202_vm4, %v4174_v30  ;;  %4222 = vst.msk [vmem:[%s7570_s5 + $0x98] sm:$0xff] %vm4202_vm4, %v4165_v23 }
 0x546   :  { %3529 = vmax.xlane.f32.xlu1 %v3528_v4  ;;  %3414 = vmax.xlane.f32.xlu0 %v3413_v20 }
 0x547   :  { %v4292_v24 = vpop.xlane.xlu1 %4291  ;;  %v4177_v1 = vpop.xlane.xlu0 %4176 }
 0x548   :  { %4351 = vst.msk [vmem:[%s7570_s5 + $0x90] sm:$0xff] %vm4332_vm5, %v4292_v24 }
 0x549   :  { %4226 = vst.msk [vmem:[%s7570_s5 + $0xb8] sm:$0xff] %vm4202_vm4, %v4177_v1 }
 0x54a   :  { %3541 = vmax.xlane.f32.xlu1 %v3540_v44  ;;  %3532 = vmax.xlane.f32.xlu0 %v3531_v29 }
 0x54b   :  { %v4304_v52 = vpop.xlane.xlu1 %4303  ;;  %v4295_v58 = vpop.xlane.xlu0 %4294 }
 0x54c   :  { %4355 = vst.msk [vmem:[%s7570_s5 + $0xb0] sm:$0xff] %vm4332_vm5, %v4304_v52  ;;  %4352 = vst.msk [vmem:[%s7570_s5 + $0x98] sm:$0xff] %vm4332_vm5, %v4295_v58 }
 0x54e   :  { %3659 = vmax.xlane.f32.xlu1 %v3658_v53  ;;  %3544 = vmax.xlane.f32.xlu0 %v3543_v41 }
 0x54f   :  { %v3376_v8 = vpop.xlane.xlu1 %3375  ;;  %v4307_v61 = vpop.xlane.xlu0 %4306 }
 0x550   :  { %3439 = vst.msk [vmem:[%s7570_s5 + $0x80] sm:$0xff] %vm3422_vm14, %v3376_v8 }
 0x551   :  { %4356 = vst.msk [vmem:[%s7570_s5 + $0xb8] sm:$0xff] %vm4332_vm5, %v4307_v61 }
 0x552   :  { %3671 = vmax.xlane.f32.xlu1 %v3670_v15  ;;  %3662 = vmax.xlane.f32.xlu0 %v3661_v18 }
 0x553   :  { %v3388_v45 = vpop.xlane.xlu1 %3387  ;;  %v3379_v37 = vpop.xlane.xlu0 %3378 }
 0x554   :  { %3443 = vst.msk [vmem:[%s7570_s5 + $0xa0] sm:$0xff] %vm3422_vm14, %v3388_v45  ;;  %3440 = vst.msk [vmem:[%s7570_s5 + $0x88] sm:$0xff] %vm3422_vm14, %v3379_v37 }
 0x556   :  { %3789 = vmax.xlane.f32.xlu1 %v3788_v55  ;;  %3674 = vmax.xlane.f32.xlu0 %v3673_v54 }
 0x557   :  { %v3506_v36 = vpop.xlane.xlu1 %3505  ;;  %v3391_v35 = vpop.xlane.xlu0 %3390 }
 0x558   :  { %3569 = vst.msk [vmem:[%s7570_s5 + $0x80] sm:$0xff] %vm3552_vm15, %v3506_v36 }
 0x559   :  { %3444 = vst.msk [vmem:[%s7570_s5 + $0xa8] sm:$0xff] %vm3422_vm14, %v3391_v35 }
 0x55a   :  { %3801 = vmax.xlane.f32.xlu1 %v3800_v11  ;;  %3792 = vmax.xlane.f32.xlu0 %v3791_v16 }
 0x55b   :  { %v3518_v39 = vpop.xlane.xlu1 %3517  ;;  %v3509_v25 = vpop.xlane.xlu0 %3508 }
 0x55c   :  { %3573 = vst.msk [vmem:[%s7570_s5 + $0xa0] sm:$0xff] %vm3552_vm15, %v3518_v39  ;;  %3570 = vst.msk [vmem:[%s7570_s5 + $0x88] sm:$0xff] %vm3552_vm15, %v3509_v25 }
 0x55e   :  { %3919 = vmax.xlane.f32.xlu1 %v3918_v21  ;;  %3804 = vmax.xlane.f32.xlu0 %v3803_v59 }
 0x55f   :  { %v3636_v12 = vpop.xlane.xlu1 %3635  ;;  %v3521_v19 = vpop.xlane.xlu0 %3520 }
 0x560   :  { %3699 = vst.msk [vmem:[%s7570_s5 + $0x80] sm:$0xff] %vm3682_vm0, %v3636_v12 }
 0x561   :  { %3574 = vst.msk [vmem:[%s7570_s5 + $0xa8] sm:$0xff] %vm3552_vm15, %v3521_v19 }
 0x562   :  { %3931 = vmax.xlane.f32.xlu1 %v3930_v40  ;;  %3922 = vmax.xlane.f32.xlu0 %v3921_v27 }
 0x563   :  { %v3648_v17 = vpop.xlane.xlu1 %3647  ;;  %v3639_v57 = vpop.xlane.xlu0 %3638 }
 0x564   :  { %3703 = vst.msk [vmem:[%s7570_s5 + $0xa0] sm:$0xff] %vm3682_vm0, %v3648_v17  ;;  %3700 = vst.msk [vmem:[%s7570_s5 + $0x88] sm:$0xff] %vm3682_vm0, %v3639_v57 }
 0x566   :  { %4049 = vmax.xlane.f32.xlu1 %v4048_v0  ;;  %3934 = vmax.xlane.f32.xlu0 %v3933_v22 }
 0x567   :  { %v3766_v28 = vpop.xlane.xlu1 %3765  ;;  %v3651_v26 = vpop.xlane.xlu0 %3650 }
 0x568   :  { %3829 = vst.msk [vmem:[%s7570_s5 + $0x80] sm:$0xff] %vm3812_vm1, %v3766_v28 }
 0x569   :  { %3704 = vst.msk [vmem:[%s7570_s5 + $0xa8] sm:$0xff] %vm3682_vm0, %v3651_v26 }
 0x56a   :  { %4061 = vmax.xlane.f32.xlu1 %v4060_v7  ;;  %4052 = vmax.xlane.f32.xlu0 %v4051_v6 }
 0x56b   :  { %v3778_v3 = vpop.xlane.xlu1 %3777  ;;  %v3769_v2 = vpop.xlane.xlu0 %3768 }
 0x56c   :  { %3833 = vst.msk [vmem:[%s7570_s5 + $0xa0] sm:$0xff] %vm3812_vm1, %v3778_v3  ;;  %3830 = vst.msk [vmem:[%s7570_s5 + $0x88] sm:$0xff] %vm3812_vm1, %v3769_v2 }
 0x56e   :  { %4179 = vmax.xlane.f32.xlu1 %v4178_v43  ;;  %4064 = vmax.xlane.f32.xlu0 %v4063_v42 }
 0x56f   :  { %v3896_v9 = vpop.xlane.xlu1 %3895  ;;  %v3781_v10 = vpop.xlane.xlu0 %3780 }
 0x570   :  { %3959 = vst.msk [vmem:[%s7570_s5 + $0x80] sm:$0xff] %vm3942_vm2, %v3896_v9 }
 0x571   :  { %3834 = vst.msk [vmem:[%s7570_s5 + $0xa8] sm:$0xff] %vm3812_vm1, %v3781_v10 }
 0x572   :  { %4191 = vmax.xlane.f32.xlu1 %v4190_v49  ;;  %4182 = vmax.xlane.f32.xlu0 %v4181_v14 }
 0x573   :  { %v3908_v46 = vpop.xlane.xlu1 %3907  ;;  %v3899_v62 = vpop.xlane.xlu0 %3898 }
 0x574   :  { %3963 = vst.msk [vmem:[%s7570_s5 + $0xa0] sm:$0xff] %vm3942_vm2, %v3908_v46  ;;  %3960 = vst.msk [vmem:[%s7570_s5 + $0x88] sm:$0xff] %vm3942_vm2, %v3899_v62 }
 0x576   :  { %4309 = vmax.xlane.f32.xlu1 %v4308_v33  ;;  %4194 = vmax.xlane.f32.xlu0 %v4193_v31 }
 0x577   :  { %v4026_v60 = vpop.xlane.xlu1 %4025  ;;  %v3911_v51 = vpop.xlane.xlu0 %3910 }
 0x578   :  { %4089 = vst.msk [vmem:[%s7570_s5 + $0x80] sm:$0xff] %vm4072_vm3, %v4026_v60 }
 0x579   :  { %3964 = vst.msk [vmem:[%s7570_s5 + $0xa8] sm:$0xff] %vm3942_vm2, %v3911_v51 }
 0x57a   :  { %4321 = vmax.xlane.f32.xlu1 %v4320_v56  ;;  %4312 = vmax.xlane.f32.xlu0 %v4311_v48 }
 0x57b   :  { %v4038_v32 = vpop.xlane.xlu1 %4037  ;;  %v4029_v50 = vpop.xlane.xlu0 %4028 }
 0x57c   :  { %4093 = vst.msk [vmem:[%s7570_s5 + $0xa0] sm:$0xff] %vm4072_vm3, %v4038_v32  ;;  %4090 = vst.msk [vmem:[%s7570_s5 + $0x88] sm:$0xff] %vm4072_vm3, %v4029_v50 }
 0x57e   :  { %4327 = vmax.xlane.f32.xlu1 %v4326_v5  ;;  %4324 = vmax.xlane.f32.xlu0 %v4323_v13 }
 0x57f   :  { %v4156_v47 = vpop.xlane.xlu1 %4155  ;;  %v4041_v30 = vpop.xlane.xlu0 %4040 }
 0x580   :  { %4219 = vst.msk [vmem:[%s7570_s5 + $0x80] sm:$0xff] %vm4202_vm4, %v4156_v47 }
 0x581   :  { %4094 = vst.msk [vmem:[%s7570_s5 + $0xa8] sm:$0xff] %vm4072_vm3, %v4041_v30 }
 0x582   :  { %4330 = vmax.xlane.f32.xlu0 %v4329_v34 }
 0x583   :  { %v4168_v23 = vpop.xlane.xlu1 %4167  ;;  %v4159_v63 = vpop.xlane.xlu0 %4158 }
 0x584   :  { %4223 = vst.msk [vmem:[%s7570_s5 + $0xa0] sm:$0xff] %vm4202_vm4, %v4168_v23  ;;  %4220 = vst.msk [vmem:[%s7570_s5 + $0x88] sm:$0xff] %vm4202_vm4, %v4159_v63 }
 0x587   :  { %v4286_v4 = vpop.xlane.xlu1 %4285  ;;  %v4171_v38 = vpop.xlane.xlu0 %4170 }
 0x588   :  { %4349 = vst.msk [vmem:[%s7570_s5 + $0x80] sm:$0xff] %vm4332_vm5, %v4286_v4 }
 0x589   :  { %4224 = vst.msk [vmem:[%s7570_s5 + $0xa8] sm:$0xff] %vm4202_vm4, %v4171_v38 }
 0x58b   :  { %v4298_v20 = vpop.xlane.xlu1 %4297  ;;  %v4289_v24 = vpop.xlane.xlu0 %4288 }
 0x58c   :  { %4353 = vst.msk [vmem:[%s7570_s5 + $0xa0] sm:$0xff] %vm4332_vm5, %v4298_v20  ;;  %4350 = vst.msk [vmem:[%s7570_s5 + $0x88] sm:$0xff] %vm4332_vm5, %v4289_v24 }
 0x58f   :  { %v3406_v1 = vpop.xlane.xlu1 %3405  ;;  %v4301_v44 = vpop.xlane.xlu0 %4300 }
 0x590   :  { %3449 = vst.msk [vmem:[%s7570_s5 + $0xd0] sm:$0xff] %vm3422_vm14, %v3406_v1 }
 0x591   :  { %4354 = vst.msk [vmem:[%s7570_s5 + $0xa8] sm:$0xff] %vm4332_vm5, %v4301_v44 }
 0x593   :  { %v3418_v29 = vpop.xlane.xlu1 %3417  ;;  %v3409_v52 = vpop.xlane.xlu0 %3408 }
 0x594   :  { %3453 = vst.msk [vmem:[%s7570_s5 + $0xf0] sm:$0xff] %vm3422_vm14, %v3418_v29  ;;  %3450 = vst.msk [vmem:[%s7570_s5 + $0xd8] sm:$0xff] %vm3422_vm14, %v3409_v52 }
 0x597   :  { %v3536_v58 = vpop.xlane.xlu1 %3535  ;;  %v3421_v53 = vpop.xlane.xlu0 %3420 }
 0x598   :  { %3579 = vst.msk [vmem:[%s7570_s5 + $0xd0] sm:$0xff] %vm3552_vm15, %v3536_v58 }
 0x599   :  { %3454 = vst.msk [vmem:[%s7570_s5 + $0xf8] sm:$0xff] %vm3422_vm14, %v3421_v53 }
 0x59b   :  { %v3548_v41 = vpop.xlane.xlu1 %3547  ;;  %v3539_v8 = vpop.xlane.xlu0 %3538 }
 0x59c   :  { %3583 = vst.msk [vmem:[%s7570_s5 + $0xf0] sm:$0xff] %vm3552_vm15, %v3548_v41  ;;  %3580 = vst.msk [vmem:[%s7570_s5 + $0xd8] sm:$0xff] %vm3552_vm15, %v3539_v8 }
 0x59f   :  { %v3666_v61 = vpop.xlane.xlu1 %3665  ;;  %v3551_v15 = vpop.xlane.xlu0 %3550 }
 0x5a0   :  { %3709 = vst.msk [vmem:[%s7570_s5 + $0xd0] sm:$0xff] %vm3682_vm0, %v3666_v61 }
 0x5a1   :  { %3584 = vst.msk [vmem:[%s7570_s5 + $0xf8] sm:$0xff] %vm3552_vm15, %v3551_v15 }
 0x5a3   :  { %v3678_v18 = vpop.xlane.xlu1 %3677  ;;  %v3669_v45 = vpop.xlane.xlu0 %3668 }
 0x5a4   :  { %3713 = vst.msk [vmem:[%s7570_s5 + $0xf0] sm:$0xff] %vm3682_vm0, %v3678_v18  ;;  %3710 = vst.msk [vmem:[%s7570_s5 + $0xd8] sm:$0xff] %vm3682_vm0, %v3669_v45 }
 0x5a7   :  { %v3796_v37 = vpop.xlane.xlu1 %3795  ;;  %v3681_v55 = vpop.xlane.xlu0 %3680 }
 0x5a8   :  { %3839 = vst.msk [vmem:[%s7570_s5 + $0xd0] sm:$0xff] %vm3812_vm1, %v3796_v37 }
 0x5a9   :  { %3714 = vst.msk [vmem:[%s7570_s5 + $0xf8] sm:$0xff] %vm3682_vm0, %v3681_v55 }
 0x5ab   :  { %v3808_v54 = vpop.xlane.xlu1 %3807  ;;  %v3799_v36 = vpop.xlane.xlu0 %3798 }
 0x5ac   :  { %3843 = vst.msk [vmem:[%s7570_s5 + $0xf0] sm:$0xff] %vm3812_vm1, %v3808_v54  ;;  %3840 = vst.msk [vmem:[%s7570_s5 + $0xd8] sm:$0xff] %vm3812_vm1, %v3799_v36 }
 0x5af   :  { %v3926_v35 = vpop.xlane.xlu1 %3925  ;;  %v3811_v11 = vpop.xlane.xlu0 %3810 }
 0x5b0   :  { %3969 = vst.msk [vmem:[%s7570_s5 + $0xd0] sm:$0xff] %vm3942_vm2, %v3926_v35 }
 0x5b1   :  { %3844 = vst.msk [vmem:[%s7570_s5 + $0xf8] sm:$0xff] %vm3812_vm1, %v3811_v11 }
 0x5b3   :  { %v3938_v16 = vpop.xlane.xlu1 %3937  ;;  %v3929_v39 = vpop.xlane.xlu0 %3928 }
 0x5b4   :  { %3973 = vst.msk [vmem:[%s7570_s5 + $0xf0] sm:$0xff] %vm3942_vm2, %v3938_v16  ;;  %3970 = vst.msk [vmem:[%s7570_s5 + $0xd8] sm:$0xff] %vm3942_vm2, %v3929_v39 }
 0x5b7   :  { %v4056_v25 = vpop.xlane.xlu1 %4055  ;;  %v3941_v21 = vpop.xlane.xlu0 %3940 }
 0x5b8   :  { %4099 = vst.msk [vmem:[%s7570_s5 + $0xd0] sm:$0xff] %vm4072_vm3, %v4056_v25 }
 0x5b9   :  { %3974 = vst.msk [vmem:[%s7570_s5 + $0xf8] sm:$0xff] %vm3942_vm2, %v3941_v21 }
 0x5bb   :  { %v4068_v59 = vpop.xlane.xlu1 %4067  ;;  %v4059_v12 = vpop.xlane.xlu0 %4058 }
 0x5bc   :  { %4103 = vst.msk [vmem:[%s7570_s5 + $0xf0] sm:$0xff] %vm4072_vm3, %v4068_v59  ;;  %4100 = vst.msk [vmem:[%s7570_s5 + $0xd8] sm:$0xff] %vm4072_vm3, %v4059_v12 }
 0x5bf   :  { %v4186_v19 = vpop.xlane.xlu1 %4185  ;;  %v4071_v40 = vpop.xlane.xlu0 %4070 }
 0x5c0   :  { %4229 = vst.msk [vmem:[%s7570_s5 + $0xd0] sm:$0xff] %vm4202_vm4, %v4186_v19 }
 0x5c1   :  { %4104 = vst.msk [vmem:[%s7570_s5 + $0xf8] sm:$0xff] %vm4072_vm3, %v4071_v40 }
 0x5c3   :  { %v4198_v27 = vpop.xlane.xlu1 %4197  ;;  %v4189_v17 = vpop.xlane.xlu0 %4188 }
 0x5c4   :  { %4233 = vst.msk [vmem:[%s7570_s5 + $0xf0] sm:$0xff] %vm4202_vm4, %v4198_v27  ;;  %4230 = vst.msk [vmem:[%s7570_s5 + $0xd8] sm:$0xff] %vm4202_vm4, %v4189_v17 }
 0x5c7   :  { %v4316_v57 = vpop.xlane.xlu1 %4315  ;;  %v4201_v0 = vpop.xlane.xlu0 %4200 }
 0x5c8   :  { %4359 = vst.msk [vmem:[%s7570_s5 + $0xd0] sm:$0xff] %vm4332_vm5, %v4316_v57 }
 0x5c9   :  { %4234 = vst.msk [vmem:[%s7570_s5 + $0xf8] sm:$0xff] %vm4202_vm4, %v4201_v0 }
 0x5cb   :  { %v3400_v22 = vpop.xlane.xlu1 %3399  ;;  %v4319_v28 = vpop.xlane.xlu0 %4318 }
 0x5cc   :  { %3447 = vst.msk [vmem:[%s7570_s5 + $0xc0] sm:$0xff] %vm3422_vm14, %v3400_v22 }
 0x5cd   :  { %4360 = vst.msk [vmem:[%s7570_s5 + $0xd8] sm:$0xff] %vm4332_vm5, %v4319_v28 }
 0x5cf   :  { %v3412_v26 = vpop.xlane.xlu1 %3411  ;;  %v3403_v7 = vpop.xlane.xlu0 %3402 }
 0x5d0   :  { %3451 = vst.msk [vmem:[%s7570_s5 + $0xe0] sm:$0xff] %vm3422_vm14, %v3412_v26  ;;  %3448 = vst.msk [vmem:[%s7570_s5 + $0xc8] sm:$0xff] %vm3422_vm14, %v3403_v7 }
 0x5d3   :  { %v3530_v6 = vpop.xlane.xlu1 %3529  ;;  %v3415_v3 = vpop.xlane.xlu0 %3414 }
 0x5d4   :  { %3577 = vst.msk [vmem:[%s7570_s5 + $0xc0] sm:$0xff] %vm3552_vm15, %v3530_v6 }
 0x5d5   :  { %3452 = vst.msk [vmem:[%s7570_s5 + $0xe8] sm:$0xff] %vm3422_vm14, %v3415_v3 }
 0x5d7   :  { %v3542_v2 = vpop.xlane.xlu1 %3541  ;;  %v3533_v43 = vpop.xlane.xlu0 %3532 }
 0x5d8   :  { %3581 = vst.msk [vmem:[%s7570_s5 + $0xe0] sm:$0xff] %vm3552_vm15, %v3542_v2  ;;  %3578 = vst.msk [vmem:[%s7570_s5 + $0xc8] sm:$0xff] %vm3552_vm15, %v3533_v43 }
 0x5db   :  { %v3660_v42 = vpop.xlane.xlu1 %3659  ;;  %v3545_v9 = vpop.xlane.xlu0 %3544 }
 0x5dc   :  { %3707 = vst.msk [vmem:[%s7570_s5 + $0xc0] sm:$0xff] %vm3682_vm0, %v3660_v42 }
 0x5dd   :  { %3582 = vst.msk [vmem:[%s7570_s5 + $0xe8] sm:$0xff] %vm3552_vm15, %v3545_v9 }
 0x5df   :  { %v3672_v10 = vpop.xlane.xlu1 %3671  ;;  %v3663_v49 = vpop.xlane.xlu0 %3662 }
 0x5e0   :  { %3711 = vst.msk [vmem:[%s7570_s5 + $0xe0] sm:$0xff] %vm3682_vm0, %v3672_v10  ;;  %3708 = vst.msk [vmem:[%s7570_s5 + $0xc8] sm:$0xff] %vm3682_vm0, %v3663_v49 }
 0x5e3   :  { %v3790_v14 = vpop.xlane.xlu1 %3789  ;;  %v3675_v46 = vpop.xlane.xlu0 %3674 }
 0x5e4   :  { %3837 = vst.msk [vmem:[%s7570_s5 + $0xc0] sm:$0xff] %vm3812_vm1, %v3790_v14 }
 0x5e5   :  { %3712 = vst.msk [vmem:[%s7570_s5 + $0xe8] sm:$0xff] %vm3682_vm0, %v3675_v46 }
 0x5e7   :  { %v3802_v62 = vpop.xlane.xlu1 %3801  ;;  %v3793_v33 = vpop.xlane.xlu0 %3792 }
 0x5e8   :  { %3841 = vst.msk [vmem:[%s7570_s5 + $0xe0] sm:$0xff] %vm3812_vm1, %v3802_v62  ;;  %3838 = vst.msk [vmem:[%s7570_s5 + $0xc8] sm:$0xff] %vm3812_vm1, %v3793_v33 }
 0x5eb   :  { %v3920_v31 = vpop.xlane.xlu1 %3919  ;;  %v3805_v60 = vpop.xlane.xlu0 %3804 }
 0x5ec   :  { %3967 = vst.msk [vmem:[%s7570_s5 + $0xc0] sm:$0xff] %vm3942_vm2, %v3920_v31 }
 0x5ed   :  { %3842 = vst.msk [vmem:[%s7570_s5 + $0xe8] sm:$0xff] %vm3812_vm1, %v3805_v60 }
 0x5ef   :  { %v3932_v51 = vpop.xlane.xlu1 %3931  ;;  %v3923_v56 = vpop.xlane.xlu0 %3922 }
 0x5f0   :  { %3971 = vst.msk [vmem:[%s7570_s5 + $0xe0] sm:$0xff] %vm3942_vm2, %v3932_v51  ;;  %3968 = vst.msk [vmem:[%s7570_s5 + $0xc8] sm:$0xff] %vm3942_vm2, %v3923_v56 }
 0x5f3   :  { %v4050_v48 = vpop.xlane.xlu1 %4049  ;;  %v3935_v32 = vpop.xlane.xlu0 %3934 }
 0x5f4   :  { %4097 = vst.msk [vmem:[%s7570_s5 + $0xc0] sm:$0xff] %vm4072_vm3, %v4050_v48 }
 0x5f5   :  { %3972 = vst.msk [vmem:[%s7570_s5 + $0xe8] sm:$0xff] %vm3942_vm2, %v3935_v32 }
 0x5f7   :  { %v4062_v50 = vpop.xlane.xlu1 %4061  ;;  %v4053_v5 = vpop.xlane.xlu0 %4052 }
 0x5f8   :  { %4101 = vst.msk [vmem:[%s7570_s5 + $0xe0] sm:$0xff] %vm4072_vm3, %v4062_v50  ;;  %4098 = vst.msk [vmem:[%s7570_s5 + $0xc8] sm:$0xff] %vm4072_vm3, %v4053_v5 }
 0x5fb   :  { %v4180_v13 = vpop.xlane.xlu1 %4179  ;;  %v4065_v47 = vpop.xlane.xlu0 %4064 }
 0x5fc   :  { %4227 = vst.msk [vmem:[%s7570_s5 + $0xc0] sm:$0xff] %vm4202_vm4, %v4180_v13 }
 0x5fd   :  { %4102 = vst.msk [vmem:[%s7570_s5 + $0xe8] sm:$0xff] %vm4072_vm3, %v4065_v47 }
 0x5ff   :  { %v4192_v30 = vpop.xlane.xlu1 %4191  ;;  %v4183_v34 = vpop.xlane.xlu0 %4182 }
 0x600   :  { %4231 = vst.msk [vmem:[%s7570_s5 + $0xe0] sm:$0xff] %vm4202_vm4, %v4192_v30  ;;  %4228 = vst.msk [vmem:[%s7570_s5 + $0xc8] sm:$0xff] %vm4202_vm4, %v4183_v34 }
 0x603   :  { %v4310_v23 = vpop.xlane.xlu1 %4309  ;;  %v4195_v63 = vpop.xlane.xlu0 %4194 }
 0x604   :  { %4357 = vst.msk [vmem:[%s7570_s5 + $0xc0] sm:$0xff] %vm4332_vm5, %v4310_v23 }
 0x605   :  { %4232 = vst.msk [vmem:[%s7570_s5 + $0xe8] sm:$0xff] %vm4202_vm4, %v4195_v63 }
 0x607   :  { %v4322_v4 = vpop.xlane.xlu1 %4321  ;;  %v4313_v38 = vpop.xlane.xlu0 %4312 }
 0x608   :  { %4361 = vst.msk [vmem:[%s7570_s5 + $0xe0] sm:$0xff] %vm4332_vm5, %v4322_v4  ;;  %4358 = vst.msk [vmem:[%s7570_s5 + $0xc8] sm:$0xff] %vm4332_vm5, %v4313_v38 }
 0x60b   :  { %v4328_v20 = vpop.xlane.xlu1 %4327  ;;  %v4325_v24 = vpop.xlane.xlu0 %4324 }
 0x60c   :  { %4363 = vst.msk [vmem:[%s7570_s5 + $0xf0] sm:$0xff] %vm4332_vm5, %v4328_v20  ;;  %4362 = vst.msk [vmem:[%s7570_s5 + $0xe8] sm:$0xff] %vm4332_vm5, %v4325_v24 }
 0x60f   :  { %v4331_v1 = vpop.xlane.xlu0 %4330 }
 0x610   :  { %4364 = vst.msk [vmem:[%s7570_s5 + $0xf8] sm:$0xff] %vm4332_vm5, %v4331_v1 }

</bundles_post_ra>
